<compile_context>
chip_gen: v7x
topology: tpu7x:2x2x1
jax: 0.10.0
libtpu: 0.0.40
codegen_flags: <defaults>
</compile_context>

<pallas_src>
import jax
import jax.numpy as jnp
from jax.experimental import pallas as pl
from jax.experimental.pallas import tpu as pltpu


def _make_fused_conv_kernel(W, Cin, CmidP, Cout, TH, nT, compute_dtype):
    """Builds the fused (conv3x3 -> conv3x3) kernel specialized on static shapes."""

    def kernel(x_ref, w1_ref, b1_ref, w2_ref, b2_ref, o_ref, xbuf, mbuf):
        # x_ref : (1, H, W, Cin)      full image of this batch element (stays resident in
        #                             VMEM across the inner row-tile grid axis)
        # w1_ref: (3, 3, Cin, CmidP)  conv1 weights, out-channels zero-padded to CmidP
        # b1_ref: (1, CmidP)          conv1 bias (f32), zero-padded
        # w2_ref: (3, 3, CmidP, Cout) conv2 weights, in-channels zero-padded to CmidP
        # b2_ref: (1, Cout)           conv2 bias (f32)
        # o_ref : (1, TH, W, Cout)    output row tile
        # xbuf  : (TH+4, W+2, Cin)    zero-bordered input rows for this tile (scratch)
        # mbuf  : (TH+2, W+2, CmidP)  zero-bordered conv1 activation, lane-dense (scratch)
        t = pl.program_id(1)
        r0 = t * TH
        cdt = compute_dtype

        # ---- Stage 0: gather input rows [r0-2, r0+TH+2) into xbuf, zero the halo. ----
        # Left / right 'same'-padding columns (image cols -1 and W) -- re-zeroed every
        # step so no cross-step scratch state is relied upon (megacore-safe).
        zcol = jnp.zeros((TH + 4, 1, Cin), cdt)
        xbuf[:, 0:1, :] = zcol
        xbuf[:, W + 1:W + 2, :] = zcol

        ztop = jnp.zeros((2, W + 2, Cin), cdt)
        if nT == 1:
            xbuf[0:2, :, :] = ztop
            xbuf[TH + 2:TH + 4, :, :] = ztop
            xbuf[2:TH + 2, 1:W + 1, :] = x_ref[0].astype(cdt)
        else:
            @pl.when(t == 0)
            def _():
                xbuf[0:2, :, :] = ztop
                xbuf[2:TH + 4, 1:W + 1, :] = x_ref[0, 0:TH + 2, :, :].astype(cdt)

            @pl.when(t == nT - 1)
            def _():
                xbuf[TH + 2:TH + 4, :, :] = ztop
                xbuf[0:TH + 2, 1:W + 1, :] = (
                    x_ref[0, pl.ds(r0 - 2, TH + 2), :, :].astype(cdt))

            if nT > 2:
                @pl.when((t > 0) & (t < nT - 1))
                def _():
                    xbuf[0:TH + 4, 1:W + 1, :] = (
                        x_ref[0, pl.ds(r0 - 2, TH + 4), :, :].astype(cdt))

        def conv3x3(src_ref, n_rows, w_ref, cout):
            # src_ref: (n_rows + 2, W + 2, cin), zero-bordered.  Returns the 'same' 3x3
            # conv of its interior as (n_rows, W, cout) float32: 9 shifted
            # (n_rows*W, cin) x (cin, cout) MXU matmuls with f32 accumulation.  The
            # leading-dim reshape is layout-free; only the kw sublane shift relayouts
            # (could be moved to the XLU with pltpu.roll — kept as slices for robustness).
            cin = src_ref.shape[-1]
            acc = jnp.zeros((n_rows * W, cout), jnp.float32)
            for kh in range(3):
                for kw in range(3):
                    lhs = src_ref[kh:kh + n_rows, kw:kw + W, :]
                    acc = acc + jnp.dot(
                        lhs.reshape(n_rows * W, cin), w_ref[kh, kw],
                        preferred_element_type=jnp.float32)
            return acc.reshape(n_rows, W, cout)

        # ---- Stage 1: conv1 over the tile plus one halo row on each side -> mbuf. ----
        mid = conv3x3(xbuf, TH + 2, w1_ref, CmidP) + b1_ref[0, :]
        mbuf[:, 1:W + 1, :] = mid.astype(cdt)

        # conv2's own 'same'-padding halo inside mbuf: border columns always zero, the
        # top/bottom halo row is zero only where it falls outside the image.
        zcol2 = jnp.zeros((TH + 2, 1, CmidP), cdt)
        mbuf[:, 0:1, :] = zcol2
        mbuf[:, W + 1:W + 2, :] = zcol2
        zrow2 = jnp.zeros((1, W + 2, CmidP), cdt)
        if nT == 1:
            mbuf[0:1, :, :] = zrow2
            mbuf[TH + 1:TH + 2, :, :] = zrow2
        else:
            @pl.when(t == 0)
            def _():
                mbuf[0:1, :, :] = zrow2

            @pl.when(t == nT - 1)
            def _():
                mbuf[TH + 1:TH + 2, :, :] = zrow2

        # ---- Stage 2: conv2 over the tile; single store of the output block. ----
        out = conv3x3(mbuf, TH, w2_ref, Cout) + b2_ref[0, :]
        o_ref[...] = out[None].astype(o_ref.dtype)

    return kernel


def conv_final_forward(x_nchw, params, *, tile_h=8, compute_dtype=jnp.bfloat16):
    """Reproduces CONV_FINAL.forward. x_nchw: (N, Cin, H, W) -> (N, Cout, H, W)."""
    w1, b1, w2, b2 = params
    N, Cin, H, W = x_nchw.shape
    Cout = w1.shape[3]

    if H % tile_h != 0:          # keep row tiles exact; fall back to whole-image rows
        tile_h = H
    TH = tile_h
    nT = H // TH

    LANE = 128
    CmidP = ((Cout + LANE - 1) // LANE) * LANE   # lane-dense intermediate channels

    # NCHW -> NHWC (channels-last is the lane-dense layout for the kernel).
    # TODO(synk): at real UNet sizes, also row-tile the *input* block (halo via manual
    # make_async_copy from pl.ANY) instead of keeping the whole image resident per batch.
    x = jnp.transpose(x_nchw, (0, 2, 3, 1))

    cdt = compute_dtype
    w1p = jnp.zeros((3, 3, Cin, CmidP), cdt).at[:, :, :, :Cout].set(w1.astype(cdt))
    b1p = jnp.zeros((1, CmidP), jnp.float32).at[0, :Cout].set(b1.astype(jnp.float32))
    w2p = jnp.zeros((3, 3, CmidP, Cout), cdt).at[:, :, :Cout, :].set(w2.astype(cdt))
    b2p = b2.astype(jnp.float32).reshape(1, Cout)

    kernel = _make_fused_conv_kernel(W, Cin, CmidP, Cout, TH, nT, cdt)

    out_nhwc = pl.pallas_call(
        kernel,
        out_shape=jax.ShapeDtypeStruct((N, H, W, Cout), x_nchw.dtype),
        grid=(N, nT),
        in_specs=[
            # Full image per batch element; the block index ignores t, so Pallas keeps it
            # resident in VMEM across the nT inner row-tile steps (one HBM read per n).
            pl.BlockSpec((1, H, W, Cin), lambda n, t: (n, 0, 0, 0)),
            # NOTE: the constant-index weight/bias blocks could additionally be
            # single-buffered (pipeline_mode=pl.Buffered(1)) to halve their VMEM.
            pl.BlockSpec((3, 3, Cin, CmidP), lambda n, t: (0, 0, 0, 0)),
            pl.BlockSpec((1, CmidP), lambda n, t: (0, 0)),
            pl.BlockSpec((3, 3, CmidP, Cout), lambda n, t: (0, 0, 0, 0)),
            pl.BlockSpec((1, Cout), lambda n, t: (0, 0)),
        ],
        out_specs=pl.BlockSpec((1, TH, W, Cout), lambda n, t: (n, t, 0, 0)),
        scratch_shapes=[
            pltpu.VMEM((TH + 4, W + 2, Cin), cdt),      # zero-bordered input rows
            pltpu.VMEM((TH + 2, W + 2, CmidP), cdt),    # fused intermediate activation
        ],
        compiler_params=pltpu.CompilerParams(
            dimension_semantics=("parallel", "parallel"),
            vmem_limit_bytes=32 * 1024 * 1024,
        ),
    )(x, w1p, b1p, w2p, b2p)

    return jnp.transpose(out_nhwc, (0, 3, 1, 2))     # NHWC -> NCHW


def init_params(key, in_ch, out_ch, filter_sz=3, dtype=jnp.float32):
    """Deterministic synthetic init (PyTorch-style uniform fan-in bound)."""
    k1, k2, k3, k4 = jax.random.split(key, 4)
    bound1 = 1.0 / (in_ch * filter_sz * filter_sz) ** 0.5
    bound2 = 1.0 / (out_ch * filter_sz * filter_sz) ** 0.5
    w1 = jax.random.uniform(k1, (filter_sz, filter_sz, in_ch, out_ch),
                            minval=-bound1, maxval=bound1, dtype=dtype)
    b1 = jax.random.uniform(k2, (out_ch,), minval=-bound1, maxval=bound1, dtype=dtype)
    w2 = jax.random.uniform(k3, (filter_sz, filter_sz, out_ch, out_ch),
                            minval=-bound2, maxval=bound2, dtype=dtype)
    b2 = jax.random.uniform(k4, (out_ch,), minval=-bound2, maxval=bound2, dtype=dtype)
    return (w1, b1, w2, b2)


def reference_forward(x_nchw, params, compute_dtype=jnp.float32):
    """Pure-JAX reference (lax conv, NCHW) with the same mixed-precision policy."""
    w1, b1, w2, b2 = params

    def conv(x, w, b):
        w_oihw = jnp.transpose(w, (3, 2, 0, 1)).astype(compute_dtype)
        y = jax.lax.conv_general_dilated(
            x.astype(compute_dtype), w_oihw, window_strides=(1, 1), padding="SAME",
            dimension_numbers=("NCHW", "OIHW", "NCHW"),
            preferred_element_type=jnp.float32)
        return y + b.astype(jnp.float32)[None, :, None, None]

    y1 = conv(x_nchw, w1, b1).astype(compute_dtype)   # matches the kernel's VMEM mid
    y2 = conv(y1, w2, b2)
    return y2.astype(x_nchw.dtype)


if __name__ == "__main__":
    key = jax.random.PRNGKey(0)
    k_x, k_p = jax.random.split(key)

    N, in_ch, out_ch, H, W = 2, 4, 8, 16, 16
    x = jax.random.normal(k_x, (N, in_ch, H, W), dtype=jnp.float32)
    params = init_params(k_p, in_ch, out_ch)

    # bf16 MXU path (production default); tile_h=4 exercises first/interior/last tiles.
    out_bf16 = jax.block_until_ready(
        conv_final_forward(x, params, tile_h=4, compute_dtype=jnp.bfloat16))
    ref_bf16 = reference_forward(x, params, compute_dtype=jnp.bfloat16)
    assert out_bf16.shape == (N, out_ch, H, W)
    assert jnp.allclose(out_bf16, ref_bf16, atol=5e-3, rtol=5e-3)

    # f32 path: exactness check of the fused conv structure itself (two row tiles).
    out_f32 = jax.block_until_ready(
        conv_final_forward(x, params, tile_h=8, compute_dtype=jnp.float32))
    ref_f32 = reference_forward(x, params, compute_dtype=jnp.float32)
    assert jnp.allclose(out_f32, ref_f32, atol=1e-4, rtol=1e-4)

    # Single-row-tile path (nT == 1).
    out_one = jax.block_until_ready(
        conv_final_forward(x, params, tile_h=16, compute_dtype=jnp.bfloat16))
    assert jnp.allclose(out_one, ref_bf16, atol=5e-3, rtol=5e-3)

    print("KERNEL_OK")
</pallas_src>

<mosaic_0001>
module attributes {stable_mosaic.version = 11 : i64} {
  func.func @kernel(%arg0: i32, %arg1: i32, %arg2: memref<1x16x16x4xf32, #tpu.memory_space<vmem>>, %arg3: memref<3x3x4x128xbf16, #tpu.memory_space<vmem>>, %arg4: memref<1x128xf32, #tpu.memory_space<vmem>>, %arg5: memref<3x3x128x8xbf16, #tpu.memory_space<vmem>>, %arg6: memref<1x8xf32, #tpu.memory_space<vmem>>, %arg7: memref<1x4x16x8xf32, #tpu.memory_space<vmem>>, %arg8: memref<8x18x4xbf16, #tpu.memory_space<vmem>>, %arg9: memref<6x18x128xbf16, #tpu.memory_space<vmem>>) attributes {dimension_semantics = [#tpu.dimension_semantics<parallel>, #tpu.dimension_semantics<parallel>], iteration_bounds = array<i64: 2, 4>, scalar_prefetch = 0 : i64, scratch_operands = 2 : i64, tpu.core_type = #tpu.core_type<tc>, window_params = [{transform_indices = @transform_0, window_bounds = array<i64: 1, 16, 16, 4>}, {pipeline_mode = #tpu.pipeline_mode<synchronous>, transform_indices = @transform_1, window_bounds = array<i64: 3, 3, 4, 128>}, {pipeline_mode = #tpu.pipeline_mode<synchronous>, transform_indices = @transform_2, window_bounds = array<i64: 1, 128>}, {pipeline_mode = #tpu.pipeline_mode<synchronous>, transform_indices = @transform_3, window_bounds = array<i64: 3, 3, 128, 8>}, {pipeline_mode = #tpu.pipeline_mode<synchronous>, transform_indices = @transform_4, window_bounds = array<i64: 1, 8>}, {transform_indices = @transform_5, window_bounds = array<i64: 1, 4, 16, 8>}]} {
    %c4_i32 = arith.constant 4 : i32
    %0 = arith.muli %arg1, %c4_i32 : i32
    %cst = arith.constant 0.000000e+00 : bf16
    %1 = vector.broadcast %cst : bf16 to vector<8x1x4xbf16>
    %c0 = arith.constant 0 : index
    %c0_0 = arith.constant 0 : index
    %c0_1 = arith.constant 0 : index
    %2 = vector.load %arg8[%c0, %c0_0, %c0_1] : memref<8x18x4xbf16, #tpu.memory_space<vmem>>, vector<8x1x4xbf16>
    tpu.vector_store %arg8[%c0, %c0_0, %c0_1], %1 {strides = array<i32>} : memref<8x18x4xbf16, #tpu.memory_space<vmem>>, vector<8x1x4xbf16>,
    %c0_2 = arith.constant 0 : index
    %c17 = arith.constant 17 : index
    %c0_3 = arith.constant 0 : index
    %3 = vector.load %arg8[%c0_2, %c17, %c0_3] : memref<8x18x4xbf16, #tpu.memory_space<vmem>>, vector<8x1x4xbf16>
    tpu.vector_store %arg8[%c0_2, %c17, %c0_3], %1 {strides = array<i32>} : memref<8x18x4xbf16, #tpu.memory_space<vmem>>, vector<8x1x4xbf16>,
    %cst_4 = arith.constant 0.000000e+00 : bf16
    %4 = vector.broadcast %cst_4 : bf16 to vector<2x18x4xbf16>
    %c0_i32 = arith.constant 0 : i32
    %5 = arith.cmpi eq, %arg1, %c0_i32 : i32
    %6 = arith.extui %5 : i1 to i32
    %c0_i32_5 = arith.constant 0 : i32
    %7 = arith.cmpi ne, %6, %c0_i32_5 : i32
    scf.if %7 {
      %c0_177 = arith.constant 0 : index
      %c0_178 = arith.constant 0 : index
      %c0_179 = arith.constant 0 : index
      %152 = vector.load %arg8[%c0_177, %c0_178, %c0_179] : memref<8x18x4xbf16, #tpu.memory_space<vmem>>, vector<2x18x4xbf16>
      tpu.vector_store %arg8[%c0_177, %c0_178, %c0_179], %4 {strides = array<i32>} : memref<8x18x4xbf16, #tpu.memory_space<vmem>>, vector<2x18x4xbf16>,
      %c0_180 = arith.constant 0 : index
      %c0_181 = arith.constant 0 : index
      %c0_182 = arith.constant 0 : index
      %c0_183 = arith.constant 0 : index
      %153 = vector.load %arg2[%c0_180, %c0_181, %c0_182, %c0_183] : memref<1x16x16x4xf32, #tpu.memory_space<vmem>>, vector<1x6x16x4xf32>
      %154 = vector.shape_cast %153 : vector<1x6x16x4xf32> to vector<6x16x4xf32>
      %155 = arith.truncf %154 : vector<6x16x4xf32> to vector<6x16x4xbf16>
      %c2_184 = arith.constant 2 : index
      %c1_185 = arith.constant 1 : index
      %c0_186 = arith.constant 0 : index
      %156 = vector.load %arg8[%c2_184, %c1_185, %c0_186] : memref<8x18x4xbf16, #tpu.memory_space<vmem>>, vector<6x16x4xbf16>
      tpu.vector_store %arg8[%c2_184, %c1_185, %c0_186], %155 {strides = array<i32>} : memref<8x18x4xbf16, #tpu.memory_space<vmem>>, vector<6x16x4xbf16>,
    } else {
    }
    %c3_i32 = arith.constant 3 : i32
    %8 = arith.cmpi eq, %arg1, %c3_i32 : i32
    %9 = arith.extui %8 : i1 to i32
    %c0_i32_6 = arith.constant 0 : i32
    %10 = arith.cmpi ne, %9, %c0_i32_6 : i32
    scf.if %10 {
      %c6 = arith.constant 6 : index
      %c0_177 = arith.constant 0 : index
      %c0_178 = arith.constant 0 : index
      %152 = vector.load %arg8[%c6, %c0_177, %c0_178] : memref<8x18x4xbf16, #tpu.memory_space<vmem>>, vector<2x18x4xbf16>
      tpu.vector_store %arg8[%c6, %c0_177, %c0_178], %4 {strides = array<i32>} : memref<8x18x4xbf16, #tpu.memory_space<vmem>>, vector<2x18x4xbf16>,
      %c2_i32 = arith.constant 2 : i32
      %153 = arith.subi %0, %c2_i32 : i32
      %c0_179 = arith.constant 0 : index
      %154 = arith.index_cast %153 : i32 to index
      %c0_180 = arith.constant 0 : index
      %c0_181 = arith.constant 0 : index
      %155 = vector.load %arg2[%c0_179, %154, %c0_180, %c0_181] : memref<1x16x16x4xf32, #tpu.memory_space<vmem>>, vector<1x6x16x4xf32>
      %156 = vector.shape_cast %155 : vector<1x6x16x4xf32> to vector<6x16x4xf32>
      %157 = arith.truncf %156 : vector<6x16x4xf32> to vector<6x16x4xbf16>
      %c0_182 = arith.constant 0 : index
      %c1_183 = arith.constant 1 : index
      %c0_184 = arith.constant 0 : index
      %158 = vector.load %arg8[%c0_182, %c1_183, %c0_184] : memref<8x18x4xbf16, #tpu.memory_space<vmem>>, vector<6x16x4xbf16>
      tpu.vector_store %arg8[%c0_182, %c1_183, %c0_184], %157 {strides = array<i32>} : memref<8x18x4xbf16, #tpu.memory_space<vmem>>, vector<6x16x4xbf16>,
    } else {
    }
    %c0_i32_7 = arith.constant 0 : i32
    %11 = arith.cmpi sgt, %arg1, %c0_i32_7 : i32
    %c3_i32_8 = arith.constant 3 : i32
    %12 = arith.cmpi slt, %arg1, %c3_i32_8 : i32
    %13 = arith.andi %11, %12 : i1
    %14 = arith.extui %13 : i1 to i32
    %c0_i32_9 = arith.constant 0 : i32
    %15 = arith.cmpi ne, %14, %c0_i32_9 : i32
    scf.if %15 {
      %c2_i32 = arith.constant 2 : i32
      %152 = arith.subi %0, %c2_i32 : i32
      %c0_177 = arith.constant 0 : index
      %153 = arith.index_cast %152 : i32 to index
      %c0_178 = arith.constant 0 : index
      %c0_179 = arith.constant 0 : index
      %154 = vector.load %arg2[%c0_177, %153, %c0_178, %c0_179] : memref<1x16x16x4xf32, #tpu.memory_space<vmem>>, vector<1x8x16x4xf32>
      %155 = vector.shape_cast %154 : vector<1x8x16x4xf32> to vector<8x16x4xf32>
      %156 = arith.truncf %155 : vector<8x16x4xf32> to vector<8x16x4xbf16>
      %c0_180 = arith.constant 0 : index
      %c1_181 = arith.constant 1 : index
      %c0_182 = arith.constant 0 : index
      %157 = vector.load %arg8[%c0_180, %c1_181, %c0_182] : memref<8x18x4xbf16, #tpu.memory_space<vmem>>, vector<8x16x4xbf16>
      tpu.vector_store %arg8[%c0_180, %c1_181, %c0_182], %156 {strides = array<i32>} : memref<8x18x4xbf16, #tpu.memory_space<vmem>>, vector<8x16x4xbf16>,
    } else {
    }
    %cst_10 = arith.constant 0.000000e+00 : f32
    %16 = vector.broadcast %cst_10 : f32 to vector<96x128xf32>
    %c0_11 = arith.constant 0 : index
    %c0_12 = arith.constant 0 : index
    %c0_13 = arith.constant 0 : index
    %17 = vector.load %arg8[%c0_11, %c0_12, %c0_13] : memref<8x18x4xbf16, #tpu.memory_space<vmem>>, vector<6x16x4xbf16>
    %18 = vector.shape_cast %17 : vector<6x16x4xbf16> to vector<96x4xbf16>
    %c0_14 = arith.constant 0 : index
    %c0_15 = arith.constant 0 : index
    %c0_16 = arith.constant 0 : index
    %c0_17 = arith.constant 0 : index
    %19 = vector.load %arg3[%c0_14, %c0_15, %c0_16, %c0_17] : memref<3x3x4x128xbf16, #tpu.memory_space<vmem>>, vector<1x1x4x128xbf16>
    %20 = vector.shape_cast %19 : vector<1x1x4x128xbf16> to vector<4x128xbf16>
    %cst_18 = arith.constant dense<0.000000e+00> : vector<96x128xf32>
    %21 = tpu.matmul %18, %20, %cst_18 {dimension_numbers = #tpu.dot_dimension_numbers<[1], [0], [0], [1], [0, 0, 1, 1], [], []>} : vector<96x4xbf16>, vector<4x128xbf16>, vector<96x128xf32> -> vector<96x128xf32>
    %22 = arith.addf %16, %21 : vector<96x128xf32>
    %c0_19 = arith.constant 0 : index
    %c1 = arith.constant 1 : index
    %c0_20 = arith.constant 0 : index
    %23 = vector.load %arg8[%c0_19, %c1, %c0_20] : memref<8x18x4xbf16, #tpu.memory_space<vmem>>, vector<6x16x4xbf16>
    %24 = vector.shape_cast %23 : vector<6x16x4xbf16> to vector<96x4xbf16>
    %c0_21 = arith.constant 0 : index
    %c1_22 = arith.constant 1 : index
    %c0_23 = arith.constant 0 : index
    %c0_24 = arith.constant 0 : index
    %25 = vector.load %arg3[%c0_21, %c1_22, %c0_23, %c0_24] : memref<3x3x4x128xbf16, #tpu.memory_space<vmem>>, vector<1x1x4x128xbf16>
    %26 = vector.shape_cast %25 : vector<1x1x4x128xbf16> to vector<4x128xbf16>
    %cst_25 = arith.constant dense<0.000000e+00> : vector<96x128xf32>
    %27 = tpu.matmul %24, %26, %cst_25 {dimension_numbers = #tpu.dot_dimension_numbers<[1], [0], [0], [1], [0, 0, 1, 1], [], []>} : vector<96x4xbf16>, vector<4x128xbf16>, vector<96x128xf32> -> vector<96x128xf32>
    %28 = arith.addf %22, %27 : vector<96x128xf32>
    %c0_26 = arith.constant 0 : index
    %c2 = arith.constant 2 : index
    %c0_27 = arith.constant 0 : index
    %29 = vector.load %arg8[%c0_26, %c2, %c0_27] : memref<8x18x4xbf16, #tpu.memory_space<vmem>>, vector<6x16x4xbf16>
    %30 = vector.shape_cast %29 : vector<6x16x4xbf16> to vector<96x4xbf16>
    %c0_28 = arith.constant 0 : index
    %c2_29 = arith.constant 2 : index
    %c0_30 = arith.constant 0 : index
    %c0_31 = arith.constant 0 : index
    %31 = vector.load %arg3[%c0_28, %c2_29, %c0_30, %c0_31] : memref<3x3x4x128xbf16, #tpu.memory_space<vmem>>, vector<1x1x4x128xbf16>
    %32 = vector.shape_cast %31 : vector<1x1x4x128xbf16> to vector<4x128xbf16>
    %cst_32 = arith.constant dense<0.000000e+00> : vector<96x128xf32>
    %33 = tpu.matmul %30, %32, %cst_32 {dimension_numbers = #tpu.dot_dimension_numbers<[1], [0], [0], [1], [0, 0, 1, 1], [], []>} : vector<96x4xbf16>, vector<4x128xbf16>, vector<96x128xf32> -> vector<96x128xf32>
    %34 = arith.addf %28, %33 : vector<96x128xf32>
    %c1_33 = arith.constant 1 : index
    %c0_34 = arith.constant 0 : index
    %c0_35 = arith.constant 0 : index
    %35 = vector.load %arg8[%c1_33, %c0_34, %c0_35] : memref<8x18x4xbf16, #tpu.memory_space<vmem>>, vector<6x16x4xbf16>
    %36 = vector.shape_cast %35 : vector<6x16x4xbf16> to vector<96x4xbf16>
    %c1_36 = arith.constant 1 : index
    %c0_37 = arith.constant 0 : index
    %c0_38 = arith.constant 0 : index
    %c0_39 = arith.constant 0 : index
    %37 = vector.load %arg3[%c1_36, %c0_37, %c0_38, %c0_39] : memref<3x3x4x128xbf16, #tpu.memory_space<vmem>>, vector<1x1x4x128xbf16>
    %38 = vector.shape_cast %37 : vector<1x1x4x128xbf16> to vector<4x128xbf16>
    %cst_40 = arith.constant dense<0.000000e+00> : vector<96x128xf32>
    %39 = tpu.matmul %36, %38, %cst_40 {dimension_numbers = #tpu.dot_dimension_numbers<[1], [0], [0], [1], [0, 0, 1, 1], [], []>} : vector<96x4xbf16>, vector<4x128xbf16>, vector<96x128xf32> -> vector<96x128xf32>
    %40 = arith.addf %34, %39 : vector<96x128xf32>
    %c1_41 = arith.constant 1 : index
    %c1_42 = arith.constant 1 : index
    %c0_43 = arith.constant 0 : index
    %41 = vector.load %arg8[%c1_41, %c1_42, %c0_43] : memref<8x18x4xbf16, #tpu.memory_space<vmem>>, vector<6x16x4xbf16>
    %42 = vector.shape_cast %41 : vector<6x16x4xbf16> to vector<96x4xbf16>
    %c1_44 = arith.constant 1 : index
    %c1_45 = arith.constant 1 : index
    %c0_46 = arith.constant 0 : index
    %c0_47 = arith.constant 0 : index
    %43 = vector.load %arg3[%c1_44, %c1_45, %c0_46, %c0_47] : memref<3x3x4x128xbf16, #tpu.memory_space<vmem>>, vector<1x1x4x128xbf16>
    %44 = vector.shape_cast %43 : vector<1x1x4x128xbf16> to vector<4x128xbf16>
    %cst_48 = arith.constant dense<0.000000e+00> : vector<96x128xf32>
    %45 = tpu.matmul %42, %44, %cst_48 {dimension_numbers = #tpu.dot_dimension_numbers<[1], [0], [0], [1], [0, 0, 1, 1], [], []>} : vector<96x4xbf16>, vector<4x128xbf16>, vector<96x128xf32> -> vector<96x128xf32>
    %46 = arith.addf %40, %45 : vector<96x128xf32>
    %c1_49 = arith.constant 1 : index
    %c2_50 = arith.constant 2 : index
    %c0_51 = arith.constant 0 : index
    %47 = vector.load %arg8[%c1_49, %c2_50, %c0_51] : memref<8x18x4xbf16, #tpu.memory_space<vmem>>, vector<6x16x4xbf16>
    %48 = vector.shape_cast %47 : vector<6x16x4xbf16> to vector<96x4xbf16>
    %c1_52 = arith.constant 1 : index
    %c2_53 = arith.constant 2 : index
    %c0_54 = arith.constant 0 : index
    %c0_55 = arith.constant 0 : index
    %49 = vector.load %arg3[%c1_52, %c2_53, %c0_54, %c0_55] : memref<3x3x4x128xbf16, #tpu.memory_space<vmem>>, vector<1x1x4x128xbf16>
    %50 = vector.shape_cast %49 : vector<1x1x4x128xbf16> to vector<4x128xbf16>
    %cst_56 = arith.constant dense<0.000000e+00> : vector<96x128xf32>
    %51 = tpu.matmul %48, %50, %cst_56 {dimension_numbers = #tpu.dot_dimension_numbers<[1], [0], [0], [1], [0, 0, 1, 1], [], []>} : vector<96x4xbf16>, vector<4x128xbf16>, vector<96x128xf32> -> vector<96x128xf32>
    %52 = arith.addf %46, %51 : vector<96x128xf32>
    %c2_57 = arith.constant 2 : index
    %c0_58 = arith.constant 0 : index
    %c0_59 = arith.constant 0 : index
    %53 = vector.load %arg8[%c2_57, %c0_58, %c0_59] : memref<8x18x4xbf16, #tpu.memory_space<vmem>>, vector<6x16x4xbf16>
    %54 = vector.shape_cast %53 : vector<6x16x4xbf16> to vector<96x4xbf16>
    %c2_60 = arith.constant 2 : index
    %c0_61 = arith.constant 0 : index
    %c0_62 = arith.constant 0 : index
    %c0_63 = arith.constant 0 : index
    %55 = vector.load %arg3[%c2_60, %c0_61, %c0_62, %c0_63] : memref<3x3x4x128xbf16, #tpu.memory_space<vmem>>, vector<1x1x4x128xbf16>
    %56 = vector.shape_cast %55 : vector<1x1x4x128xbf16> to vector<4x128xbf16>
    %cst_64 = arith.constant dense<0.000000e+00> : vector<96x128xf32>
    %57 = tpu.matmul %54, %56, %cst_64 {dimension_numbers = #tpu.dot_dimension_numbers<[1], [0], [0], [1], [0, 0, 1, 1], [], []>} : vector<96x4xbf16>, vector<4x128xbf16>, vector<96x128xf32> -> vector<96x128xf32>
    %58 = arith.addf %52, %57 : vector<96x128xf32>
    %c2_65 = arith.constant 2 : index
    %c1_66 = arith.constant 1 : index
    %c0_67 = arith.constant 0 : index
    %59 = vector.load %arg8[%c2_65, %c1_66, %c0_67] : memref<8x18x4xbf16, #tpu.memory_space<vmem>>, vector<6x16x4xbf16>
    %60 = vector.shape_cast %59 : vector<6x16x4xbf16> to vector<96x4xbf16>
    %c2_68 = arith.constant 2 : index
    %c1_69 = arith.constant 1 : index
    %c0_70 = arith.constant 0 : index
    %c0_71 = arith.constant 0 : index
    %61 = vector.load %arg3[%c2_68, %c1_69, %c0_70, %c0_71] : memref<3x3x4x128xbf16, #tpu.memory_space<vmem>>, vector<1x1x4x128xbf16>
    %62 = vector.shape_cast %61 : vector<1x1x4x128xbf16> to vector<4x128xbf16>
    %cst_72 = arith.constant dense<0.000000e+00> : vector<96x128xf32>
    %63 = tpu.matmul %60, %62, %cst_72 {dimension_numbers = #tpu.dot_dimension_numbers<[1], [0], [0], [1], [0, 0, 1, 1], [], []>} : vector<96x4xbf16>, vector<4x128xbf16>, vector<96x128xf32> -> vector<96x128xf32>
    %64 = arith.addf %58, %63 : vector<96x128xf32>
    %c2_73 = arith.constant 2 : index
    %c2_74 = arith.constant 2 : index
    %c0_75 = arith.constant 0 : index
    %65 = vector.load %arg8[%c2_73, %c2_74, %c0_75] : memref<8x18x4xbf16, #tpu.memory_space<vmem>>, vector<6x16x4xbf16>
    %66 = vector.shape_cast %65 : vector<6x16x4xbf16> to vector<96x4xbf16>
    %c2_76 = arith.constant 2 : index
    %c2_77 = arith.constant 2 : index
    %c0_78 = arith.constant 0 : index
    %c0_79 = arith.constant 0 : index
    %67 = vector.load %arg3[%c2_76, %c2_77, %c0_78, %c0_79] : memref<3x3x4x128xbf16, #tpu.memory_space<vmem>>, vector<1x1x4x128xbf16>
    %68 = vector.shape_cast %67 : vector<1x1x4x128xbf16> to vector<4x128xbf16>
    %cst_80 = arith.constant dense<0.000000e+00> : vector<96x128xf32>
    %69 = tpu.matmul %66, %68, %cst_80 {dimension_numbers = #tpu.dot_dimension_numbers<[1], [0], [0], [1], [0, 0, 1, 1], [], []>} : vector<96x4xbf16>, vector<4x128xbf16>, vector<96x128xf32> -> vector<96x128xf32>
    %70 = arith.addf %64, %69 : vector<96x128xf32>
    %71 = vector.shape_cast %70 : vector<96x128xf32> to vector<6x16x128xf32>
    %c0_81 = arith.constant 0 : index
    %c0_82 = arith.constant 0 : index
    %72 = vector.load %arg4[%c0_81, %c0_82] : memref<1x128xf32, #tpu.memory_space<vmem>>, vector<1x128xf32>
    %73 = vector.shape_cast %72 : vector<1x128xf32> to vector<128xf32>
    %74 = vector.shape_cast %73 : vector<128xf32> to vector<1x1x128xf32>
    %75 = vector.broadcast %74 : vector<1x1x128xf32> to vector<6x16x128xf32>
    %76 = arith.addf %71, %75 : vector<6x16x128xf32>
    %77 = arith.truncf %76 : vector<6x16x128xf32> to vector<6x16x128xbf16>
    %c0_83 = arith.constant 0 : index
    %c1_84 = arith.constant 1 : index
    %c0_85 = arith.constant 0 : index
    %78 = vector.load %arg9[%c0_83, %c1_84, %c0_85] : memref<6x18x128xbf16, #tpu.memory_space<vmem>>, vector<6x16x128xbf16>
    tpu.vector_store %arg9[%c0_83, %c1_84, %c0_85], %77 {strides = array<i32>} : memref<6x18x128xbf16, #tpu.memory_space<vmem>>, vector<6x16x128xbf16>,
    %cst_86 = arith.constant 0.000000e+00 : bf16
    %79 = vector.broadcast %cst_86 : bf16 to vector<6x1x128xbf16>
    %c0_87 = arith.constant 0 : index
    %c0_88 = arith.constant 0 : index
    %c0_89 = arith.constant 0 : index
    %80 = vector.load %arg9[%c0_87, %c0_88, %c0_89] : memref<6x18x128xbf16, #tpu.memory_space<vmem>>, vector<6x1x128xbf16>
    tpu.vector_store %arg9[%c0_87, %c0_88, %c0_89], %79 {strides = array<i32>} : memref<6x18x128xbf16, #tpu.memory_space<vmem>>, vector<6x1x128xbf16>,
    %c0_90 = arith.constant 0 : index
    %c17_91 = arith.constant 17 : index
    %c0_92 = arith.constant 0 : index
    %81 = vector.load %arg9[%c0_90, %c17_91, %c0_92] : memref<6x18x128xbf16, #tpu.memory_space<vmem>>, vector<6x1x128xbf16>
    tpu.vector_store %arg9[%c0_90, %c17_91, %c0_92], %79 {strides = array<i32>} : memref<6x18x128xbf16, #tpu.memory_space<vmem>>, vector<6x1x128xbf16>,
    %cst_93 = arith.constant 0.000000e+00 : bf16
    %82 = vector.broadcast %cst_93 : bf16 to vector<1x18x128xbf16>
    %c0_i32_94 = arith.constant 0 : i32
    %83 = arith.cmpi eq, %arg1, %c0_i32_94 : i32
    %84 = arith.extui %83 : i1 to i32
    %c0_i32_95 = arith.constant 0 : i32
    %85 = arith.cmpi ne, %84, %c0_i32_95 : i32
    scf.if %85 {
      %c0_177 = arith.constant 0 : index
      %c0_178 = arith.constant 0 : index
      %c0_179 = arith.constant 0 : index
      %152 = vector.load %arg9[%c0_177, %c0_178, %c0_179] : memref<6x18x128xbf16, #tpu.memory_space<vmem>>, vector<1x18x128xbf16>
      tpu.vector_store %arg9[%c0_177, %c0_178, %c0_179], %82 {strides = array<i32>} : memref<6x18x128xbf16, #tpu.memory_space<vmem>>, vector<1x18x128xbf16>,
    } else {
    }
    %c3_i32_96 = arith.constant 3 : i32
    %86 = arith.cmpi eq, %arg1, %c3_i32_96 : i32
    %87 = arith.extui %86 : i1 to i32
    %c0_i32_97 = arith.constant 0 : i32
    %88 = arith.cmpi ne, %87, %c0_i32_97 : i32
    scf.if %88 {
      %c5 = arith.constant 5 : index
      %c0_177 = arith.constant 0 : index
      %c0_178 = arith.constant 0 : index
      %152 = vector.load %arg9[%c5, %c0_177, %c0_178] : memref<6x18x128xbf16, #tpu.memory_space<vmem>>, vector<1x18x128xbf16>
      tpu.vector_store %arg9[%c5, %c0_177, %c0_178], %82 {strides = array<i32>} : memref<6x18x128xbf16, #tpu.memory_space<vmem>>, vector<1x18x128xbf16>,
    } else {
    }
    %cst_98 = arith.constant 0.000000e+00 : f32
    %89 = vector.broadcast %cst_98 : f32 to vector<64x8xf32>
    %c0_99 = arith.constant 0 : index
    %c0_100 = arith.constant 0 : index
    %c0_101 = arith.constant 0 : index
    %90 = vector.load %arg9[%c0_99, %c0_100, %c0_101] : memref<6x18x128xbf16, #tpu.memory_space<vmem>>, vector<4x16x128xbf16>
    %91 = vector.shape_cast %90 : vector<4x16x128xbf16> to vector<64x128xbf16>
    %c0_102 = arith.constant 0 : index
    %c0_103 = arith.constant 0 : index
    %c0_104 = arith.constant 0 : index
    %c0_105 = arith.constant 0 : index
    %92 = vector.load %arg5[%c0_102, %c0_103, %c0_104, %c0_105] : memref<3x3x128x8xbf16, #tpu.memory_space<vmem>>, vector<1x1x128x8xbf16>
    %93 = vector.shape_cast %92 : vector<1x1x128x8xbf16> to vector<128x8xbf16>
    %cst_106 = arith.constant dense<0.000000e+00> : vector<64x8xf32>
    %94 = tpu.matmul %91, %93, %cst_106 {dimension_numbers = #tpu.dot_dimension_numbers<[1], [0], [0], [1], [0, 0, 1, 1], [], []>} : vector<64x128xbf16>, vector<128x8xbf16>, vector<64x8xf32> -> vector<64x8xf32>
    %95 = arith.addf %89, %94 : vector<64x8xf32>
    %c0_107 = arith.constant 0 : index
    %c1_108 = arith.constant 1 : index
    %c0_109 = arith.constant 0 : index
    %96 = vector.load %arg9[%c0_107, %c1_108, %c0_109] : memref<6x18x128xbf16, #tpu.memory_space<vmem>>, vector<4x16x128xbf16>
    %97 = vector.shape_cast %96 : vector<4x16x128xbf16> to vector<64x128xbf16>
    %c0_110 = arith.constant 0 : index
    %c1_111 = arith.constant 1 : index
    %c0_112 = arith.constant 0 : index
    %c0_113 = arith.constant 0 : index
    %98 = vector.load %arg5[%c0_110, %c1_111, %c0_112, %c0_113] : memref<3x3x128x8xbf16, #tpu.memory_space<vmem>>, vector<1x1x128x8xbf16>
    %99 = vector.shape_cast %98 : vector<1x1x128x8xbf16> to vector<128x8xbf16>
    %cst_114 = arith.constant dense<0.000000e+00> : vector<64x8xf32>
    %100 = tpu.matmul %97, %99, %cst_114 {dimension_numbers = #tpu.dot_dimension_numbers<[1], [0], [0], [1], [0, 0, 1, 1], [], []>} : vector<64x128xbf16>, vector<128x8xbf16>, vector<64x8xf32> -> vector<64x8xf32>
    %101 = arith.addf %95, %100 : vector<64x8xf32>
    %c0_115 = arith.constant 0 : index
    %c2_116 = arith.constant 2 : index
    %c0_117 = arith.constant 0 : index
    %102 = vector.load %arg9[%c0_115, %c2_116, %c0_117] : memref<6x18x128xbf16, #tpu.memory_space<vmem>>, vector<4x16x128xbf16>
    %103 = vector.shape_cast %102 : vector<4x16x128xbf16> to vector<64x128xbf16>
    %c0_118 = arith.constant 0 : index
    %c2_119 = arith.constant 2 : index
    %c0_120 = arith.constant 0 : index
    %c0_121 = arith.constant 0 : index
    %104 = vector.load %arg5[%c0_118, %c2_119, %c0_120, %c0_121] : memref<3x3x128x8xbf16, #tpu.memory_space<vmem>>, vector<1x1x128x8xbf16>
    %105 = vector.shape_cast %104 : vector<1x1x128x8xbf16> to vector<128x8xbf16>
    %cst_122 = arith.constant dense<0.000000e+00> : vector<64x8xf32>
    %106 = tpu.matmul %103, %105, %cst_122 {dimension_numbers = #tpu.dot_dimension_numbers<[1], [0], [0], [1], [0, 0, 1, 1], [], []>} : vector<64x128xbf16>, vector<128x8xbf16>, vector<64x8xf32> -> vector<64x8xf32>
    %107 = arith.addf %101, %106 : vector<64x8xf32>
    %c1_123 = arith.constant 1 : index
    %c0_124 = arith.constant 0 : index
    %c0_125 = arith.constant 0 : index
    %108 = vector.load %arg9[%c1_123, %c0_124, %c0_125] : memref<6x18x128xbf16, #tpu.memory_space<vmem>>, vector<4x16x128xbf16>
    %109 = vector.shape_cast %108 : vector<4x16x128xbf16> to vector<64x128xbf16>
    %c1_126 = arith.constant 1 : index
    %c0_127 = arith.constant 0 : index
    %c0_128 = arith.constant 0 : index
    %c0_129 = arith.constant 0 : index
    %110 = vector.load %arg5[%c1_126, %c0_127, %c0_128, %c0_129] : memref<3x3x128x8xbf16, #tpu.memory_space<vmem>>, vector<1x1x128x8xbf16>
    %111 = vector.shape_cast %110 : vector<1x1x128x8xbf16> to vector<128x8xbf16>
    %cst_130 = arith.constant dense<0.000000e+00> : vector<64x8xf32>
    %112 = tpu.matmul %109, %111, %cst_130 {dimension_numbers = #tpu.dot_dimension_numbers<[1], [0], [0], [1], [0, 0, 1, 1], [], []>} : vector<64x128xbf16>, vector<128x8xbf16>, vector<64x8xf32> -> vector<64x8xf32>
    %113 = arith.addf %107, %112 : vector<64x8xf32>
    %c1_131 = arith.constant 1 : index
    %c1_132 = arith.constant 1 : index
    %c0_133 = arith.constant 0 : index
    %114 = vector.load %arg9[%c1_131, %c1_132, %c0_133] : memref<6x18x128xbf16, #tpu.memory_space<vmem>>, vector<4x16x128xbf16>
    %115 = vector.shape_cast %114 : vector<4x16x128xbf16> to vector<64x128xbf16>
    %c1_134 = arith.constant 1 : index
    %c1_135 = arith.constant 1 : index
    %c0_136 = arith.constant 0 : index
    %c0_137 = arith.constant 0 : index
    %116 = vector.load %arg5[%c1_134, %c1_135, %c0_136, %c0_137] : memref<3x3x128x8xbf16, #tpu.memory_space<vmem>>, vector<1x1x128x8xbf16>
    %117 = vector.shape_cast %116 : vector<1x1x128x8xbf16> to vector<128x8xbf16>
    %cst_138 = arith.constant dense<0.000000e+00> : vector<64x8xf32>
    %118 = tpu.matmul %115, %117, %cst_138 {dimension_numbers = #tpu.dot_dimension_numbers<[1], [0], [0], [1], [0, 0, 1, 1], [], []>} : vector<64x128xbf16>, vector<128x8xbf16>, vector<64x8xf32> -> vector<64x8xf32>
    %119 = arith.addf %113, %118 : vector<64x8xf32>
    %c1_139 = arith.constant 1 : index
    %c2_140 = arith.constant 2 : index
    %c0_141 = arith.constant 0 : index
    %120 = vector.load %arg9[%c1_139, %c2_140, %c0_141] : memref<6x18x128xbf16, #tpu.memory_space<vmem>>, vector<4x16x128xbf16>
    %121 = vector.shape_cast %120 : vector<4x16x128xbf16> to vector<64x128xbf16>
    %c1_142 = arith.constant 1 : index
    %c2_143 = arith.constant 2 : index
    %c0_144 = arith.constant 0 : index
    %c0_145 = arith.constant 0 : index
    %122 = vector.load %arg5[%c1_142, %c2_143, %c0_144, %c0_145] : memref<3x3x128x8xbf16, #tpu.memory_space<vmem>>, vector<1x1x128x8xbf16>
    %123 = vector.shape_cast %122 : vector<1x1x128x8xbf16> to vector<128x8xbf16>
    %cst_146 = arith.constant dense<0.000000e+00> : vector<64x8xf32>
    %124 = tpu.matmul %121, %123, %cst_146 {dimension_numbers = #tpu.dot_dimension_numbers<[1], [0], [0], [1], [0, 0, 1, 1], [], []>} : vector<64x128xbf16>, vector<128x8xbf16>, vector<64x8xf32> -> vector<64x8xf32>
    %125 = arith.addf %119, %124 : vector<64x8xf32>
    %c2_147 = arith.constant 2 : index
    %c0_148 = arith.constant 0 : index
    %c0_149 = arith.constant 0 : index
    %126 = vector.load %arg9[%c2_147, %c0_148, %c0_149] : memref<6x18x128xbf16, #tpu.memory_space<vmem>>, vector<4x16x128xbf16>
    %127 = vector.shape_cast %126 : vector<4x16x128xbf16> to vector<64x128xbf16>
    %c2_150 = arith.constant 2 : index
    %c0_151 = arith.constant 0 : index
    %c0_152 = arith.constant 0 : index
    %c0_153 = arith.constant 0 : index
    %128 = vector.load %arg5[%c2_150, %c0_151, %c0_152, %c0_153] : memref<3x3x128x8xbf16, #tpu.memory_space<vmem>>, vector<1x1x128x8xbf16>
    %129 = vector.shape_cast %128 : vector<1x1x128x8xbf16> to vector<128x8xbf16>
    %cst_154 = arith.constant dense<0.000000e+00> : vector<64x8xf32>
    %130 = tpu.matmul %127, %129, %cst_154 {dimension_numbers = #tpu.dot_dimension_numbers<[1], [0], [0], [1], [0, 0, 1, 1], [], []>} : vector<64x128xbf16>, vector<128x8xbf16>, vector<64x8xf32> -> vector<64x8xf32>
    %131 = arith.addf %125, %130 : vector<64x8xf32>
    %c2_155 = arith.constant 2 : index
    %c1_156 = arith.constant 1 : index
    %c0_157 = arith.constant 0 : index
    %132 = vector.load %arg9[%c2_155, %c1_156, %c0_157] : memref<6x18x128xbf16, #tpu.memory_space<vmem>>, vector<4x16x128xbf16>
    %133 = vector.shape_cast %132 : vector<4x16x128xbf16> to vector<64x128xbf16>
    %c2_158 = arith.constant 2 : index
    %c1_159 = arith.constant 1 : index
    %c0_160 = arith.constant 0 : index
    %c0_161 = arith.constant 0 : index
    %134 = vector.load %arg5[%c2_158, %c1_159, %c0_160, %c0_161] : memref<3x3x128x8xbf16, #tpu.memory_space<vmem>>, vector<1x1x128x8xbf16>
    %135 = vector.shape_cast %134 : vector<1x1x128x8xbf16> to vector<128x8xbf16>
    %cst_162 = arith.constant dense<0.000000e+00> : vector<64x8xf32>
    %136 = tpu.matmul %133, %135, %cst_162 {dimension_numbers = #tpu.dot_dimension_numbers<[1], [0], [0], [1], [0, 0, 1, 1], [], []>} : vector<64x128xbf16>, vector<128x8xbf16>, vector<64x8xf32> -> vector<64x8xf32>
    %137 = arith.addf %131, %136 : vector<64x8xf32>
    %c2_163 = arith.constant 2 : index
    %c2_164 = arith.constant 2 : index
    %c0_165 = arith.constant 0 : index
    %138 = vector.load %arg9[%c2_163, %c2_164, %c0_165] : memref<6x18x128xbf16, #tpu.memory_space<vmem>>, vector<4x16x128xbf16>
    %139 = vector.shape_cast %138 : vector<4x16x128xbf16> to vector<64x128xbf16>
    %c2_166 = arith.constant 2 : index
    %c2_167 = arith.constant 2 : index
    %c0_168 = arith.constant 0 : index
    %c0_169 = arith.constant 0 : index
    %140 = vector.load %arg5[%c2_166, %c2_167, %c0_168, %c0_169] : memref<3x3x128x8xbf16, #tpu.memory_space<vmem>>, vector<1x1x128x8xbf16>
    %141 = vector.shape_cast %140 : vector<1x1x128x8xbf16> to vector<128x8xbf16>
    %cst_170 = arith.constant dense<0.000000e+00> : vector<64x8xf32>
    %142 = tpu.matmul %139, %141, %cst_170 {dimension_numbers = #tpu.dot_dimension_numbers<[1], [0], [0], [1], [0, 0, 1, 1], [], []>} : vector<64x128xbf16>, vector<128x8xbf16>, vector<64x8xf32> -> vector<64x8xf32>
    %143 = arith.addf %137, %142 : vector<64x8xf32>
    %144 = vector.shape_cast %143 : vector<64x8xf32> to vector<4x16x8xf32>
    %c0_171 = arith.constant 0 : index
    %c0_172 = arith.constant 0 : index
    %145 = vector.load %arg6[%c0_171, %c0_172] : memref<1x8xf32, #tpu.memory_space<vmem>>, vector<1x8xf32>
    %146 = vector.shape_cast %145 : vector<1x8xf32> to vector<8xf32>
    %147 = vector.shape_cast %146 : vector<8xf32> to vector<1x1x8xf32>
    %148 = vector.broadcast %147 : vector<1x1x8xf32> to vector<4x16x8xf32>
    %149 = arith.addf %144, %148 : vector<4x16x8xf32>
    %150 = vector.shape_cast %149 : vector<4x16x8xf32> to vector<1x4x16x8xf32>
    %c0_173 = arith.constant 0 : index
    %c0_174 = arith.constant 0 : index
    %c0_175 = arith.constant 0 : index
    %c0_176 = arith.constant 0 : index
    %151 = vector.load %arg7[%c0_173, %c0_174, %c0_175, %c0_176] : memref<1x4x16x8xf32, #tpu.memory_space<vmem>>, vector<1x4x16x8xf32>
    tpu.vector_store %arg7[%c0_173, %c0_174, %c0_175, %c0_176], %150 {strides = array<i32>} : memref<1x4x16x8xf32, #tpu.memory_space<vmem>>, vector<1x4x16x8xf32>,
    return
  }
  func.func @transform_0(%arg0: i32, %arg1: i32) -> (i32, i32, i32, i32) {
    %c0_i32 = arith.constant 0 : i32
    %c0_i32_0 = arith.constant 0 : i32
    %c0_i32_1 = arith.constant 0 : i32
    %c0_i32_2 = arith.constant 0 : i32
    return %arg0, %c0_i32, %c0_i32_0, %c0_i32_1 : i32, i32, i32, i32
  }
  func.func @transform_1(%arg0: i32, %arg1: i32) -> (i32, i32, i32, i32) {
    %c0_i32 = arith.constant 0 : i32
    %c0_i32_0 = arith.constant 0 : i32
    %c0_i32_1 = arith.constant 0 : i32
    %c0_i32_2 = arith.constant 0 : i32
    %c0_i32_3 = arith.constant 0 : i32
    return %c0_i32, %c0_i32_0, %c0_i32_1, %c0_i32_2 : i32, i32, i32, i32
  }
  func.func @transform_2(%arg0: i32, %arg1: i32) -> (i32, i32) {
    %c0_i32 = arith.constant 0 : i32
    %c0_i32_0 = arith.constant 0 : i32
    %c0_i32_1 = arith.constant 0 : i32
    return %c0_i32, %c0_i32_0 : i32, i32
  }
  func.func @transform_3(%arg0: i32, %arg1: i32) -> (i32, i32, i32, i32) {
    %c0_i32 = arith.constant 0 : i32
    %c0_i32_0 = arith.constant 0 : i32
    %c0_i32_1 = arith.constant 0 : i32
    %c0_i32_2 = arith.constant 0 : i32
    %c0_i32_3 = arith.constant 0 : i32
    return %c0_i32, %c0_i32_0, %c0_i32_1, %c0_i32_2 : i32, i32, i32, i32
  }
  func.func @transform_4(%arg0: i32, %arg1: i32) -> (i32, i32) {
    %c0_i32 = arith.constant 0 : i32
    %c0_i32_0 = arith.constant 0 : i32
    %c0_i32_1 = arith.constant 0 : i32
    return %c0_i32, %c0_i32_0 : i32, i32
  }
  func.func @transform_5(%arg0: i32, %arg1: i32) -> (i32, i32, i32, i32) {
    %c0_i32 = arith.constant 0 : i32
    %c0_i32_0 = arith.constant 0 : i32
    %c0_i32_1 = arith.constant 0 : i32
    return %arg0, %arg1, %c0_i32, %c0_i32_0 : i32, i32, i32, i32
  }
}

</mosaic_0001>

<bundles_post_ra>
// kernel: tpu_custom_call.1
= control target key start
LH: loop header
LB: loop body
LE: loop exit
PB: predicated region body
PF: predicated region fallthrough
CT: control target
= control target key end

     0   :  { %s6668_s18 = smov 0   ;;  %s6670_s19 = smov 0   ;;  %s8188_s0 = inlined_call_operand.vmem [shape: f32[2,16,16,4], index: 0, kind: input, shape index: {}]   ;;  %s8189_s1 = inlined_call_operand.vmem [shape: bf16[3,3,4,128], index: 1, kind: input, shape index: {}]   ;;  %s8190_s2 = inlined_call_operand.vmem [shape: f32[1,128], index: 2, kind: input, shape index: {}]   ;;  %s8191_s3 = inlined_call_operand.vmem [shape: bf16[3,3,128,8], index: 3, kind: input, shape index: {}]   ;;  %s8192_s4 = inlined_call_operand.vmem [shape: f32[1,8], index: 4, kind: input, shape index: {}]   ;;  %s8193_s5 = inlined_call_operand.vmem [shape: f32[2,16,16,8], index: 5, kind: output, shape index: {}]  }
   0x1   :  { %s6672_s20 = smov 0   ;;  %s6674_s21 = smov 0  }
   0x2   :  { %s6676_s22 = smov 0  }
   0x3 LB: > { %s24_s23 = sadd.s32 1, %s6624_s20  ;;  %s27_s24 = sadd.s32 1, %s6628_s21  ;;  %s6632_s22 = sphi %s6676_s22, %s15_s22   ;;  %s6628_s21 = sphi %s6674_s21, %s8225_s21   ;;  %s6624_s20 = sphi %s6672_s20, %s8224_s20   ;;  %s6620_s19 = sphi %s6670_s19, %s8223_s19   ;;  %s6616_s18 = sphi %s6668_s18, %s8222_s18  }
   0x4   : > { %p25_p0 = scmp.ge.s32.totalorder %s24_s23, 4  ;;  %p5243_p1 = scmp.ge.s32.totalorder %s6632_s22, 1 }
   0x5   : > { %p201_p2 = scmp.lt.s32.totalorder %s6632_s22, 9 }
   0x6   : > { %s8227_s23 = smov (%p25_p0, %s24_s23), 0  ;;  %s8229_s24 = smov (!%p25_p0, %s27_s24), %s6628_s21 }
   0x7   : > { %p202_p3 = pnand %p5243_p1, %p201_p2  ;;  %p29_p4 = scmp.ge.s32.totalorder %s8229_s24, 2 }
   0x8   : > { %p234_p5 = scmp.lt.s32.totalorder (!%p202_p3), %s6620_s19, 1  ;;  %s6701_s25 = sshll.u32 (!%p202_p3), %s6616_s18, 2  ;;  %vm252_vm0 = vcmask (!%p202_p3), 24576   ;;  %vm253_vm1 = vsmask.f32 (!%p202_p3), 256 }
   0x9   : > { %s8231_s24 = smov (%p29_p4, %s8229_s24), 0  ;;  %205 = sbr.rel (%p202_p3) target bundleno = 1081 (0x439), region = 40 }
   0xa   : > { %p242_p6 = scmp.lt.s32.totalorder (!%p202_p3), %s6701_s25, 15  ;;  %vm6706_vm2 = vmand (!%p202_p3), %vm252_vm0, %vm253_vm1  ;;  %v255_v1 = vld [vmem:[#allocation2] sm:$0x1] (!%p202_p3)  ;;  %v258_v2 = vld [vmem:[#allocation2 + $0xc] sm:$0x1] (!%p202_p3)  ;;  %p5251_p7 = scmp.ne.s32.totalorder (!%p202_p3), %s6616_s18, 0 }
   0xb   : > { %v256_v3 = vsel (!%p202_p3), %vm6706_vm2, 0, %v255_v1  ;;  %v259_v4 = vsel (!%p202_p3), %vm6706_vm2, 0, %v258_v2  ;;  %v261_v5 = vld [vmem:[#allocation2 + $0x18] sm:$0x1] (!%p202_p3)  ;;  %v264_v7 = vld [vmem:[#allocation2 + $0x24] sm:$0x1] (!%p202_p3) }
   0xc   : > { %257 = vst [vmem:[#allocation2] sm:$0x1] (!%p202_p3), %v256_v3  ;;  %260 = vst [vmem:[#allocation2 + $0xc] sm:$0x1] (!%p202_p3), %v259_v4  ;;  %v262_v6 = vsel (!%p202_p3), %vm6706_vm2, 0, %v261_v5  ;;  %v265_v9 = vsel (!%p202_p3), %vm6706_vm2, 0, %v264_v7 }
   0xd   : > { %v267_v8 = vld [vmem:[#allocation2 + $0x30] sm:$0x1] (!%p202_p3)  ;;  %263 = vst [vmem:[#allocation2 + $0x18] sm:$0x1] (!%p202_p3), %v262_v6  ;;  %v270_v11 = vld [vmem:[#allocation2 + $0x3c] sm:$0x1] (!%p202_p3) }
   0xe   : > { %v268_v10 = vsel (!%p202_p3), %vm6706_vm2, 0, %v267_v8  ;;  %266 = vst [vmem:[#allocation2 + $0x24] sm:$0x1] (!%p202_p3), %v265_v9  ;;  %v271_v12 = vsel (!%p202_p3), %vm6706_vm2, 0, %v270_v11  ;;  %v273_v13 = vld [vmem:[#allocation2 + $0x48] sm:$0x1] (!%p202_p3) }
   0xf   : > { %269 = vst [vmem:[#allocation2 + $0x30] sm:$0x1] (!%p202_p3), %v268_v10  ;;  %v276_v14 = vld [vmem:[#allocation2 + $0x54] sm:$0x1] (!%p202_p3)  ;;  %272 = vst [vmem:[#allocation2 + $0x3c] sm:$0x1] (!%p202_p3), %v271_v12 }
  0x10   : > { %s8233_s19 = smov (!%p234_p5, %s6620_s19), 1  ;;  %v274_v15 = vsel %vm6706_vm2, 0, %v273_v13  ;;  %v277_v16 = vsel %vm6706_vm2, 0, %v276_v14  ;;  %vm279_vm3 = vsmask.f32 7938  ;;  %vm309_vm5 = vcmask (!%p5251_p7), 27648  }
  0x11   : > { %s243_s26 = scalar_select %p242_p6, %s6701_s25, 15  ;;  %v281_v17 = vld [vmem:[#allocation2 + $0x8] sm:$0x1]  ;;  %275 = vst [vmem:[#allocation2 + $0x48] sm:$0x1] %v274_v15  ;;  %vm6734_vm4 = vmand %vm252_vm0, %vm279_vm3 }
  0x12   : > { %s5697_s27 = sshll.u32 %s8233_s19, 8  ;;  %s5248_s28 = sshll.u32 %s8233_s19, 5  ;;  %278 = vst [vmem:[#allocation2 + $0x54] sm:$0x1] %v277_v16  ;;  %v284_v19 = vld [vmem:[#allocation2 + $0x14] sm:$0x1]  ;;  %vm6776_vm7 = vmand (!%p5251_p7), %vm309_vm5, %vm279_vm3 }
  0x13   : > { %s6724_s6 = scalar_lea.vmem %s8188_s0, %s5697_s27  ;;  %s5247_s7 = sshll.u32 %s243_s26, 1  ;;  %v287_v20 = vld [vmem:[#allocation2 + $0x20] sm:$0x1]  ;;  %v282_v21 = vsel %vm6734_vm4, 0, %v281_v17  ;;  %v285_v22 = vsel %vm6734_vm4, 0, %v284_v19  ;;  %v6634_v36 = vmov (!%p5251_p7), 0  }
  0x14   : > { %s246_s8 = sadd.s32 %s5248_s28, %s5247_s7  ;;  %v288_v23 = vsel %vm6734_vm4, 0, %v287_v20  ;;  %v290_v24 = vld [vmem:[#allocation2 + $0x2c] sm:$0x1]  ;;  %283 = vst [vmem:[#allocation2 + $0x8] sm:$0x1] %v282_v21  ;;  %308 = sbr.rel (%p5251_p7) target bundleno = 54 (0x36), region = 44 }
  0x15   : > { %s5249_s9 = sshll.u32 %s246_s8, 3  ;;  %286 = vst [vmem:[#allocation2 + $0x14] sm:$0x1] %v285_v22  ;;  %289 = vst [vmem:[#allocation2 + $0x20] sm:$0x1] %v288_v23  ;;  %v291_v25 = vsel %vm6734_vm4, 0, %v290_v24 }
  0x16   : > { %s6741_s12 = scalar_lea.vmem %s8193_s5, %s5249_s9  ;;  %v293_v26 = vld [vmem:[#allocation2 + $0x38] sm:$0x1]  ;;  %v296_v27 = vld [vmem:[#allocation2 + $0x44] sm:$0x1]  ;;  %292 = vst [vmem:[#allocation2 + $0x2c] sm:$0x1] %v291_v25 }
  0x17   : > { %v294_v28 = vsel %vm6734_vm4, 0, %v293_v26  ;;  %v297_v29 = vsel %vm6734_vm4, 0, %v296_v27  ;;  %v299_v30 = vld [vmem:[#allocation2 + $0x50] sm:$0x1]  ;;  %v302_v31 = vld [vmem:[#allocation2 + $0x5c] sm:$0x1] }
  0x18   : > { %295 = vst [vmem:[#allocation2 + $0x38] sm:$0x1] %v294_v28  ;;  %298 = vst [vmem:[#allocation2 + $0x44] sm:$0x1] %v297_v29  ;;  %v300_v32 = vsel %vm6734_vm4, 0, %v299_v30  ;;  %v303_v33 = vsel %vm6734_vm4, 0, %v302_v31 }
  0x19   : > { %301 = vst [vmem:[#allocation2 + $0x50] sm:$0x1] %v300_v32  ;;  %304 = vst [vmem:[#allocation2 + $0x5c] sm:$0x1] %v303_v33  ;;  %v317_v34 = vld [vmem:[%s6724_s6] sm:$0xff] (!%p5251_p7)  ;;  %v318_v35 = vld [vmem:[%s6724_s6 + $0x8] sm:$0xff] (!%p5251_p7) }
  0x1a   : > { %310 = vst.msk [vmem:[#allocation2] sm:$0xf] (!%p5251_p7), %vm309_vm5, %v6634_v36  ;;  %311 = vst.msk [vmem:[#allocation2 + $0x4] sm:$0xf] (!%p5251_p7), %vm309_vm5, %v6634_v36  ;;  %v5698_v37 = vpack.c.bf16 (!%p5251_p7), %v317_v34, %v317_v34  ;;  %v5699_v38 = vpack.c.bf16 (!%p5251_p7), %v318_v35, %v318_v35  ;;  %v319_v39 = vld [vmem:[%s6724_s6 + $0x10] sm:$0xff] (!%p5251_p7)  ;;  %v320_v41 = vld [vmem:[%s6724_s6 + $0x18] sm:$0xff] (!%p5251_p7) }
  0x1b   : > { %313 = vst.msk [vmem:[#allocation2 + $0x8] sm:$0x1] %vm252_vm0, %v6634_v36  ;;  %316 = vst.msk [vmem:[#allocation2 + $0x14] sm:$0x1] %vm252_vm0, %v6634_v36  ;;  %vm365_vm6 = vsmask.f32 4368  ;;  %v5700_v40 = vpack.c.bf16 %v319_v39, %v319_v39  ;;  %v5701_v48 = vpack.c.bf16 %v320_v41, %v320_v41 }
  0x1c   : > { %314 = vst.msk [vmem:[#allocation2 + $0xc] sm:$0xf] %vm309_vm5, %v6634_v36  ;;  %315 = vst.msk [vmem:[#allocation2 + $0x10] sm:$0xf] %vm309_vm5, %v6634_v36  ;;  %v368_v42 = vshrl.u32 %v5698_v37, 16  ;;  %v371_v43 = vshll.u32 %v5698_v37, 16 }
  0x1d   : > { %v376_v44 = vshrl.u32 %v5699_v38, 16  ;;  %v379_v45 = vshll.u32 %v5699_v38, 16  ;;  %v385_v46 = vshrl.u32 %v5700_v40, 16  ;;  %v388_v47 = vshll.u32 %v5700_v40, 16  ;;  %v321_v49 = vld [vmem:[%s6724_s6 + $0x20] sm:$0xff]  ;;  %v322_v50 = vld [vmem:[%s6724_s6 + $0x28] sm:$0xff]  ;;  %vm6783_vm8 = vmor %vm253_vm1, %vm365_vm6 }
  0x1e   : > { %v370_v51 = vrot.slane %v368_v42, 7  ;;  %v490_v53 = vld [vmem:[#allocation2 + $0x18] sm:$0xf]  ;;  %v5702_v55 = vpack.c.bf16 %v321_v49, %v321_v49  ;;  %v5703_v56 = vpack.c.bf16 %v322_v50, %v322_v50  ;;  %v323_v57 = vld [vmem:[%s6724_s6 + $0x30] sm:$0xff]  ;;  %v494_v59 = vld [vmem:[#allocation2 + $0x20] sm:$0x1] }
  0x1f   : > { %v378_v54 = vrot.slane %v376_v44, 7  ;;  %v387_v60 = vrot.slane %v385_v46, 7  ;;  %v393_v61 = vshrl.u32 %v5701_v48, 16  ;;  %v396_v62 = vshll.u32 %v5701_v48, 16  ;;  %v497_v5 = vld [vmem:[#allocation2 + $0x24] sm:$0xf] }
  0x20   : > { %v5704_v63 = vpack.c.bf16 %v323_v57, %v323_v57  ;;  %v373_v1 = vor.u32 %v371_v43, %v370_v51  ;;  %v374_v2 = vrot.slane %v370_v51, 4  ;;  %v402_v9 = vshrl.u32 %v5702_v55, 16  ;;  %v501_v13 = vld [vmem:[#allocation2 + $0x2c] sm:$0x1]  ;;  %v504_v15 = vld [vmem:[#allocation2 + $0x30] sm:$0xf] }
  0x21   : > { %v381_v3 = vor.u32 %v379_v45, %v378_v54  ;;  %v383_v4 = vrot.slane %v378_v54, 4  ;;  %v390_v6 = vor.u32 %v388_v47, %v387_v60  ;;  %v391_v7 = vrot.slane %v387_v60, 4  ;;  %v324_v20 = vld [vmem:[%s6724_s6 + $0x38] sm:$0xff]  ;;  %v325_v21 = vld [vmem:[%s6724_s6 + $0x40] sm:$0xff]  ;;  %v326_v22 = vld [vmem:[%s6724_s6 + $0x48] sm:$0xff] }
  0x22   : > { %v395_v8 = vrot.slane %v393_v61, 7  ;;  %v491_v10 = vsel %vm6776_vm7, %v373_v1, %v490_v53  ;;  %v405_v14 = vshll.u32 %v5702_v55, 16  ;;  %v404_v19 = vrot.slane %v402_v9, 7  ;;  %v327_v27 = vld [vmem:[%s6724_s6 + $0x50] sm:$0xff]  ;;  %v328_v28 = vld [vmem:[%s6724_s6 + $0x58] sm:$0xff] }
  0x23   : > { %v382_v11 = vsel %vm6783_vm8, %v374_v2, %v381_v3  ;;  %v495_v12 = vsel %vm6706_vm2, %v383_v4, %v494_v59  ;;  %492 = vst [vmem:[#allocation2 + $0x18] sm:$0xf] %v491_v10  ;;  %v498_v16 = vsel %vm6776_vm7, %v390_v6, %v497_v5  ;;  %v410_v23 = vshrl.u32 %v5703_v56, 16  ;;  %v508_v38 = vld [vmem:[#allocation2 + $0x38] sm:$0x1] }
  0x24   : > { %493 = vst.msk [vmem:[#allocation2 + $0x1c] sm:$0xf] %vm309_vm5, %v382_v11  ;;  %496 = vst [vmem:[#allocation2 + $0x20] sm:$0x1] %v495_v12  ;;  %v398_v17 = vor.u32 %v396_v62, %v395_v8  ;;  %v400_v18 = vrot.slane %v395_v8, 4  ;;  %v413_v24 = vshll.u32 %v5703_v56, 16  ;;  %v407_v31 = vor.u32 %v405_v14, %v404_v19 }
  0x25   : > { %499 = vst [vmem:[#allocation2 + $0x24] sm:$0xf] %v498_v16  ;;  %v419_v25 = vshrl.u32 %v5704_v63, 16  ;;  %v422_v26 = vshll.u32 %v5704_v63, 16  ;;  %v408_v32 = vrot.slane %v404_v19, 4  ;;  %v412_v33 = vrot.slane %v410_v23, 7 }
  0x26   : > { %v399_v29 = vsel %vm6783_vm8, %v391_v7, %v398_v17  ;;  %v502_v30 = vsel %vm6706_vm2, %v400_v18, %v501_v13  ;;  %v5705_v35 = vpack.c.bf16 %v324_v20, %v324_v20  ;;  %v5706_v36 = vpack.c.bf16 %v325_v21, %v325_v21  ;;  %v511_v39 = vld [vmem:[#allocation2 + $0x3c] sm:$0xf]  ;;  %v515_v57 = vld [vmem:[#allocation2 + $0x44] sm:$0x1]  ;;  %v518_v62 = vld [vmem:[#allocation2 + $0x48] sm:$0xf] }
  0x27   : > { %500 = vst.msk [vmem:[#allocation2 + $0x28] sm:$0xf] %vm309_vm5, %v399_v29  ;;  %503 = vst [vmem:[#allocation2 + $0x2c] sm:$0x1] %v502_v30  ;;  %v421_v34 = vrot.slane %v419_v25, 7  ;;  %v505_v37 = vsel %vm6776_vm7, %v407_v31, %v504_v15  ;;  %v5707_v40 = vpack.c.bf16 %v326_v22, %v326_v22  ;;  %v5708_v41 = vpack.c.bf16 %v327_v27, %v327_v27 }
  0x28   : > { %v5709_v42 = vpack.c.bf16 %v328_v28, %v328_v28  ;;  %506 = vst [vmem:[#allocation2 + $0x30] sm:$0xf] %v505_v37  ;;  %v415_v43 = vor.u32 %v413_v24, %v412_v33  ;;  %v417_v44 = vrot.slane %v412_v33, 4  ;;  %v427_v47 = vshrl.u32 %v5705_v35, 16  ;;  %v522_v8 = vld [vmem:[#allocation2 + $0x50] sm:$0x1] }
  0x29   : > { %v424_v45 = vor.u32 %v422_v26, %v421_v34  ;;  %v425_v46 = vrot.slane %v421_v34, 4  ;;  %v430_v48 = vshll.u32 %v5705_v35, 16  ;;  %v436_v49 = vshrl.u32 %v5706_v36, 16  ;;  %v525_v16 = vld [vmem:[#allocation2 + $0x54] sm:$0xf] }
  0x2a   : > { %v439_v50 = vshll.u32 %v5706_v36, 16  ;;  %v416_v51 = vsel %vm6783_vm8, %v408_v32, %v415_v43  ;;  %v509_v53 = vsel %vm6706_vm2, %v417_v44, %v508_v38  ;;  %v444_v55 = vshrl.u32 %v5707_v40, 16  ;;  %v529_v21 = vld [vmem:[#allocation2 + $0x5c] sm:$0x1] }
  0x2b   : > { %v512_v54 = vsel %vm6776_vm7, %v424_v45, %v511_v39  ;;  %507 = vst.msk [vmem:[#allocation2 + $0x34] sm:$0xf] %vm309_vm5, %v416_v51  ;;  %510 = vst [vmem:[#allocation2 + $0x38] sm:$0x1] %v509_v53  ;;  %v429_v56 = vrot.slane %v427_v47, 7  ;;  %v438_v59 = vrot.slane %v436_v49, 7 }
  0x2c   : > { %513 = vst [vmem:[#allocation2 + $0x3c] sm:$0xf] %v512_v54  ;;  %v447_v60 = vshll.u32 %v5707_v40, 16  ;;  %v453_v61 = vshrl.u32 %v5708_v41, 16  ;;  %v446_v63 = vrot.slane %v444_v55, 7  ;;  %v456_v1 = vshll.u32 %v5708_v41, 16 }
  0x2d   : > { %v461_v2 = vshrl.u32 %v5709_v42, 16  ;;  %v464_v3 = vshll.u32 %v5709_v42, 16  ;;  %v432_v4 = vor.u32 %v430_v48, %v429_v56  ;;  %v434_v5 = vrot.slane %v429_v56, 4 }
  0x2e   : > { %v441_v6 = vor.u32 %v439_v50, %v438_v59  ;;  %v442_v7 = vrot.slane %v438_v59, 4  ;;  %v449_v9 = vor.u32 %v447_v60, %v446_v63  ;;  %v451_v10 = vrot.slane %v446_v63, 4 }
  0x2f   : > { %v455_v11 = vrot.slane %v453_v61, 7  ;;  %v463_v12 = vrot.slane %v461_v2, 7  ;;  %v433_v13 = vsel %vm6783_vm8, %v425_v46, %v432_v4  ;;  %v516_v14 = vsel %vm6706_vm2, %v434_v5, %v515_v57 }
  0x30   : > { %v519_v15 = vsel %vm6776_vm7, %v441_v6, %v518_v62  ;;  %514 = vst.msk [vmem:[#allocation2 + $0x40] sm:$0xf] %vm309_vm5, %v433_v13  ;;  %517 = vst [vmem:[#allocation2 + $0x44] sm:$0x1] %v516_v14  ;;  %v450_v17 = vsel %vm6783_vm8, %v442_v7, %v449_v9  ;;  %v523_v18 = vsel %vm6706_vm2, %v451_v10, %v522_v8 }
  0x31   : > { %520 = vst [vmem:[#allocation2 + $0x48] sm:$0xf] %v519_v15  ;;  %v458_v19 = vor.u32 %v456_v1, %v455_v11  ;;  %v459_v20 = vrot.slane %v455_v11, 4  ;;  %521 = vst.msk [vmem:[#allocation2 + $0x4c] sm:$0xf] %vm309_vm5, %v450_v17  ;;  %v466_v22 = vor.u32 %v464_v3, %v463_v12  ;;  %v468_v23 = vrot.slane %v463_v12, 4 }
  0x32   : > { %524 = vst [vmem:[#allocation2 + $0x50] sm:$0x1] %v523_v18 }
  0x33   : > { %v526_v24 = vsel %vm6776_vm7, %v458_v19, %v525_v16  ;;  %v467_v25 = vsel %vm6783_vm8, %v459_v20, %v466_v22  ;;  %v530_v26 = vsel %vm6706_vm2, %v468_v23, %v529_v21 }
  0x34   : > { %527 = vst [vmem:[#allocation2 + $0x54] sm:$0xf] %v526_v24  ;;  %528 = vst.msk [vmem:[#allocation2 + $0x58] sm:$0xf] %vm309_vm5, %v467_v25 }
  0x35   : > { %531 = vst [vmem:[#allocation2 + $0x5c] sm:$0x1] %v530_v26 }
  0x36 PF: > { %p5264_p8 = scmp.ne.s32.totalorder %s6616_s18, 3 }
  0x37   : > { %vm537_vm9 = vcmask (!%p5264_p8), 27648   ;;  %s5265_s13 = sadd.s32 (!%p5264_p8), 4294967294, %s6701_s25  ;;  %v6635_v52 = vmov (!%p5264_p8), 0   ;;  %vm596_vm10 = vsmask.f32 (!%p5264_p8), 4368 }
  0x38   : > { %535 = sbr.rel (%p5264_p8) target bundleno = 87 (0x57), region = 48  ;;  %538 = vst.msk [vmem:[#allocation2 + $0x48] sm:$0xf] (!%p5264_p8), %vm537_vm9, %v6635_v52  ;;  %539 = vst.msk [vmem:[#allocation2 + $0x4c] sm:$0xf] (!%p5264_p8), %vm537_vm9, %v6635_v52  ;;  %s5266_s14 = sshll.u32 (!%p5264_p8), %s5265_s13, 4 }
  0x39   : > { %541 = vst.msk [vmem:[#allocation2 + $0x50] sm:$0x1] (!%p5264_p8), %vm252_vm0, %v6635_v52  ;;  %544 = vst.msk [vmem:[#allocation2 + $0x5c] sm:$0x1] (!%p5264_p8), %vm252_vm0, %v6635_v52  ;;  %s6845_s15 = scalar_lea.vmem (!%p5264_p8), %s6724_s6, %s5266_s14  ;;  %v727_v1 = vld [vmem:[#allocation2 + $0xc] sm:$0xf] (!%p5264_p8) }
  0x3a   : > { %542 = vst.msk [vmem:[#allocation2 + $0x54] sm:$0xf] (!%p5264_p8), %vm537_vm9, %v6635_v52  ;;  %543 = vst.msk [vmem:[#allocation2 + $0x58] sm:$0xf] (!%p5264_p8), %vm537_vm9, %v6635_v52  ;;  %v548_v58 = vld [vmem:[%s6845_s15] sm:$0xff] (!%p5264_p8)  ;;  %v549_v27 = vld [vmem:[%s6845_s15 + $0x8] sm:$0xff] (!%p5264_p8) }
  0x3b   : > { %v550_v28 = vld [vmem:[%s6845_s15 + $0x10] sm:$0xff] (!%p5264_p8)  ;;  %v5710_v29 = vpack.c.bf16 (!%p5264_p8), %v548_v58, %v548_v58  ;;  %v5711_v30 = vpack.c.bf16 (!%p5264_p8), %v549_v27, %v549_v27  ;;  %v551_v32 = vld [vmem:[%s6845_s15 + $0x18] sm:$0xff] (!%p5264_p8)  ;;  %v552_v33 = vld [vmem:[%s6845_s15 + $0x20] sm:$0xff] (!%p5264_p8) }
  0x3c   : > { %v5712_v31 = vpack.c.bf16 (!%p5264_p8), %v550_v28, %v550_v28  ;;  %v5713_v34 = vpack.c.bf16 (!%p5264_p8), %v551_v32, %v551_v32  ;;  %v5714_v35 = vpack.c.bf16 (!%p5264_p8), %v552_v33, %v552_v33  ;;  %v553_v40 = vld [vmem:[%s6845_s15 + $0x28] sm:$0xff] (!%p5264_p8)  ;;  %v554_v41 = vld [vmem:[%s6845_s15 + $0x30] sm:$0xff] (!%p5264_p8)  ;;  %vm6856_vm11 = vmand (!%p5264_p8), %vm537_vm9, %vm279_vm3 }
  0x3d   : > { %v599_v36 = vshrl.u32 (!%p5264_p8), %v5710_v29, 16  ;;  %v602_v37 = vshll.u32 (!%p5264_p8), %v5710_v29, 16  ;;  %v607_v38 = vshrl.u32 (!%p5264_p8), %v5711_v30, 16  ;;  %v610_v39 = vshll.u32 (!%p5264_p8), %v5711_v30, 16  ;;  %v720_v51 = vld [vmem:[#allocation2] sm:$0xf] (!%p5264_p8)  ;;  %vm6862_vm12 = vmor (!%p5264_p8), %vm253_vm1, %vm596_vm10 }
  0x3e   : > { %v616_v42 = vshrl.u32 (!%p5264_p8), %v5712_v31, 16  ;;  %v619_v43 = vshll.u32 (!%p5264_p8), %v5712_v31, 16  ;;  %v624_v44 = vshrl.u32 (!%p5264_p8), %v5713_v34, 16  ;;  %v627_v45 = vshll.u32 (!%p5264_p8), %v5713_v34, 16  ;;  %v724_v54 = vld [vmem:[#allocation2 + $0x8] sm:$0x1] (!%p5264_p8) }
  0x3f   : > { %v601_v46 = vrot.slane %v599_v36, 7  ;;  %v609_v48 = vrot.slane %v607_v38, 7  ;;  %v633_v49 = vshrl.u32 %v5714_v35, 16  ;;  %v636_v50 = vshll.u32 %v5714_v35, 16  ;;  %v731_v2 = vld [vmem:[#allocation2 + $0x14] sm:$0x1] }
  0x40   : > { %v618_v55 = vrot.slane %v616_v42, 7  ;;  %v626_v56 = vrot.slane %v624_v44, 7  ;;  %v5715_v57 = vpack.c.bf16 %v553_v40, %v553_v40  ;;  %v5716_v59 = vpack.c.bf16 %v554_v41, %v554_v41  ;;  %v555_v11 = vld [vmem:[%s6845_s15 + $0x38] sm:$0xff]  ;;  %v556_v12 = vld [vmem:[%s6845_s15 + $0x40] sm:$0xff]  ;;  %v557_v18 = vld [vmem:[%s6845_s15 + $0x48] sm:$0xff] }
  0x41   : > { %v604_v60 = vor.u32 %v602_v37, %v601_v46  ;;  %v605_v61 = vrot.slane %v601_v46, 4  ;;  %v612_v62 = vor.u32 %v610_v39, %v609_v48  ;;  %v614_v63 = vrot.slane %v609_v48, 4  ;;  %v734_v16 = vld [vmem:[#allocation2 + $0x18] sm:$0xf]  ;;  %v558_v19 = vld [vmem:[%s6845_s15 + $0x50] sm:$0xff] }
  0x42   : > { %v621_v3 = vor.u32 %v619_v43, %v618_v55  ;;  %v622_v4 = vrot.slane %v618_v55, 4  ;;  %v629_v5 = vor.u32 %v627_v45, %v626_v56  ;;  %v631_v6 = vrot.slane %v626_v56, 4  ;;  %v738_v27 = vld [vmem:[#allocation2 + $0x20] sm:$0x1]  ;;  %v741_v33 = vld [vmem:[#allocation2 + $0x24] sm:$0xf] }
  0x43   : > { %v721_v7 = vsel %vm6856_vm11, %v604_v60, %v720_v51  ;;  %v613_v8 = vsel %vm6862_vm12, %v605_v61, %v612_v62  ;;  %v725_v9 = vsel %vm6706_vm2, %v614_v63, %v724_v54  ;;  %v635_v10 = vrot.slane %v633_v49, 7  ;;  %v559_v44 = vld [vmem:[%s6845_s15 + $0x58] sm:$0xff]  ;;  %v745_v46 = vld [vmem:[#allocation2 + $0x2c] sm:$0x1]  ;;  %v748_v55 = vld [vmem:[#allocation2 + $0x30] sm:$0xf] }
  0x44   : > { %722 = vst [vmem:[#allocation2] sm:$0xf] %v721_v7  ;;  %723 = vst.msk [vmem:[#allocation2 + $0x4] sm:$0xf] %vm537_vm9, %v613_v8  ;;  %v728_v13 = vsel %vm6856_vm11, %v621_v3, %v727_v1  ;;  %v630_v14 = vsel %vm6862_vm12, %v622_v4, %v629_v5  ;;  %v732_v15 = vsel %vm6706_vm2, %v631_v6, %v731_v2  ;;  %v641_v17 = vshrl.u32 %v5715_v57, 16 }
  0x45   : > { %726 = vst [vmem:[#allocation2 + $0x8] sm:$0x1] %v725_v9  ;;  %729 = vst [vmem:[#allocation2 + $0xc] sm:$0xf] %v728_v13  ;;  %v638_v20 = vor.u32 %v636_v50, %v635_v10  ;;  %v639_v21 = vrot.slane %v635_v10, 4  ;;  %v644_v22 = vshll.u32 %v5715_v57, 16  ;;  %v5717_v26 = vpack.c.bf16 %v555_v11, %v555_v11 }
  0x46   : > { %730 = vst.msk [vmem:[#allocation2 + $0x10] sm:$0xf] %vm537_vm9, %v630_v14  ;;  %733 = vst [vmem:[#allocation2 + $0x14] sm:$0x1] %v732_v15  ;;  %v650_v23 = vshrl.u32 %v5716_v59, 16  ;;  %v643_v24 = vrot.slane %v641_v17, 7  ;;  %v5718_v52 = vpack.c.bf16 %v556_v12, %v556_v12  ;;  %v5719_v29 = vpack.c.bf16 %v557_v18, %v557_v18 }
  0x47   : > { %v653_v25 = vshll.u32 %v5716_v59, 16  ;;  %v735_v58 = vsel %vm6856_vm11, %v638_v20, %v734_v16  ;;  %v5720_v30 = vpack.c.bf16 %v558_v19, %v558_v19  ;;  %v658_v34 = vshrl.u32 %v5717_v26, 16  ;;  %v752_v61 = vld [vmem:[#allocation2 + $0x38] sm:$0x1]  ;;  %v755_v5 = vld [vmem:[#allocation2 + $0x3c] sm:$0xf] }
  0x48   : > { %v652_v28 = vrot.slane %v650_v23, 7  ;;  %736 = vst [vmem:[#allocation2 + $0x18] sm:$0xf] %v735_v58  ;;  %v646_v31 = vor.u32 %v644_v22, %v643_v24  ;;  %v648_v32 = vrot.slane %v643_v24, 4  ;;  %v661_v35 = vshll.u32 %v5717_v26, 16 }
  0x49   : > { %v667_v38 = vshrl.u32 %v5718_v52, 16  ;;  %v670_v39 = vshll.u32 %v5718_v52, 16  ;;  %v660_v42 = vrot.slane %v658_v34, 7  ;;  %v675_v43 = vshrl.u32 %v5719_v29, 16  ;;  %v759_v15 = vld [vmem:[#allocation2 + $0x44] sm:$0x1] }
  0x4a   : > { %v655_v36 = vor.u32 %v653_v25, %v652_v28  ;;  %v656_v37 = vrot.slane %v652_v28, 4  ;;  %v647_v40 = vsel %vm6862_vm12, %v639_v21, %v646_v31  ;;  %v739_v41 = vsel %vm6706_vm2, %v648_v32, %v738_v27 }
  0x4b   : > { %737 = vst.msk [vmem:[#allocation2 + $0x1c] sm:$0xf] %vm537_vm9, %v647_v40  ;;  %740 = vst [vmem:[#allocation2 + $0x20] sm:$0x1] %v739_v41  ;;  %v669_v48 = vrot.slane %v667_v38, 7  ;;  %v678_v49 = vshll.u32 %v5719_v29, 16  ;;  %v663_v51 = vor.u32 %v661_v35, %v660_v42  ;;  %v5721_v63 = vpack.c.bf16 %v559_v44, %v559_v44 }
  0x4c   : > { %v742_v45 = vsel %vm6856_vm11, %v655_v36, %v741_v33  ;;  %v684_v50 = vshrl.u32 %v5720_v30, 16  ;;  %v665_v54 = vrot.slane %v660_v42, 4  ;;  %v677_v56 = vrot.slane %v675_v43, 7 }
  0x4d   : > { %743 = vst [vmem:[#allocation2 + $0x24] sm:$0xf] %v742_v45  ;;  %v687_v57 = vshll.u32 %v5720_v30, 16  ;;  %v672_v59 = vor.u32 %v670_v39, %v669_v48  ;;  %v673_v60 = vrot.slane %v669_v48, 4  ;;  %v664_v1 = vsel %vm6862_vm12, %v656_v37, %v663_v51 }
  0x4e   : > { %v686_v62 = vrot.slane %v684_v50, 7  ;;  %v746_v2 = vsel %vm6706_vm2, %v665_v54, %v745_v46  ;;  %v680_v3 = vor.u32 %v678_v49, %v677_v56  ;;  %v682_v4 = vrot.slane %v677_v56, 4  ;;  %744 = vst.msk [vmem:[#allocation2 + $0x28] sm:$0xf] %vm537_vm9, %v664_v1 }
  0x4f   : > { %747 = vst [vmem:[#allocation2 + $0x2c] sm:$0x1] %v746_v2  ;;  %v749_v6 = vsel %vm6856_vm11, %v672_v59, %v748_v55  ;;  %v692_v8 = vshrl.u32 %v5721_v63, 16  ;;  %v695_v11 = vshll.u32 %v5721_v63, 16 }
  0x50   : > { %v689_v7 = vor.u32 %v687_v57, %v686_v62  ;;  %750 = vst [vmem:[#allocation2 + $0x30] sm:$0xf] %v749_v6  ;;  %v681_v9 = vsel %vm6862_vm12, %v673_v60, %v680_v3  ;;  %v753_v10 = vsel %vm6706_vm2, %v682_v4, %v752_v61  ;;  %v690_v13 = vrot.slane %v686_v62, 4 }
  0x51   : > { %751 = vst.msk [vmem:[#allocation2 + $0x34] sm:$0xf] %vm537_vm9, %v681_v9  ;;  %754 = vst [vmem:[#allocation2 + $0x38] sm:$0x1] %v753_v10  ;;  %v694_v14 = vrot.slane %v692_v8, 7 }
  0x52   : > { %v756_v12 = vsel %vm6856_vm11, %v689_v7, %v755_v5 }
  0x53   : > { %757 = vst [vmem:[#allocation2 + $0x3c] sm:$0xf] %v756_v12  ;;  %v697_v16 = vor.u32 %v695_v11, %v694_v14  ;;  %v699_v17 = vrot.slane %v694_v14, 4 }
  0x55   : > { %v698_v18 = vsel %vm6862_vm12, %v690_v13, %v697_v16  ;;  %v760_v19 = vsel %vm6706_vm2, %v699_v17, %v759_v15 }
  0x56   : > { %758 = vst.msk [vmem:[#allocation2 + $0x40] sm:$0xf] %vm537_vm9, %v698_v18  ;;  %761 = vst [vmem:[#allocation2 + $0x44] sm:$0x1] %v760_v19 }
  0x57 PF: > { %p762_p9 = scmp.gt.s32.totalorder %s6616_s18, 0  ;;  %p763_p10 = scmp.lt.s32.totalorder %s6616_s18, 3 }
  0x59   : > { %p764_p11 = pnand %p763_p10, %p762_p9 }
  0x5a   : > { %s5279_s16 = sadd.s32 (!%p764_p11), 4294967294, %s6701_s25  ;;  %vm997_vm13 = vcmask (!%p764_p11), 27648   ;;  %vm835_vm14 = vsmask.f32 (!%p764_p11), 4368  ;;  %v999_v38 = vld [vmem:[#allocation2] sm:$0xf] (!%p764_p11) }
  0x5b   : > { %767 = sbr.rel (%p764_p11) target bundleno = 128 (0x80), region = 52  ;;  %s5280_s17 = sshll.u32 (!%p764_p11), %s5279_s16, 4  ;;  %vm6927_vm15 = vmand (!%p764_p11), %vm997_vm13, %vm279_vm3  ;;  %v1004_v43 = vld [vmem:[#allocation2 + $0x8] sm:$0x1] (!%p764_p11)  ;;  %v1007_v55 = vld [vmem:[#allocation2 + $0xc] sm:$0xf] (!%p764_p11) }
  0x5c   : > { %s6917_s19 = scalar_lea.vmem (!%p764_p11), %s6724_s6, %s5280_s17  ;;  %vm6933_vm0 = vmor (!%p764_p11), %vm253_vm1, %vm835_vm14  ;;  %v1011_v56 = vld [vmem:[#allocation2 + $0x14] sm:$0x1] (!%p764_p11)  ;;  %v1014_v10 = vld [vmem:[#allocation2 + $0x18] sm:$0xf] (!%p764_p11) }
  0x5d   : > { %v771_v47 = vld [vmem:[%s6917_s19] sm:$0xff] (!%p764_p11)  ;;  %v772_v53 = vld [vmem:[%s6917_s19 + $0x8] sm:$0xff] (!%p764_p11)  ;;  %v773_v20 = vld [vmem:[%s6917_s19 + $0x10] sm:$0xff] (!%p764_p11) }
  0x5e   : > { %v5722_v21 = vpack.c.bf16 (!%p764_p11), %v771_v47, %v771_v47  ;;  %v5723_v22 = vpack.c.bf16 (!%p764_p11), %v772_v53, %v772_v53  ;;  %v5724_v23 = vpack.c.bf16 (!%p764_p11), %v773_v20, %v773_v20  ;;  %v774_v24 = vld [vmem:[%s6917_s19 + $0x18] sm:$0xff] (!%p764_p11)  ;;  %v775_v25 = vld [vmem:[%s6917_s19 + $0x20] sm:$0xff] (!%p764_p11)  ;;  %v776_v26 = vld [vmem:[%s6917_s19 + $0x28] sm:$0xff] (!%p764_p11) }
  0x5f   : > { %v5725_v52 = vpack.c.bf16 (!%p764_p11), %v774_v24, %v774_v24  ;;  %v5726_v58 = vpack.c.bf16 (!%p764_p11), %v775_v25, %v775_v25  ;;  %v5727_v27 = vpack.c.bf16 (!%p764_p11), %v776_v26, %v776_v26  ;;  %v777_v62 = vld [vmem:[%s6917_s19 + $0x30] sm:$0xff] (!%p764_p11)  ;;  %v778_v63 = vld [vmem:[%s6917_s19 + $0x38] sm:$0xff] (!%p764_p11)  ;;  %v779_v5 = vld [vmem:[%s6917_s19 + $0x40] sm:$0xff] (!%p764_p11) }
  0x60   : > { %v838_v28 = vshrl.u32 (!%p764_p11), %v5722_v21, 16  ;;  %v841_v29 = vshll.u32 (!%p764_p11), %v5722_v21, 16  ;;  %v846_v30 = vshrl.u32 (!%p764_p11), %v5723_v22, 16  ;;  %v849_v31 = vshll.u32 (!%p764_p11), %v5723_v22, 16  ;;  %v780_v6 = vld [vmem:[%s6917_s19 + $0x48] sm:$0xff] (!%p764_p11)  ;;  %v782_v24 = vld [vmem:[%s6917_s19 + $0x58] sm:$0xff] (!%p764_p11) }
  0x61   : > { %v855_v32 = vshrl.u32 (!%p764_p11), %v5724_v23, 16  ;;  %v858_v33 = vshll.u32 (!%p764_p11), %v5724_v23, 16  ;;  %v863_v34 = vshrl.u32 (!%p764_p11), %v5725_v52, 16  ;;  %v866_v35 = vshll.u32 (!%p764_p11), %v5725_v52, 16  ;;  %v1018_v14 = vld [vmem:[#allocation2 + $0x20] sm:$0x1] (!%p764_p11) }
  0x62   : > { %v840_v36 = vrot.slane %v838_v28, 7  ;;  %v848_v39 = vrot.slane %v846_v30, 7  ;;  %v872_v40 = vshrl.u32 %v5726_v58, 16  ;;  %v875_v41 = vshll.u32 %v5726_v58, 16  ;;  %v781_v23 = vld [vmem:[%s6917_s19 + $0x50] sm:$0xff] }
  0x63   : > { %v857_v44 = vrot.slane %v855_v32, 7  ;;  %v865_v45 = vrot.slane %v863_v34, 7  ;;  %v880_v46 = vshrl.u32 %v5727_v27, 16  ;;  %v883_v48 = vshll.u32 %v5727_v27, 16  ;;  %v1025_v32 = vld [vmem:[#allocation2 + $0x2c] sm:$0x1] }
  0x64   : > { %v843_v49 = vor.u32 %v841_v29, %v840_v36  ;;  %v844_v50 = vrot.slane %v840_v36, 4  ;;  %v851_v51 = vor.u32 %v849_v31, %v848_v39  ;;  %v853_v54 = vrot.slane %v848_v39, 4  ;;  %v1021_v31 = vld [vmem:[#allocation2 + $0x24] sm:$0xf] }
  0x65   : > { %v860_v57 = vor.u32 %v858_v33, %v857_v44  ;;  %v861_v59 = vrot.slane %v857_v44, 4  ;;  %v868_v60 = vor.u32 %v866_v35, %v865_v45  ;;  %v870_v61 = vrot.slane %v865_v45, 4 }
  0x66   : > { %v1000_v1 = vsel %vm6927_vm15, %v843_v49, %v999_v38  ;;  %v852_v2 = vsel %vm6933_vm0, %v844_v50, %v851_v51  ;;  %v1005_v3 = vsel %vm6706_vm2, %v853_v54, %v1004_v43  ;;  %v874_v4 = vrot.slane %v872_v40, 7  ;;  %v1028_v43 = vld [vmem:[#allocation2 + $0x30] sm:$0xf]  ;;  %v783_v49 = vld [vmem:[%s6917_s19 + $0x60] sm:$0xff]  ;;  %v784_v50 = vld [vmem:[%s6917_s19 + $0x68] sm:$0xff] }
  0x67   : > { %1001 = vst [vmem:[#allocation2] sm:$0xf] %v1000_v1  ;;  %1003 = vst.msk [vmem:[#allocation2 + $0x4] sm:$0xf] %vm997_vm13, %v852_v2  ;;  %v1008_v7 = vsel %vm6927_vm15, %v860_v57, %v1007_v55  ;;  %v869_v8 = vsel %vm6933_vm0, %v861_v59, %v868_v60  ;;  %v1012_v9 = vsel %vm6706_vm2, %v870_v61, %v1011_v56  ;;  %v882_v11 = vrot.slane %v880_v46, 7 }
  0x68   : > { %1006 = vst [vmem:[#allocation2 + $0x8] sm:$0x1] %v1005_v3  ;;  %1009 = vst [vmem:[#allocation2 + $0xc] sm:$0xf] %v1008_v7  ;;  %v877_v12 = vor.u32 %v875_v41, %v874_v4  ;;  %v878_v13 = vrot.slane %v874_v4, 4  ;;  %v5728_v15 = vpack.c.bf16 %v777_v62, %v777_v62  ;;  %v5729_v16 = vpack.c.bf16 %v778_v63, %v778_v63 }
  0x69   : > { %1010 = vst.msk [vmem:[#allocation2 + $0x10] sm:$0xf] %vm997_vm13, %v869_v8  ;;  %1013 = vst [vmem:[#allocation2 + $0x14] sm:$0x1] %v1012_v9  ;;  %v885_v17 = vor.u32 %v883_v48, %v882_v11  ;;  %v887_v18 = vrot.slane %v882_v11, 4  ;;  %v5730_v19 = vpack.c.bf16 %v779_v5, %v779_v5  ;;  %v5731_v47 = vpack.c.bf16 %v780_v6, %v780_v6  ;;  %v785_v5 = vld [vmem:[%s6917_s19 + $0x70] sm:$0xff] }
  0x6a   : > { %v1015_v53 = vsel %vm6927_vm15, %v877_v12, %v1014_v10  ;;  %v889_v20 = vshrl.u32 %v5728_v15, 16  ;;  %v892_v21 = vshll.u32 %v5728_v15, 16  ;;  %v897_v22 = vshrl.u32 %v5729_v16, 16  ;;  %v1032_v56 = vld [vmem:[#allocation2 + $0x38] sm:$0x1] }
  0x6b   : > { %1016 = vst [vmem:[#allocation2 + $0x18] sm:$0xf] %v1015_v53  ;;  %v886_v25 = vsel %vm6933_vm0, %v878_v13, %v885_v17  ;;  %v1019_v26 = vsel %vm6706_vm2, %v887_v18, %v1018_v14  ;;  %v900_v52 = vshll.u32 %v5729_v16, 16  ;;  %v906_v58 = vshrl.u32 %v5730_v19, 16  ;;  %v1035_v63 = vld [vmem:[#allocation2 + $0x3c] sm:$0xf] }
  0x6c   : > { %1017 = vst.msk [vmem:[#allocation2 + $0x1c] sm:$0xf] %vm997_vm13, %v886_v25  ;;  %1020 = vst [vmem:[#allocation2 + $0x20] sm:$0x1] %v1019_v26  ;;  %v891_v27 = vrot.slane %v889_v20, 7  ;;  %v899_v28 = vrot.slane %v897_v22, 7  ;;  %v5732_v35 = vpack.c.bf16 %v781_v23, %v781_v23  ;;  %v5733_v36 = vpack.c.bf16 %v782_v24, %v782_v24 }
  0x6d   : > { %v909_v29 = vshll.u32 %v5730_v19, 16  ;;  %v914_v30 = vshrl.u32 %v5731_v47, 16  ;;  %v908_v33 = vrot.slane %v906_v58, 7  ;;  %v917_v34 = vshll.u32 %v5731_v47, 16  ;;  %v786_v6 = vld [vmem:[%s6917_s19 + $0x78] sm:$0xff] }
  0x6e   : > { %v894_v38 = vor.u32 %v892_v21, %v891_v27  ;;  %v895_v39 = vrot.slane %v891_v27, 4  ;;  %v902_v40 = vor.u32 %v900_v52, %v899_v28  ;;  %v904_v41 = vrot.slane %v899_v28, 4  ;;  %v1039_v16 = vld [vmem:[#allocation2 + $0x44] sm:$0x1]  ;;  %v1042_v22 = vld [vmem:[#allocation2 + $0x48] sm:$0xf] }
  0x6f   : > { %v911_v44 = vor.u32 %v909_v29, %v908_v33  ;;  %v912_v45 = vrot.slane %v908_v33, 4  ;;  %v916_v46 = vrot.slane %v914_v30, 7  ;;  %v923_v48 = vshrl.u32 %v5732_v35, 16  ;;  %v1046_v29 = vld [vmem:[#allocation2 + $0x50] sm:$0x1] }
  0x70   : > { %v1022_v51 = vsel %vm6927_vm15, %v894_v38, %v1021_v31  ;;  %v903_v54 = vsel %vm6933_vm0, %v895_v39, %v902_v40  ;;  %v1026_v55 = vsel %vm6706_vm2, %v904_v41, %v1025_v32  ;;  %v926_v57 = vshll.u32 %v5732_v35, 16  ;;  %v1049_v35 = vld [vmem:[#allocation2 + $0x54] sm:$0xf]  ;;  %v1053_v41 = vld [vmem:[#allocation2 + $0x5c] sm:$0x1] }
  0x71   : > { %1023 = vst [vmem:[#allocation2 + $0x24] sm:$0xf] %v1022_v51  ;;  %1024 = vst.msk [vmem:[#allocation2 + $0x28] sm:$0xf] %vm997_vm13, %v903_v54  ;;  %v1029_v59 = vsel %vm6927_vm15, %v911_v44, %v1028_v43  ;;  %v919_v60 = vor.u32 %v917_v34, %v916_v46  ;;  %v921_v61 = vrot.slane %v916_v46, 4  ;;  %v925_v62 = vrot.slane %v923_v48, 7 }
  0x72   : > { %1027 = vst [vmem:[#allocation2 + $0x2c] sm:$0x1] %v1026_v55  ;;  %1030 = vst [vmem:[#allocation2 + $0x30] sm:$0xf] %v1029_v59  ;;  %v931_v1 = vshrl.u32 %v5733_v36, 16  ;;  %v934_v2 = vshll.u32 %v5733_v36, 16  ;;  %v5734_v3 = vpack.c.bf16 %v783_v49, %v783_v49  ;;  %v5735_v4 = vpack.c.bf16 %v784_v50, %v784_v50 }
  0x73   : > { %v920_v7 = vsel %vm6933_vm0, %v912_v45, %v919_v60  ;;  %v1033_v8 = vsel %vm6706_vm2, %v921_v61, %v1032_v56  ;;  %v928_v9 = vor.u32 %v926_v57, %v925_v62  ;;  %v929_v10 = vrot.slane %v925_v62, 4 }
  0x74   : > { %1031 = vst.msk [vmem:[#allocation2 + $0x34] sm:$0xf] %vm997_vm13, %v920_v7  ;;  %1034 = vst [vmem:[#allocation2 + $0x38] sm:$0x1] %v1033_v8  ;;  %v933_v11 = vrot.slane %v931_v1, 7  ;;  %v940_v12 = vshrl.u32 %v5734_v3, 16  ;;  %v5736_v18 = vpack.c.bf16 %v785_v5, %v785_v5  ;;  %v5737_v19 = vpack.c.bf16 %v786_v6, %v786_v6 }
  0x75   : > { %v943_v13 = vshll.u32 %v5734_v3, 16  ;;  %v948_v14 = vshrl.u32 %v5735_v4, 16  ;;  %v1036_v15 = vsel %vm6927_vm15, %v928_v9, %v1035_v63  ;;  %v951_v17 = vshll.u32 %v5735_v4, 16 }
  0x76   : > { %1037 = vst [vmem:[#allocation2 + $0x3c] sm:$0xf] %v1036_v15  ;;  %v936_v47 = vor.u32 %v934_v2, %v933_v11  ;;  %v938_v53 = vrot.slane %v933_v11, 4  ;;  %v942_v20 = vrot.slane %v940_v12, 7  ;;  %v957_v23 = vshrl.u32 %v5736_v18, 16 }
  0x77   : > { %v950_v21 = vrot.slane %v948_v14, 7  ;;  %v960_v24 = vshll.u32 %v5736_v18, 16  ;;  %v965_v25 = vshrl.u32 %v5737_v19, 16  ;;  %v968_v26 = vshll.u32 %v5737_v19, 16 }
  0x78   : > { %v937_v52 = vsel %vm6933_vm0, %v929_v10, %v936_v47  ;;  %v1040_v58 = vsel %vm6706_vm2, %v938_v53, %v1039_v16  ;;  %v945_v27 = vor.u32 %v943_v13, %v942_v20  ;;  %v946_v28 = vrot.slane %v942_v20, 4 }
  0x79   : > { %1038 = vst.msk [vmem:[#allocation2 + $0x40] sm:$0xf] %vm997_vm13, %v937_v52  ;;  %1041 = vst [vmem:[#allocation2 + $0x44] sm:$0x1] %v1040_v58  ;;  %v953_v30 = vor.u32 %v951_v17, %v950_v21  ;;  %v955_v31 = vrot.slane %v950_v21, 4  ;;  %v959_v32 = vrot.slane %v957_v23, 7 }
  0x7a   : > { %v967_v33 = vrot.slane %v965_v25, 7  ;;  %v1043_v34 = vsel %vm6927_vm15, %v945_v27, %v1042_v22 }
  0x7b   : > { %1044 = vst [vmem:[#allocation2 + $0x48] sm:$0xf] %v1043_v34  ;;  %v954_v36 = vsel %vm6933_vm0, %v946_v28, %v953_v30  ;;  %v1047_v38 = vsel %vm6706_vm2, %v955_v31, %v1046_v29  ;;  %v962_v39 = vor.u32 %v960_v24, %v959_v32  ;;  %v963_v40 = vrot.slane %v959_v32, 4 }
  0x7c   : > { %1045 = vst.msk [vmem:[#allocation2 + $0x4c] sm:$0xf] %vm997_vm13, %v954_v36  ;;  %1048 = vst [vmem:[#allocation2 + $0x50] sm:$0x1] %v1047_v38  ;;  %v970_v43 = vor.u32 %v968_v26, %v967_v33  ;;  %v972_v44 = vrot.slane %v967_v33, 4 }
  0x7d   : > { %v1050_v45 = vsel %vm6927_vm15, %v962_v39, %v1049_v35 }
  0x7e   : > { %1051 = vst [vmem:[#allocation2 + $0x54] sm:$0xf] %v1050_v45  ;;  %v971_v46 = vsel %vm6933_vm0, %v963_v40, %v970_v43  ;;  %v1054_v48 = vsel %vm6706_vm2, %v972_v44, %v1053_v41 }
  0x7f   : > { %1052 = vst.msk [vmem:[#allocation2 + $0x58] sm:$0xf] %vm997_vm13, %v971_v46  ;;  %1055 = vst [vmem:[#allocation2 + $0x5c] sm:$0x1] %v1054_v48 }
  0x80 PF: > { %v5297_v49 = vld [vmem:[%s8189_s1 + $0x2] sm:$0x3]  ;;  %vm1261_vm4 = vcmask 1041408   ;;  %v7010_v42 = vld [vmem:[#allocation2 + $0x4] sm:$0xf]  ;;  %vm1242_vm7 = vcmask 31744  }
  0x81   : > { %v7006_v50 = vld [vmem:[#allocation2] sm:$0xf]  ;;  %6439 = vmatprep.subr.msk.bf16.mxu0 %vm1261_vm4, %v5297_v49  ;;  %v1263_v37 = vsel %vm1261_vm4, %v5297_v49, 0  ;;  %v7012_v51 = vld [vmem:[#allocation2 + $0x8] sm:$0x1]  ;;  %v1088_v55 = vshll.u32 %v7010_v42, 16 }
  0x82   : > { %v1079_v0 = vshrl.u32 %v7006_v50, 16  ;;  %5922 = vmatpush3.bf16.msra.mxu0 %v1263_v37  ;;  %vm1075_vm2 = vsmask.f32 3328  ;;  %vm1076_vm5 = vsmask.f32 7440  ;;  %v1082_v54 = vshll.u32 %v7006_v50, 16 }
  0x83   : > { %v1092_v57 = vshrl.u32 %v7010_v42, 16  ;;  %v1098_v59 = vshll.u32 %v7012_v51, 16  ;;  %v1068_v60 = vld [vmem:[%s8189_s1] sm:$0x3]  ;;  %v1090_v62 = vrot.slane %v1088_v55, 5  ;;  %vm7036_vm6 = vmor %vm1075_vm2, %vm1076_vm5  ;;  %vm1496_vm8 = vcmask 1042432  }
  0x84   : > { %v1081_v56 = vrot.slane %v1079_v0, 4  ;;  %v1084_v61 = vrot.slane %v1082_v54, 5  ;;  %6440 = vmatprep.subr.msk.bf16.mxu0 %vm1261_vm4, %v1068_v60  ;;  %v7023_v63 = vld [vmem:[#allocation2 + $0xc] sm:$0xf]  ;;  %v7025_v1 = vld [vmem:[#allocation2 + $0x10] sm:$0xf] }
  0x85   : > { %v1094_v2 = vrot.slane %v1092_v57, 4  ;;  %v7027_v3 = vld [vmem:[#allocation2 + $0x14] sm:$0x1]  ;;  %v1103_v4 = vshrl.u32 %v7023_v63, 16  ;;  %v1106_v5 = vshll.u32 %v7023_v63, 16  ;;  %v1112_v7 = vshll.u32 %v7025_v1, 16 }
  0x86   : > { %v1085_v6 = vor.u32 %v1084_v61, %v1081_v56  ;;  %v1116_v8 = vshrl.u32 %v7025_v1, 16  ;;  %v1122_v9 = vshll.u32 %v7027_v3, 16  ;;  %v1100_v12 = vrot.slane %v1098_v59, 5  ;;  %v7040_v15 = vld [vmem:[#allocation2 + $0x18] sm:$0xf] }
  0x87   : > { %v1095_v11 = vor.u32 %v1094_v2, %v1090_v62  ;;  %v1105_v13 = vrot.slane %v1103_v4, 4  ;;  %v1108_v14 = vrot.slane %v1106_v5, 5  ;;  %v1114_v17 = vrot.slane %v1112_v7, 5  ;;  %v7042_v19 = vld [vmem:[#allocation2 + $0x1c] sm:$0xf] }
  0x88   : > { %v1086_v16 = vrot.slane %v1085_v6, 4  ;;  %v1118_v18 = vrot.slane %v1116_v8, 4  ;;  %v1124_v20 = vrot.slane %v1122_v9, 5  ;;  %v1395_v21 = vsel %vm1261_vm4, %v1068_v60, 0  ;;  %v7047_v24 = vld [vmem:[#allocation2 + $0x20] sm:$0x1] }
  0x89   : > { %v1096_v47 = vrot.slane %v1095_v11, 4  ;;  %v1109_v53 = vor.u32 %v1108_v14, %v1105_v13  ;;  %v1127_v25 = vshrl.u32 %v7040_v15, 16  ;;  %v1130_v26 = vshll.u32 %v7040_v15, 16  ;;  %v7055_v29 = vld [vmem:[#allocation2 + $0x24] sm:$0xf] }
  0x8a   : > { %v1091_v22 = vsel %vm7036_vm6, %v1086_v16, %v1090_v62  ;;  %v1119_v23 = vor.u32 %v1118_v18, %v1114_v17  ;;  %v1136_v27 = vshll.u32 %v7042_v19, 16  ;;  %v1140_v28 = vshrl.u32 %v7042_v19, 16  ;;  %v7057_v34 = vld [vmem:[#allocation2 + $0x28] sm:$0xf]  ;;  %v7065_v43 = vld [vmem:[#allocation2 + $0x2c] sm:$0x1] }
  0x8b   : > { %v1101_v52 = vsel %vm7036_vm6, %v1096_v47, %v1100_v12  ;;  %v1110_v58 = vrot.slane %v1109_v53, 4  ;;  %v1129_v32 = vrot.slane %v1127_v25, 4  ;;  %v1132_v33 = vrot.slane %v1130_v26, 5  ;;  %v7069_v46 = vld [vmem:[#allocation2 + $0x30] sm:$0xf] }
  0x8c   : > { %v5298_v30 = vcombine.low %v1091_v22, %v1101_v52  ;;  %v1120_v31 = vrot.slane %v1119_v23, 4  ;;  %v1138_v36 = vrot.slane %v1136_v27, 5  ;;  %v1142_v38 = vrot.slane %v1140_v28, 4  ;;  %v7072_v54 = vld [vmem:[#allocation2 + $0x34] sm:$0xf] }
  0x8d   : > { %v1115_v35 = vsel %vm7036_vm6, %v1110_v58, %v1114_v17  ;;  %v1146_v39 = vshll.u32 %v7047_v24, 16  ;;  %v1133_v41 = vor.u32 %v1132_v33, %v1129_v32  ;;  %v1151_v44 = vshrl.u32 %v7055_v29, 16  ;;  %v7078_v60 = vld [vmem:[%s8189_s1 + $0x4] sm:$0x3]  ;;  %v7085_v8 = vld [vmem:[#allocation2 + $0x38] sm:$0x1] }
  0x8e   : > { %5923 = vmatprep.mubr.msk.bf16.mxu0 %vm1242_vm7, %v5298_v30  ;;  %v1125_v40 = vsel %vm7036_vm6, %v1120_v31, %v1124_v20  ;;  %v1154_v45 = vshll.u32 %v7055_v29, 16  ;;  %v1143_v49 = vor.u32 %v1142_v38, %v1138_v36  ;;  %v1160_v0 = vshll.u32 %v7057_v34, 16  ;;  %v7088_v11 = vld [vmem:[#allocation2 + $0x3c] sm:$0xf]  ;;  %v7095_v20 = vld [vmem:[#allocation2 + $0x40] sm:$0xf] }
  0x8f   : > { %v5299_v48 = vcombine.low %v1115_v35, %v1125_v40  ;;  %v1148_v37 = vrot.slane %v1146_v39, 5  ;;  %v1134_v55 = vrot.slane %v1133_v41, 4  ;;  %v1153_v56 = vrot.slane %v1151_v44, 4  ;;  %v7103_v27 = vld [vmem:[#allocation2 + $0x44] sm:$0x1] }
  0x90   : > { %v1156_v57 = vrot.slane %v1154_v45, 5  ;;  %v1164_v59 = vshrl.u32 %v7057_v34, 16  ;;  %v1144_v61 = vrot.slane %v1143_v49, 4  ;;  %v1162_v62 = vrot.slane %v1160_v0, 5 }
  0x91   : > { %5924 = vmatmul.mubr.msk.bf16.vlgmr.msra.gmra.mrb[0].mxu0 %vm1242_vm7, %v5299_v48  ;;  %v1170_v2 = vshll.u32 %v7065_v43, 16  ;;  %v1175_v4 = vshrl.u32 %v7069_v46, 16  ;;  %v1139_v5 = vsel %vm7036_vm6, %v1134_v55, %v1138_v36  ;;  %v1178_v9 = vshll.u32 %v7069_v46, 16 }
  0x92   : > { %5936 = vmatpush3.bf16.msra.mxu0 %v1395_v21  ;;  %v1157_v6 = vor.u32 %v1156_v57, %v1153_v56  ;;  %v1166_v7 = vrot.slane %v1164_v59, 4  ;;  %v1149_v12 = vsel %vm7036_vm6, %v1144_v61, %v1148_v37  ;;  %v1184_v16 = vshll.u32 %v7072_v54, 16 }
  0x93   : > { %v1172_v13 = vrot.slane %v1170_v2, 5  ;;  %v1177_v14 = vrot.slane %v1175_v4, 4  ;;  %6441 = vmatprep.subr.msk.bf16.mxu0 %vm1261_vm4, %v7078_v60  ;;  %v5300_v17 = vcombine.low %v1139_v5, %v1149_v12  ;;  %v1180_v53 = vrot.slane %v1178_v9, 5 }
  0x94   : > { %v1158_v18 = vrot.slane %v1157_v6, 4  ;;  %v1167_v47 = vor.u32 %v1166_v7, %v1162_v62  ;;  %v1186_v21 = vrot.slane %v1184_v16, 5  ;;  %v1188_v22 = vshrl.u32 %v7072_v54, 16 }
  0x95   : > { %v1194_v23 = vshll.u32 %v7085_v8, 16  ;;  %v1199_v25 = vshrl.u32 %v7088_v11, 16  ;;  %5927 = vmatprep.mubr.msk.bf16.mxu0 %vm1242_vm7, %v5300_v17  ;;  %v1181_v58 = vor.u32 %v1180_v53, %v1177_v14  ;;  %v1202_v28 = vshll.u32 %v7088_v11, 16  ;;  %v1480_v53 = vld [vmem:[#allocation2 + $0x18] sm:$0xe] }
  0x96   : > { %v1163_v26 = vsel %vm7036_vm6, %v1158_v18, %v1162_v62  ;;  %v1168_v52 = vrot.slane %v1167_v47, 4  ;;  %v1190_v30 = vrot.slane %v1188_v22, 4  ;;  %v1208_v33 = vshll.u32 %v7095_v20, 16 }
  0x97   : > { %v1196_v31 = vrot.slane %v1194_v23, 5  ;;  %v1201_v32 = vrot.slane %v1199_v25, 4  ;;  %v1182_v36 = vrot.slane %v1181_v58, 4  ;;  %v1204_v38 = vrot.slane %v1202_v28, 5 }
  0x98   : > { %v1173_v35 = vsel %vm7036_vm6, %v1168_v52, %v1172_v13  ;;  %v1212_v39 = vshrl.u32 %v7095_v20, 16  ;;  %v1191_v41 = vor.u32 %v1190_v30, %v1186_v21  ;;  %v1210_v44 = vrot.slane %v1208_v33, 5  ;;  %v5341_v13 = vld [vmem:[%s8189_s1 + $0x6] sm:$0x3] }
  0x99   : > { %v5301_v40 = vcombine.low %v1163_v26, %v1173_v35  ;;  %v1218_v45 = vshll.u32 %v7103_v27, 16  ;;  %v1205_v48 = vor.u32 %v1204_v38, %v1201_v32  ;;  %v1187_v37 = vsel %vm7036_vm6, %v1182_v36, %v1186_v21  ;;  %v1482_v32 = vld [vmem:[#allocation2 + $0x30] sm:$0xe] }
  0x9a   : > { %v1214_v49 = vrot.slane %v1212_v39, 4  ;;  %v1192_v0 = vrot.slane %v1191_v41, 4  ;;  %v5310_v5 = vcombine.low %v7006_v50, %v7010_v42  ;;  %v5311_v7 = vcombine.low %v7023_v63, %v7025_v1  ;;  %v1478_v63 = vld [vmem:[#allocation2] sm:$0xe] }
  0x9b   : > { %5928 = vmatmul.mubr.msk.bf16.gmra.mrb[4].mxu0 %vm1242_vm7, %v5301_v40  ;;  %v1206_v55 = vrot.slane %v1205_v48, 4  ;;  %v1220_v57 = vrot.slane %v1218_v45, 5  ;;  %v5312_v9 = vcombine.low %v7040_v15, %v7042_v19  ;;  %v1580_v12 = vsel %vm1261_vm4, %v7078_v60, 0  ;;  %v5354_v45 = vld [vmem:[%s8189_s1 + $0x8] sm:$0x3] }
  0x9c   : > { %v1215_v56 = vor.u32 %v1214_v49, %v1210_v44  ;;  %v1197_v59 = vsel %vm7036_vm6, %v1192_v0, %v1196_v31  ;;  %v1501_v50 = vrot.slane %v7010_v42, 5  ;;  %v5313_v15 = vcombine.low %v7055_v29, %v7057_v34  ;;  %v1479_v29 = vld [vmem:[#allocation2 + $0xc] sm:$0xe]  ;;  %v1481_v31 = vld [vmem:[#allocation2 + $0x24] sm:$0xe] }
  0x9d   : > { %v5302_v61 = vcombine.low %v1187_v37, %v1197_v59  ;;  %v1211_v62 = vsel %vm7036_vm6, %v1206_v55, %v1210_v44  ;;  %vm1497_vm9 = vcmask 1046532   ;;  %v5314_v60 = vcombine.low %v7069_v46, %v7072_v54  ;;  %v1483_v37 = vld [vmem:[#allocation2 + $0x3c] sm:$0xe] }
  0x9e   : > { %v1216_v2 = vrot.slane %v1215_v56, 4  ;;  %v1504_v14 = vrot.slane %v7012_v51, 5  ;;  %v5322_v16 = vrot.slane %v1478_v63, 9  ;;  %v1503_v17 = vrot.slane %v1501_v50, 4  ;;  %vm7143_vm10 = vmor %vm1496_vm8, %vm1497_vm9  ;;  %v7202_v63 = vld [vmem:[#allocation2 + $0x14] sm:$0x1] }
  0x9f   : > { %5931 = vmatprep.mubr.msk.bf16.mxu0 %vm1242_vm7, %v5302_v61  ;;  %v1508_v42 = vrot.slane %v7025_v1, 5  ;;  %v1515_v51 = vrot.slane %v7042_v19, 5  ;;  %v1511_v21 = vrot.slane %v7027_v3, 5  ;;  %v5315_v22 = vcombine.low %v7088_v11, %v7095_v20 }
  0xa0   : > { %v1221_v4 = vsel %vm7036_vm6, %v1216_v2, %v1220_v57  ;;  %v1502_v47 = vsel %vm7143_vm10, %v5322_v16, %v1501_v50  ;;  %v1505_v46 = vsel %vm7143_vm10, %v1503_v17, %v1504_v14  ;;  %v5323_v25 = vrot.slane %v1479_v29, 9  ;;  %v6498_v2 = vld [vmem:[#allocation2 + $0xc] sm:$0xff]   ;;  %v6500_v50 = vld [vmem:[#allocation2 + $0x24] sm:$0xff]  }
  0xa1   : > { %v5303_v6 = vcombine.low %v1211_v62, %v1221_v4  ;;  %v5329_v23 = vcombine.low %v1502_v47, %v1505_v46  ;;  %v1510_v1 = vrot.slane %v1508_v42, 4  ;;  %v5324_v26 = vrot.slane %v1480_v53, 9  ;;  %v1834_v4 = vld [vmem:[#allocation2 + $0xc] sm:$0xf]  ;;  %v1840_v16 = vld [vmem:[#allocation2 + $0x24] sm:$0xf] }
  0xa2   : > { %v1517_v52 = vrot.slane %v1515_v51, 4  ;;  %v1518_v58 = vrot.slane %v7047_v24, 5  ;;  %v1509_v19 = vsel %vm7143_vm10, %v5323_v25, %v1508_v42  ;;  %v1522_v28 = vrot.slane %v7057_v34, 5  ;;  %v7208_v46 = vld [vmem:[#allocation2 + $0x28] sm:$0xf] }
  0xa3   : > { %5932 = vmatmul.mubr.msk.bf16.gmra.mrb[8].mxu0 %vm1242_vm7, %v5303_v6  ;;  %v1512_v3 = vsel %vm7143_vm10, %v1510_v1, %v1511_v21  ;;  %v1516_v11 = vsel %vm7143_vm10, %v5324_v26, %v1515_v51  ;;  %v1529_v24 = vrot.slane %v7072_v54, 5  ;;  %v5325_v36 = vrot.slane %v1481_v31, 9  ;;  %v7214_v53 = vld [vmem:[%s8189_s1 + $0xa] sm:$0x3] }
  0xa4   : > { %5937 = vmatprep.mubr.msk.bf16.mxu0 %vm1242_vm7, %v5310_v5  ;;  %v1519_v30 = vsel %vm7143_vm10, %v1517_v52, %v1518_v58  ;;  %v5330_v33 = vcombine.low %v1509_v19, %v1512_v3  ;;  %v1524_v38 = vrot.slane %v1522_v28, 4  ;;  %v1525_v39 = vrot.slane %v7065_v43, 5  ;;  %v7196_v5 = vld [vmem:[#allocation2 + $0x10] sm:$0xf] }
  0xa5   : > { %v5331_v35 = vcombine.low %v1516_v11, %v1519_v30  ;;  %v1739_v40 = vsel %vm1261_vm4, %v5341_v13, 0  ;;  %v5326_v41 = vrot.slane %v1482_v32, 9  ;;  %v1531_v34 = vrot.slane %v1529_v24, 4  ;;  %v7226_v11 = vld [vmem:[#allocation2 + $0x20] sm:$0x1] }
  0xa6   : > { %v1532_v44 = vrot.slane %v7085_v8, 5  ;;  %v1523_v54 = vsel %vm7143_vm10, %v5325_v36, %v1522_v28  ;;  %v1526_v43 = vsel %vm7143_vm10, %v1524_v38, %v1525_v39  ;;  %v1536_v48 = vrot.slane %v7095_v20, 5 }
  0xa7   : > { %v1530_v8 = vsel %vm7143_vm10, %v5326_v41, %v1529_v24  ;;  %v5332_v0 = vcombine.low %v1523_v54, %v1526_v43  ;;  %v5327_v56 = vrot.slane %v1483_v37, 9  ;;  %v1539_v59 = vrot.slane %v7103_v27, 5  ;;  %v7230_v24 = vld [vmem:[#allocation2 + $0x2c] sm:$0x1]  ;;  %v6502_v41 = vld [vmem:[#allocation2 + $0x3c] sm:$0xff]  }
  0xa8   : > { %v1533_v49 = vsel %vm7143_vm10, %v1531_v34, %v1532_v44  ;;  %v1538_v57 = vrot.slane %v1536_v48, 4  ;;  %v1853_v6 = vshrl.u32 %v1834_v4, 16  ;;  %v1856_v27 = vshll.u32 %v1834_v4, 16  ;;  %v7235_v43 = vld [vmem:[#allocation2 + $0x34] sm:$0xf] }
  0xa9   : > { %v5333_v55 = vcombine.low %v1530_v8, %v1533_v49  ;;  %v1537_v20 = vsel %vm7143_vm10, %v5327_v56, %v1536_v48  ;;  %v2035_v51 = vsel %vm1261_vm4, %v5354_v45, 0  ;;  %v1904_v25 = vshll.u32 %v1840_v16, 16 }
  0xaa   : > { %v1540_v61 = vsel %vm7143_vm10, %v1538_v57, %v1539_v59  ;;  %v1858_v17 = vrot.slane %v1856_v27, 5  ;;  %v1872_v1 = vshll.u32 %v7202_v63, 16  ;;  %v1910_v26 = vshll.u32 %v7208_v46, 16 }
  0xab   : > { %5938 = vmatmul.mubr.msk.bf16.vlgmr.msra.gmra.mrb[0].mxu0 %vm1242_vm7, %v5311_v7  ;;  %v5334_v62 = vcombine.low %v1537_v20, %v1540_v61  ;;  %v1862_v7 = vshll.u32 %v7196_v5, 16  ;;  %v1914_v52 = vshrl.u32 %v7208_v46, 16  ;;  %v1896_v54 = vshll.u32 %v7226_v11, 16 }
  0xac   : > { %5950 = vmatpush3.bf16.msra.mxu0 %v1580_v12  ;;  %5941 = vmatprep.mubr.msk.bf16.mxu0 %vm1242_vm7, %v5312_v9  ;;  %v1866_v9 = vshrl.u32 %v7196_v5, 16  ;;  %v1837_v12 = vld [vmem:[#allocation2 + $0x18] sm:$0xf]  ;;  %v1874_v36 = vrot.slane %v1872_v1, 5  ;;  %v7232_v38 = vrot.slane %v1910_v26, 5  ;;  %v1920_v49 = vshll.u32 %v7230_v24, 16 }
  0xad   : > { %6442 = vmatprep.subr.msk.bf16.mxu0 %vm1261_vm4, %v5341_v13  ;;  %v6499_v13 = vld [vmem:[#allocation2 + $0x18] sm:$0xff]   ;;  %v1877_v14 = vshrl.u32 %v1837_v12, 16  ;;  %v7206_v42 = vrot.slane %v1862_v7, 5  ;;  %v1880_v47 = vshll.u32 %v1837_v12, 16  ;;  %v1916_v39 = vrot.slane %v1914_v52, 4  ;;  %v6503_v12 = vld [vmem:[#allocation2 + $0x48] sm:$0xff]  }
  0xae   : > { %v1868_v29 = vrot.slane %v1866_v9, 4  ;;  %v1934_v59 = vshll.u32 %v7235_v43, 16  ;;  %v1938_v20 = vshrl.u32 %v7235_v43, 16  ;;  %v1898_v4 = vrot.slane %v1896_v54, 5  ;;  %v7255_v26 = vld [vmem:[#allocation2 + $0x4c] sm:$0xf] }
  0xaf   : > { %v1879_v3 = vrot.slane %v1877_v14, 4  ;;  %v1882_v28 = vrot.slane %v1880_v47, 5  ;;  %v1917_v56 = vor.u32 %v1916_v39, %v7232_v38  ;;  %v1986_v39 = vshrl.u32 %v7255_v26, 16 }
  0xb0   : > { %v1869_v19 = vor.u32 %v1868_v29, %v7206_v42  ;;  %v1936_v29 = vrot.slane %v1934_v59, 5  ;;  %v1940_v47 = vrot.slane %v1938_v20, 4  ;;  %vm3162_vm11 = vcmask 1043456  }
  0xb1   : > { %vm3168_vm12 = vcmask 1040384   ;;  %vm3040_vm13 = vsmask.f32 4368  ;;  %vm7500_vm14 = vmand %vm3162_vm11, %vm279_vm3 }
  0xb2   : > { %v1870_v44 = vrot.slane %v1869_v19, 4  ;;  %vm7506_vm15 = vmand %vm3168_vm12, %vm253_vm1 }
  0xb3   : > { %5942 = vmatmul.mubr.msk.bf16.gmra.mrb[4].mxu0 %vm1242_vm7, %v5313_v15  ;;  %v1855_v15 = vrot.slane %v1853_v6, 4  ;;  %vm7513_vm0 = vmor %vm253_vm1, %vm3040_vm13 }
  0xb4   : > { %5945 = vmatprep.mubr.msk.bf16.mxu0 %vm1242_vm7, %v5314_v60  ;;  %v7204_v60 = vld [vmem:[#allocation2 + $0x1c] sm:$0xf]  ;;  %vm7536_vm1 = vmand %vm3168_vm12, %vm279_vm3 }
  0xb5   : > { %v1886_v21 = vshll.u32 %v7204_v60, 16  ;;  %v1859_v58 = vor.u32 %v1858_v17, %v1855_v15  ;;  %v1922_v15 = vrot.slane %v1920_v49, 5  ;;  %v7253_v17 = vld [vmem:[#allocation2 + $0x38] sm:$0x1] }
  0xb6   : > { %v1944_v19 = vshll.u32 %v7253_v17, 16 }
  0xb7   : > { %v7228_v30 = vrot.slane %v1886_v21, 5  ;;  %v1860_v34 = vrot.slane %v1859_v58, 4  ;;  %v1849_v21 = vld [vmem:[#allocation2 + $0x48] sm:$0xf] }
  0xb9   : > { %v1865_v61 = vsel %vm7036_vm6, %v1860_v34, %v7206_v42 }
  0xbb   : > { %5946 = vmatmul.mubr.msk.bf16.gmra.mrb[8].mxu0 %vm1242_vm7, %v5315_v22  ;;  %v1890_v22 = vshrl.u32 %v7204_v60, 16 }
  0xbc   : > { %5951 = vmatprep.mubr.msk.bf16.mxu0 %vm1242_vm7, %v5329_v23  ;;  %v1901_v23 = vshrl.u32 %v1840_v16, 16  ;;  %v1918_v16 = vrot.slane %v1917_v56, 4  ;;  %v2235_v56 = vsel %vm1261_vm4, %v7214_v53, 0 }
  0xbd   : > { %v1892_v31 = vrot.slane %v1890_v22, 4 }
  0xbe   : > { %v1903_v32 = vrot.slane %v1901_v23, 4 }
  0xbf   : > { %v1893_v48 = vor.u32 %v1892_v31, %v7228_v30  ;;  %v1923_v31 = vsel %vm7036_vm6, %v1918_v16, %v1922_v15 }
  0xc3   : > { %5952 = vmatmul.mubr.msk.bf16.vlgmr.msra.gmra.mrb[0].mxu0 %vm1242_vm7, %v5330_v33  ;;  %v1906_v33 = vrot.slane %v1904_v25, 5 }
  0xc4   : > { %5964 = vmatpush3.bf16.msra.mxu0 %v1739_v40  ;;  %5955 = vmatprep.mubr.msk.bf16.mxu0 %vm1242_vm7, %v5331_v35  ;;  %v6501_v35 = vld [vmem:[#allocation2 + $0x30] sm:$0xff]  }
  0xc5   : > { %6443 = vmatprep.subr.msk.bf16.mxu0 %vm1261_vm4, %v5354_v45  ;;  %v1843_v40 = vld [vmem:[#allocation2 + $0x30] sm:$0xf]  ;;  %v1883_v45 = vor.u32 %v1882_v28, %v1879_v3  ;;  %v1907_v8 = vor.u32 %v1906_v33, %v1903_v32  ;;  %v7263_v3 = vld [vmem:[#allocation2 + $0x44] sm:$0x1]  ;;  %v1941_v33 = vor.u32 %v1940_v47, %v1936_v29 }
  0xc6   : > { %v1925_v37 = vshrl.u32 %v1843_v40, 16  ;;  %v1928_v57 = vshll.u32 %v1843_v40, 16  ;;  %v1968_v34 = vshll.u32 %v7263_v3, 16 }
  0xc7   : > { %v1942_v54 = vrot.slane %v1941_v33, 4 }
  0xc8   : > { %v1927_v14 = vrot.slane %v1925_v37, 4  ;;  %v1930_v42 = vrot.slane %v1928_v57, 5  ;;  %v1970_v20 = vrot.slane %v1968_v34, 5 }
  0xca   : > { %v1931_v32 = vor.u32 %v1930_v42, %v1927_v14 }
  0xcb   : > { %5956 = vmatmul.mubr.msk.bf16.gmra.mrb[4].mxu0 %vm1242_vm7, %v5332_v0  ;;  %v1846_v0 = vld [vmem:[#allocation2 + $0x3c] sm:$0xf] }
  0xcc   : > { %5959 = vmatprep.mubr.msk.bf16.mxu0 %vm1242_vm7, %v5333_v55  ;;  %v7239_v55 = vld [vmem:[#allocation2 + $0x40] sm:$0xf]  ;;  %v1949_v6 = vshrl.u32 %v1846_v0, 16  ;;  %v1952_v27 = vshll.u32 %v1846_v0, 16  ;;  %v1988_v0 = vrot.slane %v1986_v39, 4 }
  0xcd   : > { %v1958_v7 = vshll.u32 %v7239_v55, 16  ;;  %v1962_v9 = vshrl.u32 %v7239_v55, 16 }
  0xce   : > { %v1951_v22 = vrot.slane %v1949_v6, 4  ;;  %v1954_v23 = vrot.slane %v1952_v27, 5 }
  0xcf   : > { %v1960_v25 = vrot.slane %v1958_v7, 5  ;;  %v1964_v1 = vrot.slane %v1962_v9, 4 }
  0xd0   : > { %v1955_v40 = vor.u32 %v1954_v23, %v1951_v22  ;;  %v2163_v22 = vrot.slane %v7204_v60, 5  ;;  %v2173_v60 = vrot.slane %v7230_v24, 5  ;;  %v2184_v24 = vrot.slane %v7239_v55, 5 }
  0xd2   : > { %v1956_v57 = vrot.slane %v1955_v40, 4  ;;  %v2133_v40 = vld [vmem:[#allocation2 + $0x30] sm:$0xe] }
  0xd3   : > { %5960 = vmatmul.mubr.msk.bf16.gmra.mrb[8].mxu0 %vm1242_vm7, %v5334_v62  ;;  %v1875_v62 = vsel %vm7036_vm6, %v1870_v44, %v1874_v36  ;;  %v1982_v36 = vshll.u32 %v7255_v26, 16 }
  0xd4   : > { %5965 = vmatprep.mubr.msk.bf16.mxu0 %vm1242_vm7, %v6498_v2  ;;  %v1884_v2 = vrot.slane %v1883_v45, 4  ;;  %v1961_v7 = vsel %vm7036_vm6, %v1956_v57, %v1960_v25  ;;  %v2135_v57 = vld [vmem:[#allocation2 + $0x48] sm:$0xe] }
  0xd5   : > { %v1984_v37 = vrot.slane %v1982_v36, 5  ;;  %v2177_v36 = vrot.slane %v7235_v43, 5  ;;  %v2186_v43 = vrot.slane %v2184_v24, 4 }
  0xd6   : > { %v1889_v52 = vsel %vm7036_vm6, %v1884_v2, %v7228_v30  ;;  %v1973_v30 = vshrl.u32 %v1849_v21, 16 }
  0xd7   : > { %v1989_v6 = vor.u32 %v1988_v0, %v1984_v37  ;;  %v2191_v0 = vrot.slane %v7255_v26, 5 }
  0xd9   : > { %v1990_v16 = vrot.slane %v1989_v6, 4 }
  0xdb   : > { %5966 = vmatmul.mubr.msk.bf16.vlgmr.msra.gmra.mrb[0].mxu0 %vm1242_vm7, %v6499_v13  ;;  %v1894_v13 = vrot.slane %v1893_v48, 4  ;;  %v1946_v48 = vrot.slane %v1944_v19, 5 }
  0xdc   : > { %5978 = vmatpush3.bf16.msra.mxu0 %v2035_v51  ;;  %5969 = vmatprep.mubr.msk.bf16.mxu0 %vm1242_vm7, %v6500_v50  ;;  %v1908_v50 = vrot.slane %v1907_v8, 4  ;;  %v5355_v51 = vcombine.low %v1865_v61, %v1875_v62  ;;  %v1975_v8 = vrot.slane %v1973_v30, 4  ;;  %v7277_v61 = vld [vmem:[#allocation2 + $0x50] sm:$0x1]  ;;  %v5386_v62 = vld [vmem:[%s8189_s1 + $0xc] sm:$0x3] }
  0xdd   : > { %6444 = vmatprep.subr.msk.bf16.mxu0 %vm1261_vm4, %v7214_v53  ;;  %v1899_v58 = vsel %vm7036_vm6, %v1894_v13, %v1898_v4  ;;  %v1947_v53 = vsel %vm7036_vm6, %v1942_v54, %v1946_v48  ;;  %v1992_v27 = vshll.u32 %v7277_v61, 16  ;;  %v2130_v13 = vld [vmem:[#allocation2 + $0xc] sm:$0xe]  ;;  %v2180_v54 = vrot.slane %v7253_v17, 5 }
  0xde   : > { %v1913_v28 = vsel %vm7036_vm6, %v1908_v50, %v7232_v38  ;;  %v5356_v44 = vcombine.low %v1889_v52, %v1899_v58  ;;  %v1932_v38 = vrot.slane %v1931_v32, 4  ;;  %v2132_v52 = vld [vmem:[#allocation2 + $0x24] sm:$0xe]  ;;  %v2166_v32 = vrot.slane %v7226_v11, 5 }
  0xdf   : > { %v5357_v45 = vcombine.low %v1913_v28, %v1923_v31  ;;  %v1994_v42 = vrot.slane %v1992_v27, 5  ;;  %v2165_v31 = vrot.slane %v2163_v22, 4  ;;  %v5369_v33 = vrot.slane %v2132_v52, 9  ;;  %v6504_v27 = vld [vmem:[#allocation2 + $0x18] sm:$0xff]   ;;  %v7365_v52 = vld [vmem:[%s8189_s1 + $0x10] sm:$0x3] }
  0xe0   : > { %v1937_v2 = vsel %vm7036_vm6, %v1932_v38, %v1936_v29  ;;  %v5367_v29 = vrot.slane %v2130_v13, 9  ;;  %v2179_v38 = vrot.slane %v2177_v36, 4  ;;  %v2394_v48 = vsel %vm1261_vm4, %v5386_v62, 0 }
  0xe1   : > { %v5358_v50 = vcombine.low %v1937_v2, %v1947_v53  ;;  %v2193_v2 = vrot.slane %v2191_v0, 4  ;;  %v2194_v53 = vrot.slane %v7277_v61, 5 }
  0xe2   : > { %v2181_v17 = vsel %vm7143_vm10, %v2179_v38, %v2180_v54 }
  0xe3   : > { %5970 = vmatmul.mubr.msk.bf16.gmra.mrb[4].mxu0 %vm1242_vm7, %v6501_v35  ;;  %v1976_v35 = vshll.u32 %v1849_v21, 16 }
  0xe4   : > { %5973 = vmatprep.mubr.msk.bf16.mxu0 %vm1242_vm7, %v6502_v41  ;;  %v1965_v41 = vor.u32 %v1964_v1, %v1960_v25  ;;  %v2131_v1 = vld [vmem:[#allocation2 + $0x18] sm:$0xe] }
  0xe5   : > { %v1978_v49 = vrot.slane %v1976_v35, 5  ;;  %v5368_v28 = vrot.slane %v2131_v1, 9  ;;  %v7359_v1 = vld [vmem:[#allocation2 + $0x34] sm:$0xf] }
  0xe6   : > { %v1966_v59 = vrot.slane %v1965_v41, 4  ;;  %v2134_v41 = vld [vmem:[#allocation2 + $0x3c] sm:$0xe] }
  0xe7   : > { %v1979_v4 = vor.u32 %v1978_v49, %v1975_v8  ;;  %v2164_v35 = vsel %vm7143_vm10, %v5368_v28, %v2163_v22  ;;  %v5371_v8 = vrot.slane %v2134_v41, 9  ;;  %v2187_v49 = vrot.slane %v7263_v3, 5 }
  0xe8   : > { %v1971_v9 = vsel %vm7036_vm6, %v1966_v59, %v1970_v20 }
  0xe9   : > { %v5359_v15 = vcombine.low %v1961_v7, %v1971_v9  ;;  %v1980_v14 = vrot.slane %v1979_v4, 4  ;;  %v2185_v3 = vsel %vm7143_vm10, %v5371_v8, %v2184_v24  ;;  %v2195_v4 = vsel %vm7143_vm10, %v2193_v2, %v2194_v53  ;;  %v2489_v7 = vld [vmem:[#allocation2 + $0x18] sm:$0xf]  ;;  %v7347_v9 = vld [vmem:[#allocation2 + $0x1c] sm:$0xf]  ;;  %v6508_v8 = vld [vmem:[#allocation2 + $0x48] sm:$0xff]  }
  0xea   : > { %v2511_v13 = vshll.u32 %v2489_v7, 16  ;;  %v2517_v61 = vshll.u32 %v7347_v9, 16  ;;  %v7381_v24 = vld [vmem:[#allocation2 + $0x38] sm:$0x1] }
  0xeb   : > { %5974 = vmatmul.mubr.msk.bf16.gmra.mrb[8].mxu0 %vm1242_vm7, %v6503_v12  ;;  %v2156_v12 = vrot.slane %v7196_v5, 5  ;;  %v1985_v21 = vsel %vm7036_vm6, %v1980_v14, %v1984_v37  ;;  %v1995_v5 = vsel %vm7036_vm6, %v1990_v16, %v1994_v42  ;;  %v5399_v37 = vld [vmem:[%s8189_s1 + $0xe] sm:$0x3]  ;;  %v6505_v14 = vld [vmem:[#allocation2 + $0x24] sm:$0xff]   ;;  %v6506_v16 = vld [vmem:[#allocation2 + $0x30] sm:$0xff]  }
  0xec   : > { %5979 = vmatprep.mubr.msk.bf16.mxu0 %vm1242_vm7, %v5355_v51  ;;  %v2159_v51 = vrot.slane %v7202_v63, 5  ;;  %v2170_v63 = vrot.slane %v7208_v46, 5  ;;  %v5360_v58 = vcombine.low %v1985_v21, %v1995_v5  ;;  %v2167_v46 = vsel %vm7143_vm10, %v2165_v31, %v2166_v32  ;;  %v7353_v42 = vld [vmem:[#allocation2 + $0x20] sm:$0x1]  ;;  %v2495_v21 = vld [vmem:[#allocation2 + $0x30] sm:$0xf] }
  0xed   : > { %v2158_v47 = vrot.slane %v2156_v12, 4  ;;  %v2157_v23 = vsel %vm7143_vm10, %v5367_v29, %v2156_v12  ;;  %v5375_v34 = vcombine.low %v2164_v35, %v2167_v46  ;;  %v2508_v12 = vshrl.u32 %v2489_v7, 16 }
  0xee   : > { %v2172_v30 = vrot.slane %v2170_v63, 4  ;;  %v2171_v39 = vsel %vm7143_vm10, %v5369_v33, %v2170_v63  ;;  %v7357_v5 = vrot.slane %v2517_v61, 5  ;;  %v2690_v63 = vsel %vm1261_vm4, %v5399_v37, 0 }
  0xef   : > { %v2160_v25 = vsel %vm7143_vm10, %v2158_v47, %v2159_v51  ;;  %v2510_v29 = vrot.slane %v2508_v12, 4  ;;  %v2513_v47 = vrot.slane %v2511_v13, 5  ;;  %v7355_v51 = vld [vmem:[#allocation2 + $0x28] sm:$0xf]  ;;  %v2556_v28 = vshrl.u32 %v2495_v21, 16 }
  0xf0   : > { %v5374_v19 = vcombine.low %v2157_v23, %v2160_v25  ;;  %v2174_v11 = vsel %vm7143_vm10, %v2172_v30, %v2173_v60  ;;  %v2559_v31 = vshll.u32 %v2495_v21, 16  ;;  %v2527_v32 = vshll.u32 %v7353_v42, 16 }
  0xf1   : > { %v2565_v33 = vshll.u32 %v7359_v1, 16  ;;  %v2569_v30 = vshrl.u32 %v7359_v1, 16  ;;  %v2514_v60 = vor.u32 %v2513_v47, %v2510_v29  ;;  %v2558_v41 = vrot.slane %v2556_v28, 4 }
  0xf3   : > { %5980 = vmatmul.mubr.msk.bf16.vlgmr.msra.gmra.mrb[0].mxu0 %vm1242_vm7, %v5356_v44  ;;  %v5376_v44 = vcombine.low %v2171_v39, %v2174_v11  ;;  %v7377_v39 = vld [vmem:[#allocation2 + $0x2c] sm:$0x1]  ;;  %v7383_v38 = vrot.slane %v2565_v33, 5  ;;  %v2571_v54 = vrot.slane %v2569_v30, 4  ;;  %v7406_v33 = vld [vmem:[#allocation2 + $0x58] sm:$0xf] }
  0xf4   : > { %5992 = vmatpush3.bf16.msra.mxu0 %v2235_v56  ;;  %5983 = vmatprep.mubr.msk.bf16.mxu0 %vm1242_vm7, %v5357_v45  ;;  %v5370_v45 = vrot.slane %v2133_v40, 9  ;;  %v2188_v56 = vsel %vm7143_vm10, %v2186_v43, %v2187_v49  ;;  %v2515_v43 = vrot.slane %v2514_v60, 4 }
  0xf5   : > { %6445 = vmatprep.subr.msk.bf16.mxu0 %vm1261_vm4, %v5386_v62  ;;  %v5378_v20 = vcombine.low %v2185_v3, %v2188_v56  ;;  %v5372_v62 = vrot.slane %v2135_v57, 9  ;;  %v2575_v56 = vshll.u32 %v7381_v24, 16 }
  0xf6   : > { %v2178_v55 = vsel %vm7143_vm10, %v5370_v45, %v2177_v36  ;;  %v2529_v45 = vrot.slane %v2527_v32, 5 }
  0xf7   : > { %v5377_v59 = vcombine.low %v2178_v55, %v2181_v17  ;;  %v2192_v26 = vsel %vm7143_vm10, %v5372_v62, %v2191_v0  ;;  %v2551_v55 = vshll.u32 %v7377_v39, 16  ;;  %v7386_v17 = vld [vmem:[#allocation2 + $0x40] sm:$0xf]  ;;  %v2572_v62 = vor.u32 %v2571_v54, %v7383_v38 }
  0xf8   : > { %v5379_v6 = vcombine.low %v2192_v26, %v2195_v4  ;;  %v2589_v53 = vshll.u32 %v7386_v17, 16  ;;  %v2593_v26 = vshrl.u32 %v7386_v17, 16  ;;  %v2520_v4 = vsel %vm7036_vm6, %v2515_v43, %v7357_v5 }
  0xf9   : > { %v2553_v7 = vrot.slane %v2551_v55, 5  ;;  %v2577_v29 = vrot.slane %v2575_v56, 5  ;;  %v2573_v21 = vrot.slane %v2572_v62, 4  ;;  %v2641_v54 = vshrl.u32 %v7406_v33, 16 }
  0xfa   : > { %v2890_v62 = vsel %vm1261_vm4, %v7365_v52, 0 }
  0xfb   : > { %5984 = vmatmul.mubr.msk.bf16.gmra.mrb[4].mxu0 %vm1242_vm7, %v5358_v50  ;;  %v2521_v50 = vshrl.u32 %v7347_v9, 16 }
  0xfc   : > { %5987 = vmatprep.mubr.msk.bf16.mxu0 %vm1242_vm7, %v5359_v15  ;;  %v2492_v15 = vld [vmem:[#allocation2 + $0x24] sm:$0xf] }
  0xfd   : > { %v2523_v22 = vrot.slane %v2521_v50, 4  ;;  %v2532_v23 = vshrl.u32 %v2492_v15, 16  ;;  %v2535_v25 = vshll.u32 %v2492_v15, 16  ;;  %v6509_v15 = vld [vmem:[#allocation2 + $0x54] sm:$0xff]  }
  0xff   : > { %v2524_v35 = vor.u32 %v2523_v22, %v7357_v5  ;;  %v2534_v46 = vrot.slane %v2532_v23, 4  ;;  %v2537_v36 = vrot.slane %v2535_v25, 5  ;;  %v7404_v22 = vld [vmem:[#allocation2 + $0x44] sm:$0x1]  ;;  %v2591_v23 = vrot.slane %v2589_v53, 5 }
 0x100   : > { %v2595_v25 = vrot.slane %v2593_v26, 4 }
 0x101   : > { %v2525_v49 = vrot.slane %v2524_v35, 4  ;;  %v2599_v35 = vshll.u32 %v7404_v22, 16 }
 0x103   : > { %5988 = vmatmul.mubr.msk.bf16.gmra.mrb[8].mxu0 %vm1242_vm7, %v5360_v58  ;;  %v2541_v58 = vshll.u32 %v7355_v51, 16 }
 0x104   : > { %5993 = vmatprep.mubr.msk.bf16.mxu0 %vm1242_vm7, %v5374_v19  ;;  %v2545_v19 = vshrl.u32 %v7355_v51, 16 }
 0x105   : > { %v7379_v11 = vrot.slane %v2541_v58, 5  ;;  %v2504_v58 = vld [vmem:[#allocation2 + $0x54] sm:$0xf] }
 0x106   : > { %v2547_v40 = vrot.slane %v2545_v19, 4 }
 0x108   : > { %v2548_v0 = vor.u32 %v2547_v40, %v7379_v11  ;;  %v2578_v40 = vsel %vm7036_vm6, %v2573_v21, %v2577_v29 }
 0x10b   : > { %5994 = vmatmul.mubr.msk.bf16.vlgmr.msra.gmra.mrb[0].mxu0 %vm1242_vm7, %v5375_v34  ;;  %v2561_v34 = vrot.slane %v2559_v31, 5 }
 0x10c   : > { %6006 = vmatpush3.bf16.msra.mxu0 %v2394_v48  ;;  %5997 = vmatprep.mubr.msk.bf16.mxu0 %vm1242_vm7, %v5376_v44  ;;  %v6507_v44 = vld [vmem:[#allocation2 + $0x3c] sm:$0xff]  }
 0x10d   : > { %6446 = vmatprep.subr.msk.bf16.mxu0 %vm1261_vm4, %v5399_v37  ;;  %v2498_v48 = vld [vmem:[#allocation2 + $0x3c] sm:$0xf]  ;;  %v2538_v37 = vor.u32 %v2537_v36, %v2534_v46  ;;  %v2562_v3 = vor.u32 %v2561_v34, %v2558_v41  ;;  %v7414_v46 = vld [vmem:[#allocation2 + $0x50] sm:$0x1]  ;;  %v2596_v34 = vor.u32 %v2595_v25, %v2591_v23  ;;  %v2814_v25 = vrot.slane %v7353_v42, 5 }
 0x10e   : > { %v2580_v57 = vshrl.u32 %v2498_v48, 16  ;;  %v2583_v2 = vshll.u32 %v2498_v48, 16  ;;  %v2623_v43 = vshll.u32 %v7414_v46, 16  ;;  %v2825_v42 = vrot.slane %v7359_v1, 5 }
 0x10f   : > { %v2597_v55 = vrot.slane %v2596_v34, 4 }
 0x110   : > { %v2582_v47 = vrot.slane %v2580_v57, 4  ;;  %v2585_v5 = vrot.slane %v2583_v2, 5  ;;  %v2625_v26 = vrot.slane %v2623_v43, 5  ;;  %v2827_v34 = vrot.slane %v2825_v42, 4 }
 0x112   : > { %v2586_v41 = vor.u32 %v2585_v5, %v2582_v47 }
 0x113   : > { %5998 = vmatmul.mubr.msk.bf16.gmra.mrb[4].mxu0 %vm1242_vm7, %v5377_v59  ;;  %v2501_v59 = vld [vmem:[#allocation2 + $0x48] sm:$0xf] }
 0x114   : > { %6001 = vmatprep.mubr.msk.bf16.mxu0 %vm1242_vm7, %v5378_v20  ;;  %v7390_v20 = vld [vmem:[#allocation2 + $0x4c] sm:$0xf]  ;;  %v2604_v12 = vshrl.u32 %v2501_v59, 16  ;;  %v2607_v13 = vshll.u32 %v2501_v59, 16  ;;  %v2643_v59 = vrot.slane %v2641_v54, 4 }
 0x115   : > { %v2613_v61 = vshll.u32 %v7390_v20, 16  ;;  %v2617_v50 = vshrl.u32 %v7390_v20, 16  ;;  %v2788_v54 = vld [vmem:[#allocation2 + $0x3c] sm:$0xe] }
 0x116   : > { %v2606_v19 = vrot.slane %v2604_v12, 4  ;;  %v2609_v28 = vrot.slane %v2607_v13, 5 }
 0x117   : > { %v2615_v31 = vrot.slane %v2613_v61, 5  ;;  %v2619_v32 = vrot.slane %v2617_v50, 4  ;;  %v2811_v50 = vrot.slane %v7347_v9, 5 }
 0x118   : > { %v2610_v48 = vor.u32 %v2609_v28, %v2606_v19 }
 0x11a   : > { %v2611_v2 = vrot.slane %v2610_v48, 4  ;;  %v2789_v48 = vld [vmem:[#allocation2 + $0x48] sm:$0xe] }
 0x11b   : > { %6002 = vmatmul.mubr.msk.bf16.gmra.mrb[8].mxu0 %vm1242_vm7, %v5379_v6  ;;  %v2530_v6 = vsel %vm7036_vm6, %v2525_v49, %v2529_v45  ;;  %v2637_v45 = vshll.u32 %v7406_v33, 16 }
 0x11c   : > { %6007 = vmatprep.mubr.msk.bf16.mxu0 %vm1242_vm7, %v6504_v27  ;;  %v2539_v27 = vrot.slane %v2538_v37, 4  ;;  %v2616_v13 = vsel %vm7036_vm6, %v2611_v2, %v2615_v31 }
 0x11d   : > { %v2639_v57 = vrot.slane %v2637_v45, 5 }
 0x11e   : > { %v2544_v30 = vsel %vm7036_vm6, %v2539_v27, %v7379_v11  ;;  %v2628_v11 = vshrl.u32 %v2504_v58, 16 }
 0x11f   : > { %v2644_v12 = vor.u32 %v2643_v59, %v2639_v57  ;;  %v2790_v59 = vld [vmem:[#allocation2 + $0x54] sm:$0xe] }
 0x120   : > { %v5417_v2 = vrot.slane %v2790_v59, 9 }
 0x121   : > { %v2645_v47 = vrot.slane %v2644_v12, 4 }
 0x123   : > { %6008 = vmatmul.mubr.msk.bf16.vlgmr.msra.gmra.mrb[0].mxu0 %vm1242_vm7, %v6505_v14  ;;  %v2549_v14 = vrot.slane %v2548_v0, 4  ;;  %v2601_v0 = vrot.slane %v2599_v35, 5 }
 0x124   : > { %6020 = vmatpush3.bf16.msra.mxu0 %v2690_v63  ;;  %6011 = vmatprep.mubr.msk.bf16.mxu0 %vm1242_vm7, %v6506_v16  ;;  %v2563_v16 = vrot.slane %v2562_v3, 4  ;;  %v5400_v63 = vcombine.low %v2520_v4, %v2530_v6  ;;  %v2630_v3 = vrot.slane %v2628_v11, 4  ;;  %v7428_v4 = vld [vmem:[#allocation2 + $0x5c] sm:$0x1] }
 0x125   : > { %6447 = vmatprep.subr.msk.bf16.mxu0 %vm1261_vm4, %v7365_v52  ;;  %v2554_v60 = vsel %vm7036_vm6, %v2549_v14, %v2553_v7  ;;  %v2602_v27 = vsel %vm7036_vm6, %v2597_v55, %v2601_v0  ;;  %v2647_v52 = vshll.u32 %v7428_v4, 16  ;;  %v5416_v55 = vrot.slane %v2789_v48, 9 }
 0x126   : > { %v2568_v36 = vsel %vm7036_vm6, %v2563_v16, %v7383_v38  ;;  %v5401_v49 = vcombine.low %v2544_v30, %v2554_v60  ;;  %v2587_v38 = vrot.slane %v2586_v41, 4 }
 0x127   : > { %v5402_v37 = vcombine.low %v2568_v36, %v2578_v40  ;;  %v2649_v21 = vrot.slane %v2647_v52, 5  ;;  %v2821_v40 = vrot.slane %v7377_v39, 5 }
 0x128   : > { %v2592_v6 = vsel %vm7036_vm6, %v2587_v38, %v2591_v23  ;;  %v2813_v23 = vrot.slane %v2811_v50, 4  ;;  %v2835_v38 = vrot.slane %v7404_v22, 5 }
 0x129   : > { %v5403_v14 = vcombine.low %v2592_v6, %v2602_v27  ;;  %v2650_v9 = vsel %vm7036_vm6, %v2645_v47, %v2649_v21 }
 0x12a   : > { %v2815_v28 = vsel %vm7143_vm10, %v2813_v23, %v2814_v25 }
 0x12b   : > { %6012 = vmatmul.mubr.msk.bf16.gmra.mrb[4].mxu0 %vm1242_vm7, %v6507_v44  ;;  %v2631_v44 = vshll.u32 %v2504_v58, 16  ;;  %v2818_v58 = vrot.slane %v7355_v51, 5  ;;  %v2828_v51 = vrot.slane %v7381_v24, 5  ;;  %v2839_v24 = vrot.slane %v7390_v20, 5 }
 0x12c   : > { %6015 = vmatprep.mubr.msk.bf16.mxu0 %vm1242_vm7, %v6508_v8  ;;  %v2620_v8 = vor.u32 %v2619_v32, %v2615_v31  ;;  %v2786_v31 = vld [vmem:[#allocation2 + $0x24] sm:$0xe]  ;;  %v2787_v32 = vld [vmem:[#allocation2 + $0x30] sm:$0xe] }
 0x12d   : > { %v2633_v56 = vrot.slane %v2631_v44, 5  ;;  %v5413_v35 = vrot.slane %v2786_v31, 9  ;;  %v2820_v36 = vrot.slane %v2818_v58, 4  ;;  %v5414_v41 = vrot.slane %v2787_v32, 9 }
 0x12e   : > { %v2621_v53 = vrot.slane %v2620_v8, 4  ;;  %v2832_v44 = vrot.slane %v7386_v17, 5  ;;  %v2829_v39 = vsel %vm7143_vm10, %v2827_v34, %v2828_v51  ;;  %v2841_v0 = vrot.slane %v2839_v24, 4 }
 0x12f   : > { %v2634_v7 = vor.u32 %v2633_v56, %v2630_v3  ;;  %v2819_v11 = vsel %vm7143_vm10, %v5413_v35, %v2818_v58  ;;  %v2822_v1 = vsel %vm7143_vm10, %v2820_v36, %v2821_v40  ;;  %v2826_v45 = vsel %vm7143_vm10, %v5414_v41, %v2825_v42  ;;  %v3164_v41 = vld [vmem:[#allocation3] sm:$0xf] }
 0x130   : > { %v2626_v61 = vsel %vm7036_vm6, %v2621_v53, %v2625_v26  ;;  %v5420_v8 = vcombine.low %v2819_v11, %v2822_v1  ;;  %v5421_v43 = vcombine.low %v2826_v45, %v2829_v39  ;;  %v2842_v17 = vrot.slane %v7414_v46, 5  ;;  %v3177_v39 = vld [vmem:[#allocation3 + $0x14] sm:$0x1] }
 0x131   : > { %v5404_v16 = vcombine.low %v2616_v13, %v2626_v61  ;;  %v2635_v29 = vrot.slane %v2634_v7, 4  ;;  %v2846_v56 = vrot.slane %v7406_v33, 5  ;;  %v2849_v26 = vrot.slane %v7428_v4, 5  ;;  %v7493_v7 = vld [vmem:[%s8190_s2] ss:$0 sm:$0xff] }
 0x132   : > { %v2843_v22 = vsel %vm7143_vm10, %v2841_v0, %v2842_v17 }
 0x133   : > { %6016 = vmatmul.mubr.msk.bf16.gmra.mrb[8].mxu0 %vm1242_vm7, %v6509_v15  ;;  %v2785_v15 = vld [vmem:[#allocation2 + $0x18] sm:$0xe]  ;;  %v2848_v53 = vrot.slane %v2846_v56, 4  ;;  %v2847_v33 = vsel %vm7143_vm10, %v5417_v2, %v2846_v56 }
 0x134   : > { %6021 = vmatprep.mubr.msk.bf16.mxu0 %vm1242_vm7, %v5400_v63  ;;  %v5412_v5 = vrot.slane %v2785_v15, 9  ;;  %v2640_v63 = vsel %vm7036_vm6, %v2635_v29, %v2639_v57  ;;  %v2840_v57 = vsel %vm7143_vm10, %v5416_v55, %v2839_v24 }
 0x135   : > { %v5405_v30 = vcombine.low %v2640_v63, %v2650_v9  ;;  %v2850_v6 = vsel %vm7143_vm10, %v2848_v53, %v2849_v26  ;;  %v3173_v9 = vld [vmem:[#allocation3 + $0xc] sm:$0xf] }
 0x136   : > { %v2812_v19 = vsel %vm7143_vm10, %v5412_v5, %v2811_v50  ;;  %v5424_v27 = vcombine.low %v2847_v33, %v2850_v6  ;;  %v3187_v6 = vld [vmem:[#allocation3 + $0x24] sm:$0xf] }
 0x137   : > { %v5419_v60 = vcombine.low %v2812_v19, %v2815_v28 }
 0x13b   : > { %6022 = vmatmul.mubr.msk.bf16.vlgmr.msra.gmra.mrb[0].mxu0 %vm1242_vm7, %v5401_v49  ;;  %v5415_v49 = vrot.slane %v2788_v54, 9 }
 0x13c   : > { %6034 = vmatpush3.bf16.msra.mxu0 %v2890_v62  ;;  %6025 = vmatprep.mubr.msk.bf16.mxu0 %vm1242_vm7, %v5402_v37  ;;  %v2834_v37 = vrot.slane %v2832_v44, 4  ;;  %v5423_v62 = vcombine.low %v2840_v57, %v2843_v22 }
 0x13d   : > { %v2833_v3 = vsel %vm7143_vm10, %v5415_v49, %v2832_v44 }
 0x13e   : > { %v2836_v20 = vsel %vm7143_vm10, %v2834_v37, %v2835_v38  ;;  %v3170_v37 = vld [vmem:[#allocation3 + $0x8] sm:$0x1] }
 0x13f   : > { %v5422_v46 = vcombine.low %v2833_v3, %v2836_v20 }
 0x143   : > { %6026 = vmatmul.mubr.msk.bf16.gmra.mrb[4].mxu0 %vm1242_vm7, %v5403_v14 }
 0x144   : > { %6029 = vmatprep.mubr.msk.bf16.mxu0 %vm1242_vm7, %v5404_v16 }
 0x14b   : > { %6030 = vmatmul.mubr.msk.bf16.gmra.mrb[8].mxu0 %vm1242_vm7, %v5405_v30 }
 0x14c   : > { %6035 = vmatprep.mubr.msk.bf16.mxu0 %vm1242_vm7, %v5419_v60 }
 0x153   : > { %6036 = vmatmul.mubr.msk.bf16.vlgmr.msra.gmra.mrb[0].mxu0 %vm1242_vm7, %v5420_v8 }
 0x154   : > { %6039 = vmatprep.mubr.msk.bf16.mxu0 %vm1242_vm7, %v5421_v43 }
 0x15b   : > { %6040 = vmatmul.mubr.msk.bf16.gmra.mrb[4].mxu0 %vm1242_vm7, %v5422_v46 }
 0x15c   : > { %6043 = vmatprep.mubr.msk.bf16.mxu0 %vm1242_vm7, %v5423_v62 }
 0x163   : > { %6044 = vmatmul.mubr.msk.bf16.gmra.mrb[8].mxu0 %vm1242_vm7, %v5424_v27 }
 0x226   : > { %v6037_v12 = vpop.f32.mrb[0].mxu0 }
 0x227   : > { %v2994_v4 = vadd.f32 %v6037_v12, %v7493_v7  ;;  %v2926_v52 = vpop.f32.mrb[1].mxu0 }
 0x228   : > { %v2992_v13 = vadd.f32 %v7493_v7, %v2926_v52  ;;  %v6038_v61 = vpop.f32.mrb[2].mxu0 }
 0x229   : > { %v5740_v50 = vpack.c.bf16 %v2994_v4, %v2994_v4  ;;  %v2995_v15 = vadd.f32 %v6038_v61, %v7493_v7  ;;  %v2929_v14 = vpop.f32.mrb[3].mxu0 }
 0x22a   : > { %v5738_v16 = vpack.c.bf16 %v2992_v13, %v2992_v13  ;;  %v2993_v29 = vadd.f32 %v7493_v7, %v2929_v14  ;;  %v3180_v13 = vld [vmem:[#allocation3 + $0x18] sm:$0xf] }
 0x22b   : > { %v3060_v47 = vshrl.u32 %v5740_v50, 16  ;;  %v5741_v21 = vpack.c.bf16 %v2995_v15, %v2995_v15  ;;  %v3063_v63 = vshll.u32 %v5740_v50, 16 }
 0x22c   : > { %v3043_v5 = vshrl.u32 %v5738_v16, 16  ;;  %v5739_v23 = vpack.c.bf16 %v2993_v29, %v2993_v29  ;;  %v3046_v58 = vshll.u32 %v5738_v16, 16 }
 0x22d   : > { %v3062_v25 = vrot.slane %v3060_v47, 7  ;;  %v3068_v19 = vshrl.u32 %v5741_v21, 16  ;;  %v3071_v42 = vshll.u32 %v5741_v21, 16 }
 0x22e   : > { %v3045_v31 = vrot.slane %v3043_v5, 7  ;;  %v3051_v32 = vshrl.u32 %v5739_v23, 16  ;;  %v3054_v30 = vshll.u32 %v5739_v23, 16  ;;  %v6041_v60 = vpop.f32.mrb[4].mxu0 }
 0x22f   : > { %v3065_v35 = vor.u32 %v3063_v63, %v3062_v25  ;;  %v3066_v36 = vrot.slane %v3062_v25, 4  ;;  %v3070_v34 = vrot.slane %v3068_v19, 7  ;;  %v2998_v51 = vadd.f32 %v6041_v60, %v7493_v7  ;;  %v2942_v11 = vpop.f32.mrb[5].mxu0 }
 0x230   : > { %v3048_v1 = vor.u32 %v3046_v58, %v3045_v31  ;;  %v3049_v44 = vrot.slane %v3045_v31, 4  ;;  %v3053_v54 = vrot.slane %v3051_v32, 7  ;;  %v2996_v24 = vadd.f32 %v7493_v7, %v2942_v11  ;;  %v6042_v48 = vpop.f32.mrb[6].mxu0 }
 0x231   : > { %v3174_v8 = vsel %vm7500_vm14, %v3065_v35, %v3173_v9  ;;  %v3073_v43 = vor.u32 %v3071_v42, %v3070_v34  ;;  %v3075_v49 = vrot.slane %v3070_v34, 4  ;;  %v5744_v38 = vpack.c.bf16 %v2998_v51, %v2998_v51  ;;  %v2945_v55 = vpop.f32.mrb[7].mxu0 }
 0x232   : > { %3175 = vst [vmem:[#allocation3 + $0xc] sm:$0xf] %v3174_v8  ;;  %v3165_v0 = vsel %vm7500_vm14, %v3048_v1, %v3164_v41  ;;  %v3056_v17 = vor.u32 %v3054_v30, %v3053_v54  ;;  %v3058_v3 = vrot.slane %v3053_v54, 4  ;;  %v5742_v20 = vpack.c.bf16 %v2996_v24, %v2996_v24  ;;  %v3191_v30 = vld [vmem:[#allocation3 + $0x2c] sm:$0x1] }
 0x233   : > { %3166 = vst [vmem:[#allocation3] sm:$0xf] %v3165_v0  ;;  %v3074_v56 = vsel %vm7513_vm0, %v3066_v36, %v3073_v43  ;;  %v3178_v57 = vsel %vm7506_vm15, %v3075_v49, %v3177_v39  ;;  %v3094_v22 = vshrl.u32 %v5744_v38, 16  ;;  %v3097_v53 = vshll.u32 %v5744_v38, 16 }
 0x234   : > { %3176 = vst [vmem:[#allocation3 + $0x10] sm:$0xf] %v3074_v56  ;;  %3179 = vst [vmem:[#allocation3 + $0x14] sm:$0x1] %v3178_v57  ;;  %v3057_v59 = vsel %vm7513_vm0, %v3049_v44, %v3056_v17  ;;  %v3171_v46 = vsel %vm7506_vm15, %v3058_v3, %v3170_v37  ;;  %v3077_v62 = vshrl.u32 %v5742_v20, 16  ;;  %v2999_v26 = vadd.f32 %v6042_v48, %v7493_v7 }
 0x235   : > { %3167 = vst [vmem:[#allocation3 + $0x4] sm:$0xf] %v3057_v59  ;;  %3172 = vst [vmem:[#allocation3 + $0x8] sm:$0x1] %v3171_v46  ;;  %v3096_v2 = vrot.slane %v3094_v22, 7  ;;  %v2997_v33 = vadd.f32 %v7493_v7, %v2945_v55  ;;  %v3080_v12 = vshll.u32 %v5742_v20, 16 }
 0x236   : > { %v3079_v27 = vrot.slane %v3077_v62, 7  ;;  %v6045_v4 = vpop.f32.mrb[8].mxu0  ;;  %v5745_v61 = vpack.c.bf16 %v2999_v26, %v2999_v26  ;;  %v3184_v37 = vld [vmem:[#allocation3 + $0x20] sm:$0x1]  ;;  %v3201_v57 = vld [vmem:[#allocation3 + $0x3c] sm:$0xf] }
 0x237   : > { %v3099_v52 = vor.u32 %v3097_v53, %v3096_v2  ;;  %v5743_v50 = vpack.c.bf16 %v2997_v33, %v2997_v33  ;;  %v2958_v15 = vpop.f32.mrb[9].mxu0  ;;  %v3100_v14 = vrot.slane %v3096_v2, 4  ;;  %v3002_v29 = vadd.f32 %v6045_v4, %v7493_v7  ;;  %v3194_v26 = vld [vmem:[#allocation3 + $0x30] sm:$0xf] }
 0x238   : > { %v3082_v16 = vor.u32 %v3080_v12, %v3079_v27  ;;  %v3000_v47 = vadd.f32 %v7493_v7, %v2958_v15  ;;  %v6046_v21 = vpop.f32.mrb[10].mxu0  ;;  %v3102_v63 = vshrl.u32 %v5745_v61, 16  ;;  %v3105_v9 = vshll.u32 %v5745_v61, 16 }
 0x239   : > { %v3211_v5 = vld [vmem:[#allocation3 + $0xc] sm:$0x1]  ;;  %v3188_v25 = vsel %vm7500_vm14, %v3099_v52, %v3187_v6  ;;  %v3085_v58 = vshrl.u32 %v5743_v50, 16  ;;  %v2961_v19 = vpop.f32.mrb[11].mxu0  ;;  %v3088_v60 = vshll.u32 %v5743_v50, 16  ;;  %v5748_v35 = vpack.c.bf16 %v3002_v29, %v3002_v29 }
 0x23a   : > { %v3212_v31 = vsel %vm7506_vm15, 0, %v3211_v5  ;;  %v3208_v42 = vld [vmem:[#allocation3] sm:$0x1]  ;;  %3189 = vst [vmem:[#allocation3 + $0x24] sm:$0xf] %v3188_v25  ;;  %v3181_v32 = vsel %vm7500_vm14, %v3082_v16, %v3180_v13  ;;  %v3104_v34 = vrot.slane %v3102_v63, 7  ;;  %v5746_v11 = vpack.c.bf16 %v3000_v47, %v3000_v47 }
 0x23b   : > { %3213 = vst [vmem:[#allocation3 + $0xc] sm:$0x1] %v3212_v31  ;;  %v3209_v36 = vsel %vm7506_vm15, 0, %v3208_v42  ;;  %v3230_v41 = vld [vmem:[#allocation3 + $0x14] sm:$0x1]  ;;  %v3087_v51 = vrot.slane %v3085_v58, 7  ;;  %v3003_v24 = vadd.f32 %v6046_v21, %v7493_v7  ;;  %v3001_v6 = vadd.f32 %v7493_v7, %v2961_v19 }
 0x23c   : > { %3182 = vst [vmem:[#allocation3 + $0x18] sm:$0xf] %v3181_v32  ;;  %3210 = vst [vmem:[#allocation3] sm:$0x1] %v3209_v36  ;;  %v3231_v1 = vsel %vm7536_vm1, 0, %v3230_v41  ;;  %v3083_v39 = vrot.slane %v3079_v27, 4  ;;  %v3107_v8 = vor.u32 %v3105_v9, %v3104_v34 }
 0x23d   : > { %v3227_v44 = vld [vmem:[#allocation3 + $0x8] sm:$0x1]  ;;  %v3128_v54 = vshrl.u32 %v5748_v35, 16  ;;  %3232 = vst [vmem:[#allocation3 + $0x14] sm:$0x1] %v3231_v1  ;;  %v3109_v43 = vrot.slane %v3104_v34, 4  ;;  %v3090_v49 = vor.u32 %v3088_v60, %v3087_v51  ;;  %v5749_v22 = vpack.c.bf16 %v3003_v24, %v3003_v24 }
 0x23e   : > { %v3228_v48 = vsel %vm7536_vm1, 0, %v3227_v44  ;;  %v3092_v38 = vrot.slane %v3087_v51, 4  ;;  %v3131_v0 = vshll.u32 %v5748_v35, 16  ;;  %v3111_v17 = vshrl.u32 %v5746_v11, 16  ;;  %v3198_v31 = vld [vmem:[#allocation3 + $0x38] sm:$0x1] }
 0x23f   : > { %3229 = vst [vmem:[#allocation3 + $0x8] sm:$0x1] %v3228_v48  ;;  %v3130_v55 = vrot.slane %v3128_v54, 7  ;;  %v3108_v3 = vsel %vm7513_vm0, %v3100_v14, %v3107_v8  ;;  %v3192_v20 = vsel %vm7506_vm15, %v3109_v43, %v3191_v30  ;;  %v3091_v56 = vsel %vm7513_vm0, %v3083_v39, %v3090_v49  ;;  %v3205_v14 = vld [vmem:[#allocation3 + $0x44] sm:$0x1] }
 0x240   : > { %3190 = vst [vmem:[#allocation3 + $0x28] sm:$0xf] %v3108_v3  ;;  %3193 = vst [vmem:[#allocation3 + $0x2c] sm:$0x1] %v3192_v20  ;;  %v3185_v59 = vsel %vm7506_vm15, %v3092_v38, %v3184_v37  ;;  %v3113_v62 = vrot.slane %v3111_v17, 7  ;;  %v3114_v2 = vshll.u32 %v5746_v11, 16  ;;  %v5747_v15 = vpack.c.bf16 %v3001_v6, %v3001_v6 }
 0x241   : > { %3183 = vst [vmem:[#allocation3 + $0x1c] sm:$0xf] %v3091_v56  ;;  %v3133_v46 = vor.u32 %v3131_v0, %v3130_v55  ;;  %v3217_v53 = vld [vmem:[#allocation3 + $0x24] sm:$0x1]  ;;  %3186 = vst [vmem:[#allocation3 + $0x20] sm:$0x1] %v3185_v59 }
 0x242   : > { %v3136_v33 = vshrl.u32 %v5749_v22, 16  ;;  %v3218_v27 = vsel %vm7506_vm15, 0, %v3217_v53  ;;  %v3116_v52 = vor.u32 %v3114_v2, %v3113_v62  ;;  %v3139_v50 = vshll.u32 %v5749_v22, 16 }
 0x243   : > { %v3214_v12 = vld [vmem:[#allocation3 + $0x18] sm:$0x1]  ;;  %v3202_v4 = vsel %vm7500_vm14, %v3133_v46, %v3201_v57  ;;  %3219 = vst [vmem:[#allocation3 + $0x24] sm:$0x1] %v3218_v27  ;;  %v3134_v16 = vrot.slane %v3130_v55, 4  ;;  %v3119_v21 = vshrl.u32 %v5747_v15, 16 }
 0x244   : > { %v3215_v13 = vsel %vm7506_vm15, 0, %v3214_v12  ;;  %3203 = vst [vmem:[#allocation3 + $0x3c] sm:$0xf] %v3202_v4  ;;  %v3138_v61 = vrot.slane %v3136_v33, 7  ;;  %v3195_v7 = vsel %vm7500_vm14, %v3116_v52, %v3194_v26  ;;  %v3122_v58 = vshll.u32 %v5747_v15, 16 }
 0x245   : > { %3216 = vst [vmem:[#allocation3 + $0x18] sm:$0x1] %v3215_v13  ;;  %3196 = vst [vmem:[#allocation3 + $0x30] sm:$0xf] %v3195_v7  ;;  %v3121_v9 = vrot.slane %v3119_v21, 7  ;;  %v3117_v32 = vrot.slane %v3113_v62, 4 }
 0x246   : > { %v3141_v29 = vor.u32 %v3139_v50, %v3138_v61  ;;  %v3143_v47 = vrot.slane %v3138_v61, 4  ;;  %v6636_v54 = vmov (!%p5251_p7), 0  }
 0x247   : > { %v3236_v5 = vld [vmem:[#allocation3 + $0x2c] sm:$0x1]  ;;  %v3124_v30 = vor.u32 %v3122_v58, %v3121_v9  ;;  %v3126_v60 = vrot.slane %v3121_v9, 4  ;;  %3248 = vst [vmem:[#allocation3] sm:$0xf] (!%p5251_p7), %v6636_v54 }
 0x248   : > { %v3142_v25 = vsel %vm7513_vm0, %v3134_v16, %v3141_v29  ;;  %v3206_v63 = vsel %vm7506_vm15, %v3143_v47, %v3205_v14  ;;  %v3237_v19 = vsel %vm7536_vm1, 0, %v3236_v5  ;;  %v3233_v28 = vld [vmem:[#allocation3 + $0x20] sm:$0x1]  ;;  %3249 = vst [vmem:[#allocation3 + $0x4] sm:$0xf] (!%p5251_p7), %v6636_v54 }
 0x249   : > { %3204 = vst [vmem:[#allocation3 + $0x40] sm:$0xf] %v3142_v25  ;;  %3207 = vst [vmem:[#allocation3 + $0x44] sm:$0x1] %v3206_v63  ;;  %v3234_v42 = vsel %vm7536_vm1, 0, %v3233_v28  ;;  %v3125_v41 = vsel %vm7513_vm0, %v3117_v32, %v3124_v30  ;;  %v3199_v34 = vsel %vm7506_vm15, %v3126_v60, %v3198_v31 }
 0x24a   : > { %3238 = vst [vmem:[#allocation3 + $0x2c] sm:$0x1] %v3237_v19  ;;  %3235 = vst [vmem:[#allocation3 + $0x20] sm:$0x1] %v3234_v42 }
 0x24b   : > { %v3223_v35 = vld [vmem:[#allocation3 + $0x3c] sm:$0x1]  ;;  %3197 = vst [vmem:[#allocation3 + $0x34] sm:$0xf] %v3125_v41  ;;  %3200 = vst [vmem:[#allocation3 + $0x38] sm:$0x1] %v3199_v34 }
 0x24c   : > { %v3224_v36 = vsel %vm7506_vm15, 0, %v3223_v35  ;;  %v3220_v51 = vld [vmem:[#allocation3 + $0x30] sm:$0x1]  ;;  %3250 = vst [vmem:[#allocation3 + $0x8] sm:$0x1] (!%p5251_p7), %v6636_v54 }
 0x24d   : > { %3225 = vst [vmem:[#allocation3 + $0x3c] sm:$0x1] %v3224_v36  ;;  %v3221_v11 = vsel %vm7506_vm15, 0, %v3220_v51 }
 0x24e   : > { %3222 = vst [vmem:[#allocation3 + $0x30] sm:$0x1] %v3221_v11  ;;  %3247 = sbr.rel (%p5251_p7) target bundleno = 597 (0x255), region = 56 }
 0x250   : > { %v3242_v1 = vld [vmem:[#allocation3 + $0x44] sm:$0x1] }
 0x251   : > { %v3243_v44 = vsel %vm7536_vm1, 0, %v3242_v1 }
 0x252   : > { %3244 = vst [vmem:[#allocation3 + $0x44] sm:$0x1] %v3243_v44  ;;  %v3239_v39 = vld [vmem:[#allocation3 + $0x38] sm:$0x1] }
 0x253   : > { %v3240_v45 = vsel %vm7536_vm1, 0, %v3239_v39 }
 0x254   : > { %3241 = vst [vmem:[#allocation3 + $0x38] sm:$0x1] %v3240_v45 }
 0x255 PF: > { %3253 = sbr.rel (%p5264_p8) target bundleno = 604 (0x25c), region = 60  ;;  %v6637_v40 = vmov (!%p5264_p8), 0  }
 0x256   : > { %3255 = vst [vmem:[#allocation3 + $0x3c] sm:$0xf] (!%p5264_p8), %v6637_v40  ;;  %3256 = vst [vmem:[#allocation3 + $0x40] sm:$0xf] (!%p5264_p8), %v6637_v40 }
 0x257   : > { %3257 = vst [vmem:[#allocation3 + $0x44] sm:$0x1] (!%p5264_p8), %v6637_v40 }
 0x25c PF: > { %v6510_v23 = vld [vmem:[%s8191_s3] sm:$0xff]   ;;  %v6511_v24 = vld [vmem:[%s8191_s3 + $0x8] sm:$0xff]   ;;  %v6512_v48 = vld [vmem:[%s8191_s3 + $0x10] sm:$0xff]   ;;  %vm5136_vm3 = vcmask 64512  }
 0x25d   : > { %6071 = vmatprep.subr.bf16.mxu1 %v6510_v23  ;;  %v6513_v8 = vld [vmem:[%s8191_s3 + $0x18] sm:$0xff]   ;;  %v7606_v43 = vld [vmem:[#allocation3] sm:$0xf]  ;;  %v7608_v49 = vld [vmem:[#allocation3 + $0x4] sm:$0xf] }
 0x25e   : > { %6072 = vmatpush3.bf16.msra.mxu1 %v6510_v23  ;;  %v5474_v37 = vcombine.low %v7606_v43, %v7608_v49  ;;  %v6514_v38 = vld [vmem:[%s8191_s3 + $0x20] sm:$0xff]   ;;  %v6515_v55 = vld [vmem:[%s8191_s3 + $0x28] sm:$0xff]   ;;  %v6516_v0 = vld [vmem:[%s8191_s3 + $0x30] sm:$0xff]   ;;  %v3679_v57 = vrot.slane %v7608_v49, 5  ;;  %v3287_v58 = vshrl.u32 %v7606_v43, 16  ;;  %v3290_v19 = vshll.u32 %v7606_v43, 16 }
 0x25f   : > { %6073 = vmatprep.subr.bf16.mxu1 %v6511_v24  ;;  %v6517_v17 = vld [vmem:[%s8191_s3 + $0x38] sm:$0xff]   ;;  %v7624_v3 = vld [vmem:[#allocation3 + $0xc] sm:$0xf]  ;;  %v7626_v20 = vld [vmem:[#allocation3 + $0x10] sm:$0xf] }
 0x260   : > { %6087 = vmatprep.mubr.bf16.mxu1 %v5474_v37  ;;  %v6519_v56 = vld [vmem:[%s8191_s3 + $0x80] sm:$0xff]   ;;  %v7632_v22 = vld [vmem:[#allocation3 + $0x18] sm:$0xf]  ;;  %v7634_v59 = vld [vmem:[#allocation3 + $0x1c] sm:$0xf]  ;;  %v5475_v2 = vcombine.low %v7624_v3, %v7626_v20  ;;  %v3681_v33 = vrot.slane %v3679_v57, 4 }
 0x261   : > { %v7636_v46 = vld [vmem:[#allocation3 + $0x8] sm:$0x1]  ;;  %v3665_v62 = vld [vmem:[#allocation3] sm:$0xe]  ;;  %v5476_v26 = vcombine.low %v7632_v22, %v7634_v59  ;;  %v7646_v12 = vld [vmem:[#allocation3 + $0x24] sm:$0xf] }
 0x262   : > { %6074 = vmatpush3.bf16.msra.mxu1 %v6511_v24  ;;  %v6521_v53 = vld [vmem:[%s8191_s3 + $0x88] sm:$0xff]   ;;  %v5486_v6 = vrot.slane %v3665_v62, 9  ;;  %v3682_v27 = vrot.slane %v7636_v46, 5  ;;  %v6522_v52 = vld [vmem:[%s8191_s3 + $0x90] sm:$0xff]   ;;  %v6523_v7 = vld [vmem:[%s8191_s3 + $0x98] sm:$0xff]   ;;  %v3686_v29 = vrot.slane %v7626_v20, 5 }
 0x263   : > { %6075 = vmatprep.subr.bf16.mxu1 %v6512_v48  ;;  %v7648_v4 = vld [vmem:[#allocation3 + $0x28] sm:$0xf]  ;;  %v6524_v14 = vld [vmem:[%s8191_s3 + $0xa0] sm:$0xff]   ;;  %v6527_v47 = vld [vmem:[%s8191_s3 + $0xb0] sm:$0xff]   ;;  %v3693_v21 = vrot.slane %v7634_v59, 5  ;;  %v3311_v32 = vshrl.u32 %v7624_v3, 16 }
 0x264   : > { %v3680_v13 = vsel %vm7143_vm10, %v5486_v6, %v3679_v57  ;;  %v3683_v61 = vsel %vm7143_vm10, %v3681_v33, %v3682_v27  ;;  %v5477_v50 = vcombine.low %v7646_v12, %v7648_v4  ;;  %v6525_v16 = vld [vmem:[%s8191_s3 + $0xa8] sm:$0xff]   ;;  %v7673_v5 = vld [vmem:[#allocation3 + $0x14] sm:$0x1]  ;;  %v7675_v63 = vld [vmem:[#allocation3 + $0x20] sm:$0x1]  ;;  %v3688_v28 = vrot.slane %v3686_v29, 4 }
 0x265   : > { %v5506_v15 = vcombine.low %v3680_v13, %v3683_v61  ;;  %v3666_v25 = vld [vmem:[#allocation3 + $0xc] sm:$0xe]  ;;  %v3667_v9 = vld [vmem:[#allocation3 + $0x18] sm:$0xe]  ;;  %v3689_v42 = vrot.slane %v7673_v5, 5  ;;  %v3695_v35 = vrot.slane %v3693_v21, 4 }
 0x266   : > { %6076 = vmatpush3.bf16.msra.mxu1 %v6512_v48  ;;  %v5487_v31 = vrot.slane %v3666_v25, 9  ;;  %v6529_v30 = vld [vmem:[%s8191_s3 + $0xb8] sm:$0xff]   ;;  %v5488_v60 = vrot.slane %v3667_v9, 9  ;;  %v3696_v36 = vrot.slane %v7675_v63, 5  ;;  %v3314_v41 = vshll.u32 %v7624_v3, 16  ;;  %v6530_v44 = vld [vmem:[%s8191_s3 + $0xc0] sm:$0xff]  }
 0x267   : > { %6077 = vmatprep.subr.bf16.mxu1 %v6513_v8  ;;  %v3335_v34 = vshrl.u32 %v7632_v22, 16  ;;  %v7687_v51 = vrot.slane %v3287_v58, 4  ;;  %v3338_v11 = vshll.u32 %v7632_v22, 16  ;;  %v3359_v1 = vshrl.u32 %v7646_v12, 16  ;;  %v7703_v24 = vld [vmem:[#allocation3 + $0x2c] sm:$0x1] }
 0x268   : > { %v3687_v39 = vsel %vm7143_vm10, %v5487_v31, %v3686_v29  ;;  %v3690_v45 = vsel %vm7143_vm10, %v3688_v28, %v3689_v42  ;;  %v3700_v54 = vrot.slane %v7648_v4, 5  ;;  %v3694_v40 = vsel %vm7143_vm10, %v5488_v60, %v3693_v21  ;;  %v3668_v48 = vld [vmem:[#allocation3 + $0x24] sm:$0xe]  ;;  %v4030_v3 = vld [vmem:[#allocation3 + $0xc] sm:$0xf]  ;;  %v6533_v25 = vld [vmem:[%s8191_s3 + $0xd8] sm:$0xff]  }
 0x269   : > { %v3697_v23 = vsel %vm7143_vm10, %v3695_v35, %v3696_v36  ;;  %v7707_v43 = vrot.slane %v3311_v32, 4  ;;  %v7709_v37 = vrot.slane %v3314_v41, 5  ;;  %v5489_v57 = vrot.slane %v3668_v48, 9  ;;  %v6559_v6 = vld [vmem:[%s8191_s3 + $0x40] sm:$0xff]   ;;  %v7727_v27 = vld [vmem:[#allocation3 + $0x14] sm:$0x1] }
 0x26a   : > { %6078 = vmatpush3.bf16.msra.mxu1 %v6513_v8  ;;  %v7705_v8 = vrot.slane %v3290_v19, 5  ;;  %v3702_v22 = vrot.slane %v3700_v54, 4  ;;  %v3703_v62 = vrot.slane %v7703_v24, 5  ;;  %v4043_v33 = vshrl.u32 %v4030_v3, 16  ;;  %6047 = vmatprep.subr.bf16.mxu0 %v6559_v6  ;;  %v4033_v21 = vld [vmem:[#allocation3 + $0x18] sm:$0xf] }
 0x26b   : > { %6079 = vmatprep.subr.bf16.mxu1 %v6514_v38  ;;  %v3701_v13 = vsel %vm7143_vm10, %v5489_v57, %v3700_v54  ;;  %6048 = vmatpush3.bf16.msra.mxu0 %v6559_v6  ;;  %v6563_v19 = vld [vmem:[%s8191_s3 + $0x50] sm:$0xff]   ;;  %v7752_v42 = vld [vmem:[#allocation3 + $0x1c] sm:$0xf]  ;;  %v7754_v32 = vld [vmem:[#allocation3 + $0x20] sm:$0x1]  ;;  %v4070_v35 = vshll.u32 %v4033_v21, 16 }
 0x26c   : > { %v3704_v61 = vsel %vm7143_vm10, %v3702_v22, %v3703_v62  ;;  %v4045_v29 = vrot.slane %v4043_v33, 4  ;;  %v6565_v60 = vld [vmem:[%s8191_s3 + $0x58] sm:$0xff]   ;;  %v4076_v36 = vshll.u32 %v7752_v42, 16  ;;  %v6534_v41 = vld [vmem:[%s8191_s3 + $0xe0] sm:$0xff]   ;;  %v6569_v57 = vld [vmem:[%s8191_s3 + $0x68] sm:$0xff]  }
 0x26d   : > { %v5509_v9 = vcombine.low %v3701_v13, %v3704_v61  ;;  %v3317_v13 = vor.u32 %v7709_v37, %v7707_v43  ;;  %v3330_v61 = vshll.u32 %v7673_v5, 16 }
 0x26e   : > { %6080 = vmatpush3.bf16.msra.mxu1 %v6514_v38  ;;  %v7711_v38 = vrot.slane %v3335_v34, 4  ;;  %v3296_v34 = vshll.u32 %v7608_v49, 16 }
 0x26f   : > { %6081 = vmatprep.subr.bf16.mxu1 %v6515_v55 }
 0x272   : > { %6082 = vmatpush3.bf16.msra.mxu1 %v6515_v55  ;;  %v7713_v55 = vrot.slane %v3338_v11, 5 }
 0x273   : > { %6083 = vmatprep.subr.bf16.mxu1 %v6516_v0 }
 0x276   : > { %6084 = vmatpush3.bf16.msra.mxu1 %v6516_v0  ;;  %v3362_v0 = vshll.u32 %v7646_v12, 16  ;;  %v4046_v12 = vshll.u32 %v4030_v3, 16 }
 0x277   : > { %6085 = vmatprep.subr.bf16.mxu1 %v6517_v17 }
 0x278   : > { %v4048_v58 = vrot.slane %v4046_v12, 5  ;;  %v3324_v12 = vshrl.u32 %v7626_v20, 16 }
 0x27a   : > { %6086 = vmatpush3.bf16.msra.mxu1 %v6517_v17  ;;  %v5507_v17 = vcombine.low %v3687_v39, %v3690_v45  ;;  %v3293_v39 = vor.u32 %v7705_v8, %v7687_v51  ;;  %v6535_v45 = vld [vmem:[%s8191_s3 + $0xe8] sm:$0xff]   ;;  %v3298_v51 = vrot.slane %v3296_v34, 5  ;;  %v3300_v8 = vshrl.u32 %v7608_v49, 16  ;;  %v6536_v49 = vld [vmem:[%s8191_s3 + $0xf0] sm:$0xff]  }
 0x27b   : > { %6095 = vmatprep.subr.bf16.mxu1 %v6519_v56 }
 0x27c   : > { %v3294_v3 = vrot.slane %v3293_v39, 4  ;;  %v3302_v22 = vrot.slane %v3300_v8, 4 }
 0x27d   : > { %6088 = vmatmul.mubr.bf16.vlgmr.msra.gmra.mrb[0].mxu1 %v5475_v2  ;;  %v7717_v2 = vrot.slane %v3359_v1, 4  ;;  %v4080_v1 = vshrl.u32 %v7752_v42, 16 }
 0x27e   : > { %6096 = vmatpush3.bf16.msra.mxu1 %v6519_v56  ;;  %6091 = vmatprep.mubr.bf16.mxu1 %v5476_v26  ;;  %v5508_v56 = vcombine.low %v3694_v40, %v3697_v23  ;;  %v7722_v26 = vld [vmem:[#allocation3 + $0x10] sm:$0xf]  ;;  %v6567_v40 = vld [vmem:[%s8191_s3 + $0x60] sm:$0xff]   ;;  %v4049_v23 = vor.u32 %v4048_v58, %v4045_v29  ;;  %v3303_v33 = vor.u32 %v3302_v22, %v3298_v51  ;;  %v3326_v29 = vrot.slane %v3324_v12, 4 }
 0x27f   : > { %6097 = vmatprep.subr.bf16.mxu1 %v6521_v53  ;;  %v6539_v58 = vld [vmem:[%s8191_s3 + $0x100] sm:$0xff]   ;;  %v3378_v12 = vshll.u32 %v7703_v24, 16 }
 0x280   : > { %v7788_v62 = vrot.slane %v4049_v23, 4 }
 0x282   : > { %6098 = vmatpush3.bf16.msra.mxu1 %v6521_v53  ;;  %v6531_v53 = vld [vmem:[%s8191_s3 + $0xc8] sm:$0xff]  }
 0x283   : > { %6099 = vmatprep.subr.bf16.mxu1 %v6522_v52 }
 0x285   : > { %6092 = vmatmul.mubr.bf16.gmra.mrb[4].mxu1 %v5477_v50  ;;  %v4052_v50 = vshll.u32 %v7722_v26, 16 }
 0x286   : > { %6100 = vmatpush3.bf16.msra.mxu1 %v6522_v52  ;;  %6111 = vmatprep.mubr.bf16.mxu1 %v5506_v15  ;;  %v6561_v52 = vld [vmem:[%s8191_s3 + $0x48] sm:$0xff]   ;;  %v4056_v15 = vshrl.u32 %v7722_v26, 16 }
 0x287   : > { %6101 = vmatprep.subr.bf16.mxu1 %v6523_v7  ;;  %6049 = vmatprep.subr.bf16.mxu0 %v6561_v52  ;;  %v7750_v28 = vrot.slane %v4052_v50, 5  ;;  %v6537_v50 = vld [vmem:[%s8191_s3 + $0xf8] sm:$0xff]  }
 0x288   : > { %v4058_v31 = vrot.slane %v4056_v15, 4  ;;  %6050 = vmatpush3.bf16.msra.mxu0 %v6561_v52  ;;  %v7797_v52 = vrot.slane %v4080_v1, 4  ;;  %v6571_v15 = vld [vmem:[%s8191_s3 + $0x70] sm:$0xff]  }
 0x289   : > { %6051 = vmatprep.subr.bf16.mxu0 %v6563_v19 }
 0x28a   : > { %6102 = vmatpush3.bf16.msra.mxu1 %v6523_v7  ;;  %v7738_v7 = vrot.slane %v3362_v0, 5  ;;  %v4059_v48 = vor.u32 %v4058_v31, %v7750_v28  ;;  %v7779_v0 = vrot.slane %v4070_v35, 5  ;;  %v6573_v31 = vld [vmem:[%s8191_s3 + $0x78] sm:$0xff]   ;;  %v3344_v35 = vshll.u32 %v7634_v59, 16 }
 0x28b   : > { %6103 = vmatprep.subr.bf16.mxu1 %v6524_v14 }
 0x28c   : > { %6052 = vmatpush3.bf16.msra.mxu0 %v6563_v19  ;;  %v7819_v19 = vld [vmem:[#allocation3 + $0x28] sm:$0xf] }
 0x28d   : > { %6053 = vmatprep.subr.bf16.mxu0 %v6565_v60  ;;  %v4104_v8 = vshrl.u32 %v7819_v19, 16 }
 0x28e   : > { %6104 = vmatpush3.bf16.msra.mxu1 %v6524_v14  ;;  %v6532_v14 = vld [vmem:[%s8191_s3 + $0xd0] sm:$0xff]  }
 0x28f   : > { %6105 = vmatprep.subr.bf16.mxu1 %v6525_v16 }
 0x290   : > { %6054 = vmatpush3.bf16.msra.mxu0 %v6565_v60 }
 0x291   : > { %6055 = vmatprep.subr.bf16.mxu0 %v6567_v40 }
 0x292   : > { %6106 = vmatpush3.bf16.msra.mxu1 %v6525_v16  ;;  %v6538_v16 = vld [vmem:[#allocation3 + $0xc] sm:$0xff]  }
 0x293   : > { %6107 = vmatprep.subr.bf16.mxu1 %v6527_v47 }
 0x294   : > { %6056 = vmatpush3.bf16.msra.mxu0 %v6567_v40  ;;  %v7835_v40 = vld [vmem:[%s8191_s3 + $0x200] sm:$0xff]  }
 0x295   : > { %6057 = vmatprep.subr.bf16.mxu0 %v6569_v57 }
 0x296   : > { %6108 = vmatpush3.bf16.msra.mxu1 %v6527_v47  ;;  %v4062_v47 = vshll.u32 %v7727_v27, 16 }
 0x297   : > { %6109 = vmatprep.subr.bf16.mxu1 %v6529_v30 }
 0x298   : > { %v7764_v11 = vrot.slane %v4062_v47, 5  ;;  %v7810_v47 = vld [vmem:[#allocation3 + $0x24] sm:$0xf]  ;;  %6058 = vmatpush3.bf16.msra.mxu0 %v6569_v57  ;;  %v3365_v57 = vor.u32 %v7738_v7, %v7717_v2  ;;  %v3368_v7 = vshll.u32 %v7648_v4, 16 }
 0x299   : > { %6059 = vmatprep.subr.bf16.mxu0 %v6571_v15  ;;  %v4091_v60 = vshrl.u32 %v7810_v47, 16 }
 0x29a   : > { %6110 = vmatpush3.bf16.msra.mxu1 %v6529_v30  ;;  %v4067_v30 = vshrl.u32 %v4033_v21, 16  ;;  %v3318_v21 = vrot.slane %v3317_v13, 4  ;;  %v4055_v13 = vsel %vm7036_vm6, %v7788_v62, %v7750_v28  ;;  %v3370_v24 = vrot.slane %v3368_v7, 5  ;;  %v7875_v28 = vld [vmem:[%s8191_s3 + $0x210] sm:$0xff]  }
 0x29b   : > { %6119 = vmatprep.subr.bf16.mxu1 %v6530_v44  ;;  %v7845_v22 = vrot.slane %v4091_v60, 4 }
 0x29c   : > { %v7773_v54 = vrot.slane %v4067_v30, 4  ;;  %6060 = vmatpush3.bf16.msra.mxu0 %v6571_v15  ;;  %v3366_v15 = vrot.slane %v3365_v57, 4 }
 0x29d   : > { %6112 = vmatmul.mubr.bf16.vlgmr.msra.gmra.mrb[0].mxu1 %v5507_v17  ;;  %v7781_v17 = vrot.slane %v4076_v36, 5  ;;  %v3348_v36 = vshrl.u32 %v7634_v59, 16  ;;  %6061 = vmatprep.subr.bf16.mxu0 %v6573_v31  ;;  %v4100_v59 = vshll.u32 %v7819_v19, 16 }
 0x29e   : > { %6120 = vmatpush3.bf16.msra.mxu1 %v6530_v44  ;;  %6115 = vmatprep.mubr.bf16.mxu1 %v5508_v56  ;;  %v4086_v44 = vshll.u32 %v7754_v32, 16  ;;  %v3306_v56 = vshll.u32 %v7636_v46, 16  ;;  %v3320_v46 = vshll.u32 %v7626_v20, 16  ;;  %v3299_v20 = vsel %vm7036_vm6, %v3294_v3, %v3298_v51  ;;  %v6541_v51 = vld [vmem:[%s8191_s3 + $0x108] sm:$0xff]  }
 0x29f   : > { %6121 = vmatprep.subr.bf16.mxu1 %v6531_v53  ;;  %v3350_v23 = vrot.slane %v3348_v36, 4 }
 0x2a0   : > { %v3308_v6 = vrot.slane %v3306_v56, 5  ;;  %6062 = vmatpush3.bf16.msra.mxu0 %v6573_v31  ;;  %v3371_v31 = vsel %vm7036_vm6, %v3366_v15, %v3370_v24  ;;  %v7920_v15 = vld [vmem:[%s8191_s3 + $0x220] sm:$0xff]  }
 0x2a1   : > { %6239 = vmatprep.subr.bf16.mxu0 %v7835_v40 }
 0x2a2   : > { %6122 = vmatpush3.bf16.msra.mxu1 %v6531_v53  ;;  %v7790_v53 = vrot.slane %v4059_v48, 4  ;;  %v3354_v48 = vshll.u32 %v7675_v63, 16  ;;  %v6542_v63 = vld [vmem:[%s8191_s3 + $0x110] sm:$0xff]  }
 0x2a3   : > { %6123 = vmatprep.subr.bf16.mxu1 %v6532_v14 }
 0x2a5   : > { %6116 = vmatmul.mubr.bf16.gmra.mrb[4].mxu1 %v5509_v9  ;;  %v3341_v9 = vor.u32 %v7713_v55, %v7711_v38  ;;  %v6540_v38 = vld [vmem:[#allocation3 + $0x18] sm:$0xff]   ;;  %v4094_v55 = vshll.u32 %v7810_v47, 16  ;;  %v7880_v47 = vld [vmem:[#allocation3 + $0x20] sm:$0x1] }
 0x2a6   : > { %6124 = vmatpush3.bf16.msra.mxu1 %v6532_v14  ;;  %6135 = vmatprep.mubr.bf16.mxu1 %v6538_v16  ;;  %v3304_v14 = vrot.slane %v3303_v33, 4  ;;  %v3322_v16 = vrot.slane %v3320_v46, 5  ;;  %v3356_v33 = vrot.slane %v3354_v48, 5  ;;  %v3372_v46 = vshrl.u32 %v7648_v4, 16 }
 0x2a7   : > { %6125 = vmatprep.subr.bf16.mxu1 %v6533_v25  ;;  %v3342_v39 = vrot.slane %v3341_v9, 4  ;;  %v6543_v9 = vld [vmem:[%s8191_s3 + $0x118] sm:$0xff]   ;;  %v4693_v60 = vshll.u32 %v7880_v47, 16 }
 0x2a8   : > { %v3309_v5 = vsel %vm7036_vm6, %v3304_v14, %v3308_v6  ;;  %v3327_v43 = vor.u32 %v3326_v29, %v3322_v16  ;;  %v3323_v34 = vsel %vm7036_vm6, %v3318_v21, %v3322_v16  ;;  %v7856_v6 = vld [vmem:[%s8191_s3 + $0x208] sm:$0xff]   ;;  %v3380_v14 = vrot.slane %v3378_v12, 5  ;;  %v7878_v29 = vld [vmem:[#allocation3 + $0x1c] sm:$0xf] }
 0x2a9   : > { %v5462_v37 = vcombine.low %v3299_v20, %v3309_v5  ;;  %v3374_v20 = vrot.slane %v3372_v46, 4  ;;  %v4687_v21 = vshrl.u32 %v7878_v29, 16 }
 0x2aa   : > { %6126 = vmatpush3.bf16.msra.mxu1 %v6533_v25  ;;  %v3332_v25 = vrot.slane %v3330_v61, 5  ;;  %v3328_v30 = vrot.slane %v3327_v43, 4  ;;  %v4065_v61 = vsel %vm7036_vm6, %v7790_v53, %v7764_v11  ;;  %v4661_v53 = vld [vmem:[#allocation3 + $0x18] sm:$0xf] }
 0x2ab   : > { %6127 = vmatprep.subr.bf16.mxu1 %v6534_v41  ;;  %6063 = vmatprep.mubr.bf16.mxu0 %v5462_v37  ;;  %v5562_v16 = vcombine.low %v4055_v13, %v4065_v61  ;;  %v3375_v11 = vor.u32 %v3374_v20, %v3370_v24  ;;  %v4674_v5 = vshrl.u32 %v4661_v53, 16  ;;  %v4677_v43 = vshll.u32 %v4661_v53, 16 }
 0x2ac   : > { %v3333_v1 = vsel %vm7036_vm6, %v3328_v30, %v3332_v25  ;;  %v4683_v37 = vshll.u32 %v7878_v29, 16  ;;  %v4664_v25 = vld [vmem:[#allocation3 + $0x24] sm:$0xf] }
 0x2ad   : > { %v5463_v3 = vcombine.low %v3323_v34, %v3333_v1  ;;  %v3376_v30 = vrot.slane %v3375_v11, 4  ;;  %v4679_v36 = vrot.slane %v4677_v43, 5  ;;  %v4689_v34 = vrot.slane %v4687_v21, 4  ;;  %v7895_v1 = vld [vmem:[#allocation3 + $0x2c] sm:$0x1] }
 0x2ae   : > { %6128 = vmatpush3.bf16.msra.mxu1 %v6534_v41  ;;  %v6546_v41 = vld [vmem:[#allocation3 + $0x24] sm:$0xff]   ;;  %v4701_v48 = vshll.u32 %v4664_v25, 16  ;;  %v4717_v12 = vshll.u32 %v7895_v1, 16  ;;  %v7935_v43 = vld [vmem:[#allocation3 + $0x34] sm:$0xf] }
 0x2af   : > { %6129 = vmatprep.subr.bf16.mxu1 %v6535_v45  ;;  %6064 = vmatmul.mubr.bf16.vlgmr.msra.gmra.mrb[12].mxu0 %v5463_v3 }
 0x2b0   : > { %6240 = vmatpush3.bf16.msra.mxu0 %v7835_v40  ;;  %v4703_v7 = vrot.slane %v4701_v48, 5 }
 0x2b1   : > { %6241 = vmatprep.subr.bf16.mxu0 %v7856_v6 }
 0x2b2   : > { %6130 = vmatpush3.bf16.msra.mxu1 %v6535_v45  ;;  %v3346_v45 = vrot.slane %v3344_v35, 5  ;;  %v7892_v35 = vld [vmem:[#allocation3 + $0x28] sm:$0xf] }
 0x2b3   : > { %6131 = vmatprep.subr.bf16.mxu1 %v6536_v49  ;;  %v4711_v46 = vshrl.u32 %v7892_v35, 16 }
 0x2b4   : > { %v3351_v56 = vor.u32 %v3350_v23, %v3346_v45  ;;  %6242 = vmatpush3.bf16.msra.mxu0 %v7856_v6  ;;  %v4698_v23 = vshrl.u32 %v4664_v25, 16  ;;  %v4719_v25 = vrot.slane %v4717_v12, 5 }
 0x2b5   : > { %6243 = vmatprep.subr.bf16.mxu0 %v7875_v28  ;;  %v4713_v20 = vrot.slane %v4711_v46, 4 }
 0x2b6   : > { %6132 = vmatpush3.bf16.msra.mxu1 %v6536_v49  ;;  %v3347_v49 = vsel %vm7036_vm6, %v3342_v39, %v3346_v45  ;;  %v3352_v2 = vrot.slane %v3351_v56, 4  ;;  %v3381_v39 = vsel %vm7036_vm6, %v3376_v30, %v3380_v14  ;;  %v4695_v45 = vrot.slane %v4693_v60, 5  ;;  %v7923_v14 = vld [vmem:[#allocation3 + $0x2c] sm:$0x1] }
 0x2b7   : > { %6133 = vmatprep.subr.bf16.mxu1 %v6537_v50  ;;  %v5465_v3 = vcombine.low %v3371_v31, %v3381_v39  ;;  %v4083_v31 = vor.u32 %v7797_v52, %v7781_v17  ;;  %v4110_v60 = vshll.u32 %v7923_v14, 16 }
 0x2b8   : > { %v3357_v4 = vsel %vm7036_vm6, %v3352_v2, %v3356_v33  ;;  %v6544_v33 = vld [vmem:[%s8191_s3 + $0x120] sm:$0xff]   ;;  %v4700_v2 = vrot.slane %v4698_v23, 4  ;;  %6244 = vmatpush3.bf16.msra.mxu0 %v7875_v28 }
 0x2b9   : > { %v5464_v62 = vcombine.low %v3347_v49, %v3357_v4  ;;  %v4707_v49 = vshll.u32 %v7892_v35, 16  ;;  %v7914_v4 = vrot.slane %v4100_v59, 5  ;;  %v4039_v59 = vld [vmem:[#allocation3 + $0x30] sm:$0xf] }
 0x2ba   : > { %6134 = vmatpush3.bf16.msra.mxu1 %v6537_v50  ;;  %v6548_v50 = vld [vmem:[#allocation3 + $0x30] sm:$0xff]   ;;  %v4704_v24 = vor.u32 %v4703_v7, %v4700_v2  ;;  %v4118_v52 = vshll.u32 %v4039_v59, 16  ;;  %v4088_v2 = vrot.slane %v4086_v44, 5 }
 0x2bb   : > { %6143 = vmatprep.subr.bf16.mxu1 %v6539_v58  ;;  %6067 = vmatprep.mubr.bf16.mxu0 %v5464_v62  ;;  %v4709_v61 = vrot.slane %v4707_v49, 5  ;;  %v4941_v62 = vrot.slane %v7878_v29, 5  ;;  %v6545_v29 = vld [vmem:[%s8191_s3 + $0x128] sm:$0xff]  }
 0x2bc   : > { %6068 = vmatmul.mubr.bf16.gmra.mrb[16].mxu0 %v5465_v3  ;;  %v4705_v21 = vrot.slane %v4704_v24, 4  ;;  %v4120_v46 = vrot.slane %v4118_v52, 5  ;;  %v4313_v52 = vrot.slane %v7727_v27, 5 }
 0x2bd   : > { %6136 = vmatmul.mubr.bf16.vlgmr.msra.gmra.mrb[0].mxu1 %v6540_v38  ;;  %v4676_v38 = vrot.slane %v4674_v5, 4  ;;  %v4944_v5 = vrot.slane %v7880_v47, 5  ;;  %v4943_v30 = vrot.slane %v4941_v62, 4 }
 0x2be   : > { %6144 = vmatpush3.bf16.msra.mxu1 %v6539_v58  ;;  %6139 = vmatprep.mubr.bf16.mxu1 %v6546_v41  ;;  %v7887_v58 = vrot.slane %v4094_v55, 5  ;;  %v4685_v41 = vrot.slane %v4683_v37, 5  ;;  %v7901_v55 = vld [vmem:[%s8191_s3 + $0x218] sm:$0xff]  }
 0x2bf   : > { %6145 = vmatprep.subr.bf16.mxu1 %v6541_v51  ;;  %v4680_v56 = vor.u32 %v4679_v36, %v4676_v38  ;;  %6245 = vmatprep.subr.bf16.mxu0 %v7901_v55  ;;  %v4115_v38 = vshrl.u32 %v4039_v59, 16  ;;  %v7951_v36 = vld [vmem:[%s8191_s3 + $0x228] sm:$0xff]   ;;  %v4945_v39 = vsel %vm7143_vm10, %v4943_v30, %v4944_v5  ;;  %v7993_v59 = vld [vmem:[%s8191_s3 + $0x238] sm:$0xff]  }
 0x2c0   : > { %v4690_v57 = vor.u32 %v4689_v34, %v4685_v41  ;;  %6246 = vmatpush3.bf16.msra.mxu0 %v7901_v55  ;;  %v4128_v34 = vshrl.u32 %v7935_v43, 16  ;;  %v4097_v23 = vor.u32 %v7887_v58, %v7845_v22  ;;  %v7977_v22 = vld [vmem:[%s8191_s3 + $0x230] sm:$0xff]   ;;  %v4924_v58 = vld [vmem:[#allocation3 + $0x24] sm:$0xe] }
 0x2c1   : > { %6247 = vmatprep.subr.bf16.mxu0 %v7920_v15  ;;  %v4117_v7 = vrot.slane %v4115_v38, 4  ;;  %v5663_v24 = vrot.slane %v4924_v58, 9  ;;  %v4293_v58 = vld [vmem:[#allocation3 + $0x18] sm:$0xe] }
 0x2c2   : > { %6146 = vmatpush3.bf16.msra.mxu1 %v6541_v51  ;;  %v4923_v51 = vld [vmem:[#allocation3 + $0x18] sm:$0xe]  ;;  %v4691_v13 = vrot.slane %v4690_v57, 4  ;;  %v4948_v57 = vrot.slane %v7892_v35, 5  ;;  %v4098_v44 = vrot.slane %v4097_v23, 4 }
 0x2c3   : > { %6147 = vmatprep.subr.bf16.mxu1 %v6542_v63  ;;  %v6549_v35 = vld [vmem:[%s8191_s3 + $0x138] sm:$0xff]  }
 0x2c4   : > { %v4696_v53 = vsel %vm7036_vm6, %v4691_v13, %v4695_v45  ;;  %v6547_v45 = vld [vmem:[%s8191_s3 + $0x130] sm:$0xff]   ;;  %6248 = vmatpush3.bf16.msra.mxu0 %v7920_v15 }
 0x2c5   : > { %6140 = vmatmul.mubr.bf16.gmra.mrb[4].mxu1 %v6548_v50  ;;  %v5662_v50 = vrot.slane %v4923_v51, 9  ;;  %6249 = vmatprep.subr.bf16.mxu0 %v7951_v36 }
 0x2c6   : > { %6148 = vmatpush3.bf16.msra.mxu1 %v6542_v63  ;;  %6159 = vmatprep.mubr.bf16.mxu1 %v5562_v16  ;;  %v4681_v63 = vrot.slane %v4680_v56, 4  ;;  %v4106_v16 = vrot.slane %v4104_v8, 4  ;;  %v4714_v8 = vor.u32 %v4713_v20, %v4709_v61  ;;  %v4950_v20 = vrot.slane %v4948_v57, 4 }
 0x2c7   : > { %6149 = vmatprep.subr.bf16.mxu1 %v6543_v9  ;;  %v4942_v47 = vsel %vm7143_vm10, %v5662_v50, %v4941_v62  ;;  %v7982_v50 = vld [vmem:[#allocation3 + $0x38] sm:$0x1]  ;;  %v4951_v62 = vrot.slane %v7895_v1, 5  ;;  %v4103_v1 = vsel %vm7036_vm6, %v4098_v44, %v7914_v4 }
 0x2c8   : > { %v4686_v11 = vsel %vm7036_vm6, %v4681_v63, %v4685_v41  ;;  %v4124_v41 = vshll.u32 %v7935_v43, 16  ;;  %v4107_v48 = vor.u32 %v4106_v16, %v7914_v4  ;;  %v5682_v3 = vcombine.low %v4942_v47, %v4945_v39  ;;  %6250 = vmatpush3.bf16.msra.mxu0 %v7951_v36  ;;  %v6557_v44 = vld [vmem:[%s8191_s3 + $0x178] sm:$0xff]  }
 0x2c9   : > { %v7937_v37 = vcombine.low %v4686_v11, %v4696_v53  ;;  %v4130_v63 = vrot.slane %v4128_v34, 4  ;;  %6251 = vmatprep.subr.bf16.mxu0 %v7977_v22  ;;  %v4121_v53 = vor.u32 %v4120_v46, %v4117_v7  ;;  %v4324_v7 = vrot.slane %v7819_v19, 5  ;;  %v4294_v46 = vld [vmem:[#allocation3 + $0x24] sm:$0xe] }
 0x2ca   : > { %6150 = vmatpush3.bf16.msra.mxu1 %v6543_v9  ;;  %v4073_v9 = vor.u32 %v7779_v0, %v7773_v54  ;;  %v4710_v54 = vsel %vm7036_vm6, %v4705_v21, %v4709_v61  ;;  %v4715_v0 = vrot.slane %v4714_v8, 4  ;;  %6255 = vmatprep.mubr.bf16.mxu0 %v5682_v3  ;;  %v4126_v12 = vrot.slane %v4124_v41, 5  ;;  %v6553_v3 = vld [vmem:[%s8191_s3 + $0x158] sm:$0xff]  }
 0x2cb   : > { %6151 = vmatprep.subr.bf16.mxu1 %v6544_v33  ;;  %v4108_v13 = vrot.slane %v4107_v48, 4  ;;  %v4112_v61 = vrot.slane %v4110_v60, 5  ;;  %v4310_v8 = vrot.slane %v7722_v26, 5  ;;  %v4122_v4 = vrot.slane %v4121_v53, 4  ;;  %v6551_v26 = vld [vmem:[%s8191_s3 + $0x148] sm:$0xff]  }
 0x2cc   : > { %v4720_v51 = vsel %vm7036_vm6, %v4715_v0, %v4719_v25  ;;  %v4074_v49 = vrot.slane %v4073_v9, 4  ;;  %v4131_v5 = vor.u32 %v4130_v63, %v4126_v12  ;;  %v4292_v25 = vld [vmem:[#allocation3 + $0xc] sm:$0xe]  ;;  %6252 = vmatpush3.bf16.msra.mxu0 %v7977_v22  ;;  %v4949_v9 = vsel %vm7143_vm10, %v5663_v24, %v4948_v57  ;;  %v6554_v57 = vld [vmem:[%s8191_s3 + $0x160] sm:$0xff]  }
 0x2cd   : > { %v7968_v56 = vcombine.low %v4710_v54, %v4720_v51  ;;  %v4113_v21 = vsel %vm7036_vm6, %v4108_v13, %v4112_v61  ;;  %6253 = vmatprep.subr.bf16.mxu0 %v7993_v59  ;;  %v5574_v54 = vrot.slane %v4292_v25, 9  ;;  %v4312_v0 = vrot.slane %v4310_v8, 4  ;;  %v6574_v25 = vld [vmem:[#allocation3 + $0x18] sm:$0xff]  }
 0x2ce   : > { %6152 = vmatpush3.bf16.msra.mxu1 %v6544_v33  ;;  %v4084_v33 = vrot.slane %v4083_v31, 4  ;;  %v4079_v16 = vsel %vm7036_vm6, %v4074_v49, %v7781_v17  ;;  %v6550_v17 = vld [vmem:[%s8191_s3 + $0x140] sm:$0xff]   ;;  %v4952_v31 = vsel %vm7143_vm10, %v4950_v20, %v4951_v62  ;;  %v5564_v30 = vcombine.low %v4103_v1, %v4113_v21  ;;  %v6555_v49 = vld [vmem:[%s8191_s3 + $0x168] sm:$0xff]  }
 0x2cf   : > { %6153 = vmatprep.subr.bf16.mxu1 %v6545_v29  ;;  %v4132_v60 = vrot.slane %v4131_v5, 4  ;;  %v5683_v41 = vcombine.low %v4949_v9, %v4952_v31  ;;  %v4127_v34 = vsel %vm7036_vm6, %v4122_v4, %v4126_v12  ;;  %v4311_v27 = vsel %vm7143_vm10, %v5574_v54, %v4310_v8  ;;  %v6562_v8 = vld [vmem:[%s8191_s3 + $0x190] sm:$0xff]   ;;  %v6564_v9 = vld [vmem:[%s8191_s3 + $0x198] sm:$0xff]   ;;  %v6566_v31 = vld [vmem:[%s8191_s3 + $0x1a0] sm:$0xff]  }
 0x2d0   : > { %v4089_v11 = vsel %vm7036_vm6, %v4084_v33, %v4088_v2  ;;  %6254 = vmatpush3.bf16.msra.mxu0 %v7993_v59  ;;  %v4314_v23 = vsel %vm7143_vm10, %v4312_v0, %v4313_v52  ;;  %v4317_v33 = vrot.slane %v7752_v42, 5  ;;  %v6556_v2 = vld [vmem:[%s8191_s3 + $0x170] sm:$0xff]   ;;  %v5575_v12 = vrot.slane %v4293_v58, 9  ;;  %v6572_v4 = vld [vmem:[%s8191_s3 + $0x1b8] sm:$0xff]   ;;  %v6578_v54 = vld [vmem:[%s8191_s3 + $0x1c8] sm:$0xff]  }
 0x2d1   : > { %v5563_v47 = vcombine.low %v4079_v16, %v4089_v11  ;;  %v5594_v51 = vcombine.low %v4311_v27, %v4314_v23  ;;  %v5576_v42 = vrot.slane %v4294_v46, 9  ;;  %v4326_v13 = vrot.slane %v4324_v7, 4  ;;  %v4295_v16 = vld [vmem:[#allocation3 + $0x30] sm:$0xe]  ;;  %v6589_v52 = vld [vmem:[#allocation3 + $0x3c] sm:$0xff]  }
 0x2d2   : > { %6154 = vmatpush3.bf16.msra.mxu1 %v6545_v29  ;;  %v4134_v29 = vshll.u32 %v7982_v50, 16  ;;  %v4319_v63 = vrot.slane %v4317_v33, 4  ;;  %v4327_v61 = vrot.slane %v7923_v14, 5  ;;  %v4318_v24 = vsel %vm7143_vm10, %v5575_v12, %v4317_v33  ;;  %v6580_v0 = vld [vmem:[%s8191_s3 + $0x1d0] sm:$0xff]   ;;  %v8109_v58 = vld [vmem:[#allocation3 + $0x40] sm:$0xf] }
 0x2d3   : > { %6155 = vmatprep.subr.bf16.mxu1 %v6547_v45  ;;  %6256 = vmatmul.mubr.bf16.vlgmr.msra.gmra.mrb[20].mxu0 %v5683_v41  ;;  %v4331_v20 = vrot.slane %v7935_v43, 5  ;;  %v4325_v62 = vsel %vm7143_vm10, %v5576_v42, %v4324_v7  ;;  %v5577_v5 = vrot.slane %v4295_v16, 9  ;;  %v6560_v43 = vld [vmem:[%s8191_s3 + $0x188] sm:$0xff]   ;;  %v6582_v41 = vld [vmem:[%s8191_s3 + $0x1d8] sm:$0xff]   ;;  %v4962_v10 = vrot.slane %v8109_v58, 5 }
 0x2d4   : > { %v4136_v38 = vrot.slane %v4134_v29, 5  ;;  %v4328_v14 = vsel %vm7143_vm10, %v4326_v13, %v4327_v61  ;;  %v4669_v7 = vld [vmem:[#allocation3 + $0x38] sm:$0x1] }
 0x2d5   : > { %v5596_v53 = vcombine.low %v4325_v62, %v4328_v14  ;;  %v4333_v29 = vrot.slane %v4331_v20, 4  ;;  %v4332_v1 = vsel %vm7143_vm10, %v5577_v5, %v4331_v20  ;;  %v4741_v61 = vshll.u32 %v4669_v7, 16  ;;  %v6592_v62 = vld [vmem:[%s8191_s3 + $0x1f8] sm:$0xff]  }
 0x2d6   : > { %6156 = vmatpush3.bf16.msra.mxu1 %v6547_v45  ;;  %v4137_v39 = vsel %vm7036_vm6, %v4132_v60, %v4136_v38  ;;  %v6552_v45 = vld [vmem:[%s8191_s3 + $0x150] sm:$0xff]   ;;  %v6575_v60 = vld [vmem:[%s8191_s3 + $0x1c0] sm:$0xff]  }
 0x2d7   : > { %6157 = vmatprep.subr.bf16.mxu1 %v6549_v35  ;;  %v5565_v48 = vcombine.low %v4127_v34, %v4137_v39  ;;  %v6576_v38 = vld [vmem:[#allocation3 + $0x24] sm:$0xff]   ;;  %v4667_v34 = vld [vmem:[#allocation3 + $0x30] sm:$0xf]  ;;  %v8098_v39 = vld [vmem:[#allocation3 + $0x34] sm:$0xf] }
 0x2d8   : > { %v4722_v27 = vshrl.u32 %v4667_v34, 16  ;;  %v4725_v23 = vshll.u32 %v4667_v34, 16 }
 0x2da   : > { %6158 = vmatpush3.bf16.msra.mxu1 %v6549_v35  ;;  %v4320_v35 = vrot.slane %v7754_v32, 5  ;;  %v6558_v32 = vld [vmem:[%s8191_s3 + $0x180] sm:$0xff]  }
 0x2db   : > { %6167 = vmatprep.subr.bf16.mxu1 %v6550_v17 }
 0x2dc   : > { %v4321_v19 = vsel %vm7143_vm10, %v4319_v63, %v4320_v35  ;;  %v4755_v63 = vshll.u32 %v8109_v58, 16  ;;  %v4759_v35 = vshrl.u32 %v8109_v58, 16  ;;  %v5694_v58 = vld [vmem:[%s8192_s4] ss:$0 sm:$0xff] }
 0x2dd   : > { %6160 = vmatmul.mubr.bf16.vlgmr.msra.gmra.mrb[0].mxu1 %v5563_v47  ;;  %v5595_v11 = vcombine.low %v4318_v24, %v4321_v19  ;;  %v6568_v47 = vld [vmem:[%s8191_s3 + $0x1a8] sm:$0xff]  }
 0x2de   : > { %6168 = vmatpush3.bf16.msra.mxu1 %v6550_v17  ;;  %6163 = vmatprep.mubr.bf16.mxu1 %v5564_v30  ;;  %v4334_v17 = vrot.slane %v7982_v50, 5  ;;  %v6570_v30 = vld [vmem:[%s8191_s3 + $0x1b0] sm:$0xff]   ;;  %v4757_v20 = vrot.slane %v4755_v63, 5 }
 0x2df   : > { %6169 = vmatprep.subr.bf16.mxu1 %v6551_v26 }
 0x2e0   : > { %v4335_v21 = vsel %vm7143_vm10, %v4333_v29, %v4334_v17 }
 0x2e1   : > { %v5597_v50 = vcombine.low %v4332_v1, %v4335_v21  ;;  %v4955_v21 = vrot.slane %v8098_v39, 5 }
 0x2e2   : > { %6170 = vmatpush3.bf16.msra.mxu1 %v6551_v26  ;;  %v6588_v26 = vld [vmem:[#allocation3 + $0x30] sm:$0xff]  }
 0x2e3   : > { %6171 = vmatprep.subr.bf16.mxu1 %v6552_v45 }
 0x2e5   : > { %6164 = vmatmul.mubr.bf16.gmra.mrb[4].mxu1 %v5565_v48  ;;  %v4731_v48 = vshll.u32 %v8098_v39, 16 }
 0x2e6   : > { %6172 = vmatpush3.bf16.msra.mxu1 %v6552_v45  ;;  %6183 = vmatprep.mubr.bf16.mxu1 %v5594_v51  ;;  %v6584_v45 = vld [vmem:[%s8191_s3 + $0x1e0] sm:$0xff]   ;;  %v4735_v51 = vshrl.u32 %v8098_v39, 16 }
 0x2e7   : > { %6173 = vmatprep.subr.bf16.mxu1 %v6553_v3  ;;  %v4733_v33 = vrot.slane %v4731_v48, 5 }
 0x2ea   : > { %6174 = vmatpush3.bf16.msra.mxu1 %v6553_v3  ;;  %v6586_v3 = vld [vmem:[%s8191_s3 + $0x1e8] sm:$0xff]  }
 0x2eb   : > { %6175 = vmatprep.subr.bf16.mxu1 %v6554_v57 }
 0x2ee   : > { %6176 = vmatpush3.bf16.msra.mxu1 %v6554_v57  ;;  %v4670_v57 = vld [vmem:[#allocation3 + $0x3c] sm:$0xf] }
 0x2ef   : > { %6177 = vmatprep.subr.bf16.mxu1 %v6555_v49  ;;  %v4746_v46 = vshrl.u32 %v4670_v57, 16  ;;  %v4749_v12 = vshll.u32 %v4670_v57, 16 }
 0x2f1   : > { %v4748_v24 = vrot.slane %v4746_v46, 4  ;;  %v4751_v19 = vrot.slane %v4749_v12, 5 }
 0x2f2   : > { %6178 = vmatpush3.bf16.msra.mxu1 %v6555_v49  ;;  %v4724_v49 = vrot.slane %v4722_v27, 4 }
 0x2f3   : > { %6179 = vmatprep.subr.bf16.mxu1 %v6556_v2  ;;  %v4752_v5 = vor.u32 %v4751_v19, %v4748_v24 }
 0x2f6   : > { %6180 = vmatpush3.bf16.msra.mxu1 %v6556_v2  ;;  %v4737_v2 = vrot.slane %v4735_v51, 4 }
 0x2f7   : > { %6181 = vmatprep.subr.bf16.mxu1 %v6557_v44 }
 0x2f8   : > { %v4738_v13 = vor.u32 %v4737_v2, %v4733_v33 }
 0x2fa   : > { %6182 = vmatpush3.bf16.msra.mxu1 %v6557_v44  ;;  %v6590_v44 = vld [vmem:[%s8191_s3 + $0x1f0] sm:$0xff]   ;;  %v4739_v16 = vrot.slane %v4738_v13, 4 }
 0x2fb   : > { %6191 = vmatprep.subr.bf16.mxu1 %v6558_v32 }
 0x2fd   : > { %6184 = vmatmul.mubr.bf16.vlgmr.msra.gmra.mrb[0].mxu1 %v5595_v11  ;;  %v4743_v11 = vrot.slane %v4741_v61, 5 }
 0x2fe   : > { %6192 = vmatpush3.bf16.msra.mxu1 %v6558_v32  ;;  %6187 = vmatprep.mubr.bf16.mxu1 %v5596_v53  ;;  %v4761_v32 = vrot.slane %v4759_v35, 4  ;;  %v4672_v53 = vld [vmem:[#allocation3 + $0x44] sm:$0x1] }
 0x2ff   : > { %6193 = vmatprep.subr.bf16.mxu1 %v6560_v43  ;;  %v4765_v17 = vshll.u32 %v4672_v53, 16  ;;  %v4744_v1 = vsel %vm7036_vm6, %v4739_v16, %v4743_v11 }
 0x300   : > { %v4762_v29 = vor.u32 %v4761_v32, %v4757_v20 }
 0x302   : > { %6194 = vmatpush3.bf16.msra.mxu1 %v6560_v43 }
 0x303   : > { %6195 = vmatprep.subr.bf16.mxu1 %v6562_v8 }
 0x305   : > { %6188 = vmatmul.mubr.bf16.gmra.mrb[4].mxu1 %v5597_v50 }
 0x306   : > { %6196 = vmatpush3.bf16.msra.mxu1 %v6562_v8  ;;  %6207 = vmatprep.mubr.bf16.mxu1 %v6574_v25  ;;  %v4925_v8 = vld [vmem:[#allocation3 + $0x30] sm:$0xe]  ;;  %v4753_v25 = vrot.slane %v4752_v5, 4 }
 0x307   : > { %6197 = vmatprep.subr.bf16.mxu1 %v6564_v9 }
 0x30a   : > { %6198 = vmatpush3.bf16.msra.mxu1 %v6564_v9  ;;  %v4763_v9 = vrot.slane %v4762_v29, 4 }
 0x30b   : > { %6199 = vmatprep.subr.bf16.mxu1 %v6566_v31 }
 0x30e   : > { %6200 = vmatpush3.bf16.msra.mxu1 %v6566_v31  ;;  %v4767_v31 = vrot.slane %v4765_v17, 5 }
 0x30f   : > { %6201 = vmatprep.subr.bf16.mxu1 %v6568_v47 }
 0x312   : > { %6202 = vmatpush3.bf16.msra.mxu1 %v6568_v47  ;;  %v5664_v47 = vrot.slane %v4925_v8, 9 }
 0x313   : > { %6203 = vmatprep.subr.bf16.mxu1 %v6570_v30 }
 0x316   : > { %6204 = vmatpush3.bf16.msra.mxu1 %v6570_v30  ;;  %v4957_v30 = vrot.slane %v4955_v21, 4 }
 0x317   : > { %6205 = vmatprep.subr.bf16.mxu1 %v6572_v4 }
 0x31a   : > { %6206 = vmatpush3.bf16.msra.mxu1 %v6572_v4  ;;  %v4958_v4 = vrot.slane %v4669_v7, 5 }
 0x31b   : > { %6215 = vmatprep.subr.bf16.mxu1 %v6575_v60 }
 0x31d   : > { %6208 = vmatmul.mubr.bf16.vlgmr.msra.gmra.mrb[0].mxu1 %v6576_v38  ;;  %v4768_v38 = vsel %vm7036_vm6, %v4763_v9, %v4767_v31 }
 0x31e   : > { %6216 = vmatpush3.bf16.msra.mxu1 %v6575_v60  ;;  %6211 = vmatprep.mubr.bf16.mxu1 %v6588_v26  ;;  %v4758_v60 = vsel %vm7036_vm6, %v4753_v25, %v4757_v20  ;;  %v4956_v26 = vsel %vm7143_vm10, %v5664_v47, %v4955_v21 }
 0x31f   : > { %6217 = vmatprep.subr.bf16.mxu1 %v6578_v54 }
 0x322   : > { %6218 = vmatpush3.bf16.msra.mxu1 %v6578_v54  ;;  %v4959_v54 = vsel %vm7143_vm10, %v4957_v30, %v4958_v4 }
 0x323   : > { %6219 = vmatprep.subr.bf16.mxu1 %v6580_v0 }
 0x325   : > { %6212 = vmatmul.mubr.bf16.gmra.mrb[4].mxu1 %v6589_v52  ;;  %v4965_v52 = vrot.slane %v4672_v53, 5 }
 0x326   : > { %6220 = vmatpush3.bf16.msra.mxu1 %v6580_v0  ;;  %6231 = vmatprep.mubr.bf16.mxu1 %v7937_v37  ;;  %v4727_v37 = vrot.slane %v4725_v23, 5  ;;  %v5653_v0 = vcombine.low %v4758_v60, %v4768_v38 }
 0x327   : > { %6221 = vmatprep.subr.bf16.mxu1 %v6582_v41 }
 0x328   : > { %v4728_v42 = vor.u32 %v4727_v37, %v4724_v49 }
 0x32a   : > { %6222 = vmatpush3.bf16.msra.mxu1 %v6582_v41  ;;  %v4729_v14 = vrot.slane %v4728_v42, 4 }
 0x32b   : > { %6223 = vmatprep.subr.bf16.mxu1 %v6584_v45 }
 0x32c   : > { %v4734_v43 = vsel %vm7036_vm6, %v4729_v14, %v4733_v33 }
 0x32d   : > { %v5652_v50 = vcombine.low %v4734_v43, %v4744_v1 }
 0x32e   : > { %6224 = vmatpush3.bf16.msra.mxu1 %v6584_v45 }
 0x32f   : > { %6225 = vmatprep.subr.bf16.mxu1 %v6586_v3 }
 0x332   : > { %6226 = vmatpush3.bf16.msra.mxu1 %v6586_v3 }
 0x333   : > { %6227 = vmatprep.subr.bf16.mxu1 %v6590_v44 }
 0x336   : > { %6228 = vmatpush3.bf16.msra.mxu1 %v6590_v44 }
 0x337   : > { %6229 = vmatprep.subr.bf16.mxu1 %v6592_v62 }
 0x33a   : > { %6230 = vmatpush3.bf16.msra.mxu1 %v6592_v62 }
 0x33b   : > { %6263 = vmatprep.subr.bf16.mxu1 %v7835_v40 }
 0x33d   : > { %6232 = vmatmul.mubr.bf16.vlgmr.msra.gmra.mrb[0].mxu1 %v7968_v56  ;;  %v5684_v56 = vcombine.low %v4956_v26, %v4959_v54 }
 0x33e   : > { %6271 = vmatpush3.bf16.msra.mxu1 %v7835_v40  ;;  %6235 = vmatprep.mubr.bf16.mxu1 %v5652_v50  ;;  %v4926_v40 = vld [vmem:[#allocation3 + $0x3c] sm:$0xe] }
 0x33f   : > { %6264 = vmatprep.subr.bf16.mxu1 %v7856_v6  ;;  %v5665_v41 = vrot.slane %v4926_v40, 9 }
 0x342   : > { %6272 = vmatpush3.bf16.msra.mxu1 %v7856_v6  ;;  %v4964_v6 = vrot.slane %v4962_v10, 4 }
 0x343   : > { %6265 = vmatprep.subr.bf16.mxu1 %v7875_v28 }
 0x345   : > { %6236 = vmatmul.mubr.bf16.gmra.mrb[4].mxu1 %v5653_v0 }
 0x346   : > { %6273 = vmatpush3.bf16.msra.mxu1 %v7875_v28  ;;  %6259 = vmatprep.mubr.bf16.mxu1 %v5684_v56  ;;  %v4966_v28 = vsel %vm7143_vm10, %v4964_v6, %v4965_v52 }
 0x347   : > { %6266 = vmatprep.subr.bf16.mxu1 %v7901_v55 }
 0x34a   : > { %6274 = vmatpush3.bf16.msra.mxu1 %v7901_v55  ;;  %v4963_v55 = vsel %vm7143_vm10, %v5665_v41, %v4962_v10 }
 0x34b   : > { %6267 = vmatprep.subr.bf16.mxu1 %v7920_v15 }
 0x34e   : > { %6275 = vmatpush3.bf16.msra.mxu1 %v7920_v15  ;;  %v5685_v15 = vcombine.low %v4963_v55, %v4966_v28 }
 0x34f   : > { %6268 = vmatprep.subr.bf16.mxu1 %v7951_v36 }
 0x352   : > { %6276 = vmatpush3.bf16.msra.mxu1 %v7951_v36 }
 0x353   : > { %6269 = vmatprep.subr.bf16.mxu1 %v7977_v22 }
 0x356   : > { %6277 = vmatpush3.bf16.msra.mxu1 %v7977_v22 }
 0x357   : > { %6270 = vmatprep.subr.bf16.mxu1 %v7993_v59 }
 0x35a   : > { %6278 = vmatpush3.bf16.msra.mxu1 %v7993_v59 }
 0x35d   : > { %6260 = vmatmul.mubr.bf16.vlgmr.msra.gmra.mrb[4].mxu1 %v5685_v15 }
 0x382   : > { %v6065_v34 = vpop.f32.mrb[12].mxu0 }
 0x383   : > { %v3497_v39 = vpop.f32.mrb[13].mxu0 }
 0x384   : > { %v6066_v36 = vpop.f32.mrb[14].mxu0 }
 0x385   : > { %v3500_v45 = vpop.f32.mrb[15].mxu0 }
 0x38f   : > { %v6069_v27 = vpop.f32.mrb[16].mxu0 }
 0x390   : > { %v3513_v23 = vpop.f32.mrb[17].mxu0 }
 0x391   : > { %v6070_v48 = vpop.f32.mrb[18].mxu0 }
 0x392   : > { %v3516_v51 = vpop.f32.mrb[19].mxu0 }
 0x3a6   : > { %v6257_v3 = vpop.f32.mrb[20].mxu0 }
 0x3a7   : > { %v5082_v57 = vpop.f32.mrb[21].mxu0 }
 0x3a8   : > { %v6258_v22 = vpop.f32.mrb[22].mxu0 }
 0x3a9   : > { %v5085_v49 = vpop.f32.mrb[23].mxu0 }
 0x410   : > { %v6233_v18 = vpop.f32.mrb[0].mxu1 }
 0x411   : > { %v6279_v37 = vadd.f32 %v6233_v18, %v6065_v34  ;;  %v4884_v33 = vpop.f32.mrb[1].mxu1 }
 0x412   : > { %v6281_v2 = vadd.f32 %v4884_v33, %v3497_v39  ;;  %v6234_v59 = vpop.f32.mrb[2].mxu1 }
 0x413   : > { %v6283_v7 = vadd.f32 %v6234_v59, %v6066_v36  ;;  %v6280_v46 = vadd.f32 %v6279_v37, %v6257_v3  ;;  %v4887_v12 = vpop.f32.mrb[3].mxu1 }
 0x414   : > { %v6285_v63 = vadd.f32 %v4887_v12, %v3500_v45  ;;  %v6282_v35 = vadd.f32 %v6281_v2, %v5082_v57 }
 0x415   : > { %v5130_v44 = vadd.f32 %v6280_v46, %v5694_v58  ;;  %v6284_v42 = vadd.f32 %v6283_v7, %v6258_v22 }
 0x416   : > { %v5128_v13 = vadd.f32 %v6282_v35, %v5694_v58  ;;  %v6286_v61 = vadd.f32 %v6285_v63, %v5085_v49 }
 0x417   : > { %5139 = vst.msk [vmem:[%s6741_s12 + $0x10] sm:$0xff] %vm5136_vm3, %v5130_v44  ;;  %v5131_v24 = vadd.f32 %v6284_v42, %v5694_v58 }
 0x418   : > { %5137 = vst.msk [vmem:[%s6741_s12] sm:$0xff] %vm5136_vm3, %v5128_v13  ;;  %v5129_v19 = vadd.f32 %v6286_v61, %v5694_v58 }
 0x419   : > { %5140 = vst.msk [vmem:[%s6741_s12 + $0x18] sm:$0xff] %vm5136_vm3, %v5131_v24 }
 0x41a   : > { %5138 = vst.msk [vmem:[%s6741_s12 + $0x8] sm:$0xff] %vm5136_vm3, %v5129_v19 }
 0x430   : > { %v6261_v20 = vpop.f32.mrb[4].mxu1 }
 0x431   : > { %v6287_v32 = vadd.f32 %v6261_v20, %v6069_v27  ;;  %v5098_v62 = vpop.f32.mrb[5].mxu1 }
 0x432   : > { %v6288_v14 = vadd.f32 %v5098_v62, %v3513_v23  ;;  %v6262_v16 = vpop.f32.mrb[6].mxu1 }
 0x433   : > { %v5134_v11 = vadd.f32 %v6287_v32, %v5694_v58  ;;  %v6289_v53 = vadd.f32 %v6262_v16, %v6070_v48  ;;  %v5101_v5 = vpop.f32.mrb[7].mxu1 }
 0x434   : > { %v5132_v29 = vadd.f32 %v6288_v14, %v5694_v58  ;;  %v6290_v17 = vadd.f32 %v5101_v5, %v3516_v51 }
 0x435   : > { %5143 = vst.msk [vmem:[%s6741_s12 + $0x30] sm:$0xff] %vm5136_vm3, %v5134_v11  ;;  %v5135_v43 = vadd.f32 %v6289_v53, %v5694_v58 }
 0x436   : > { %5141 = vst.msk [vmem:[%s6741_s12 + $0x20] sm:$0xff] %vm5136_vm3, %v5132_v29  ;;  %v5133_v1 = vadd.f32 %v6290_v17, %v5694_v58 }
 0x437   : > { %5144 = vst.msk [vmem:[%s6741_s12 + $0x38] sm:$0xff] %vm5136_vm3, %v5135_v43 }
 0x438   : > { %5142 = vst.msk [vmem:[%s6741_s12 + $0x28] sm:$0xff] %vm5136_vm3, %v5133_v1 }
 0x439 PF: > { %s15_s22 = sadd.s32 1, %s6632_s22   ;;  %s8222_s18 = smov %s6624_s20 }
 0x43a   : > { %p12_p12 = scmp.ge.s32.totalorder %s15_s22, 10   ;;  %s8223_s19 = smov %s6628_s21 }
 0x43b   : > { %s8224_s20 = smov %s8227_s23  ;;  %s8225_s21 = smov %s8231_s24 }
 0x43c   :  { %14 = sbr.rel (!%p12_p12) target bundleno = 3 (0x3), region = 115 }

</bundles_post_ra>
